<compile_context>
chip_gen: v7x
topology: tpu7x:2x2x1
jax: 0.10.0
libtpu: 0.0.40
codegen_flags: <defaults>
</compile_context>

<pallas_src>
import functools

import jax
import jax.numpy as jnp
from jax import lax
from jax.experimental import pallas as pl
from jax.experimental.pallas import tpu as pltpu


# ----------------------------------------------------------------------------
# Conv 3x3 (pad=1) + bias + ReLU:  in-kernel im2col + lane-dense matmul
# ----------------------------------------------------------------------------
def _conv3x3_kernel(xp_ref, w_ref, b_ref, o_ref, *, H, W):
    # xp_ref: (1, Cin, H+2, W+2) f32   (halo'd input for one image)
    # w_ref : (Cout, 9*Cin)      bf16  (tap-major, channel-minor)
    # b_ref : (Cout, 1)          f32
    # o_ref : (1, Cout, H*W)     f32
    x = xp_ref[0]                                   # (Cin, H+2, W+2)
    cin = x.shape[0]
    # in-kernel im2col: 9 shifted taps, tap-major / channel-minor ordering.
    taps = jnp.concatenate(
        [x[:, ki:ki + H, kj:kj + W] for ki in range(3) for kj in range(3)],
        axis=0)                                     # (9*Cin, H, W)
    patches = taps.reshape(9 * cin, H * W).astype(jnp.bfloat16)
    acc = jnp.dot(w_ref[...], patches,
                  preferred_element_type=jnp.float32)   # (Cout, H*W) lane-dense
    acc = jnp.maximum(acc + b_ref[...], 0.0)
    o_ref[0] = acc


def conv3x3_relu(x, w, b):
    """x: (B, Cin, H, W), w: (Cout, Cin, 3, 3), b: (Cout,) -> (B, Cout, H, W)."""
    B, Cin, H, W = x.shape
    Cout = w.shape[0]
    xp = jnp.pad(x, ((0, 0), (0, 0), (1, 1), (1, 1))).astype(jnp.float32)
    # weight rows: index = (ki*3 + kj)*Cin + ci  (matches the in-kernel tap concat)
    wm = w.transpose(0, 2, 3, 1).reshape(Cout, 9 * Cin).astype(jnp.bfloat16)
    bm = b.reshape(Cout, 1).astype(jnp.float32)
    out = pl.pallas_call(
        functools.partial(_conv3x3_kernel, H=H, W=W),
        out_shape=jax.ShapeDtypeStruct((B, Cout, H * W), jnp.float32),
        grid=(B,),
        in_specs=[
            pl.BlockSpec((1, Cin, H + 2, W + 2), lambda i: (i, 0, 0, 0)),
            pl.BlockSpec((Cout, 9 * Cin), lambda i: (0, 0)),
            pl.BlockSpec((Cout, 1), lambda i: (0, 0)),
        ],
        out_specs=pl.BlockSpec((1, Cout, H * W), lambda i: (i, 0, 0)),
        compiler_params=pltpu.CompilerParams(dimension_semantics=("parallel",)),
    )(xp, wm, bm)
    # contiguous metadata reshape only (no transpose) -> stays channel-major.
    return out.reshape(B, Cout, H, W)


# ----------------------------------------------------------------------------
# Fused Gram-difference MSE:  sum_b || Gram(f1_b) - Gram(f2_b) ||^2  in one kernel
# ----------------------------------------------------------------------------
def _gram_mse_kernel(f1_ref, f2_ref, o_ref, *, inv_norm):
    # f1_ref/f2_ref: (B, C, HW) f32 ; o_ref: (1, 1) f32 (sum of squared diffs)
    B = f1_ref.shape[0]
    dn = (((1,), (1,)), ((), ()))          # contract on HW axis, no transpose needed
    total = jnp.zeros((), jnp.float32)
    for b in range(B):                     # small static batch -> unrolled
        a = f1_ref[b].astype(jnp.bfloat16)
        c = f2_ref[b].astype(jnp.bfloat16)
        g1 = lax.dot_general(a, a, dn, preferred_element_type=jnp.float32)
        g2 = lax.dot_general(c, c, dn, preferred_element_type=jnp.float32)
        d = (g1 - g2) * inv_norm
        total = total + jnp.sum(d * d)
    o_ref[...] = total.reshape(1, 1)


def gram_mse_loss(fa, fb):
    """MSE between per-sample Gram matrices of fa and fb, both (B, C, H, W)."""
    # TODO(synk): original gramloss.gram_matrix normalization unknown; using the
    # standard per-sample 1/(C*H*W) normalization.
    B, C, H, W = fa.shape
    HW = H * W
    fa2 = fa.reshape(B, C, HW).astype(jnp.float32)
    fb2 = fb.reshape(B, C, HW).astype(jnp.float32)
    s = pl.pallas_call(
        functools.partial(_gram_mse_kernel, inv_norm=1.0 / float(C * HW)),
        out_shape=jax.ShapeDtypeStruct((1, 1), jnp.float32),
        grid=(1,),
        in_specs=[
            pl.BlockSpec((B, C, HW), lambda i: (0, 0, 0)),
            pl.BlockSpec((B, C, HW), lambda i: (0, 0, 0)),
        ],
        out_specs=pl.BlockSpec((1, 1), lambda i: (0, 0)),
    )(fa2, fb2)
    return s[0, 0] / jnp.float32(B * C * C)


# ----------------------------------------------------------------------------
# Tiled MSE reduction (lane/sublane dense, bounded VMEM per grid step)
# ----------------------------------------------------------------------------
def _mse_sum_kernel(a_ref, b_ref, o_ref):
    @pl.when(pl.program_id(0) == 0)
    def _():
        o_ref[...] = jnp.zeros_like(o_ref)

    d = a_ref[...] - b_ref[...]
    o_ref[...] = o_ref[...] + jnp.sum(d * d).reshape(1, 1)


def mse_loss(a, b, max_tile_rows=512):
    """Mean squared error over all elements (matches nn.MSELoss(reduction='mean'))."""
    assert a.shape == b.shape
    n = a.size
    lanes = 128
    rows = -(-n // lanes)
    tr = min(max_tile_rows, ((rows + 7) // 8) * 8)     # sublane-aligned tile rows
    rows_p = ((rows + tr - 1) // tr) * tr
    pad = rows_p * lanes - n
    af = a.reshape(-1).astype(jnp.float32)
    bf = b.reshape(-1).astype(jnp.float32)
    if pad:
        af = jnp.pad(af, (0, pad))                     # zero pads contribute 0 to sum
        bf = jnp.pad(bf, (0, pad))
    a2 = af.reshape(rows_p, lanes)
    b2 = bf.reshape(rows_p, lanes)
    s = pl.pallas_call(
        _mse_sum_kernel,
        out_shape=jax.ShapeDtypeStruct((1, 1), jnp.float32),
        grid=(rows_p // tr,),
        in_specs=[
            pl.BlockSpec((tr, lanes), lambda i: (i, 0)),
            pl.BlockSpec((tr, lanes), lambda i: (i, 0)),
        ],
        out_specs=pl.BlockSpec((1, 1), lambda i: (0, 0)),
        compiler_params=pltpu.CompilerParams(dimension_semantics=("arbitrary",)),
    )(a2, b2)
    return s[0, 0] / jnp.float32(n)


# ----------------------------------------------------------------------------
# Synthetic VGG-style feature extractor (channel-major end-to-end, no transposes)
# ----------------------------------------------------------------------------
def maxpool2x2(x):
    # TODO(synk): 2x2 max-pool kept in XLA glue (bandwidth-trivial at these sizes).
    B, C, H, W = x.shape
    return x.reshape(B, C, H // 2, 2, W // 2, 2).max(axis=(3, 5))


def vgg_features(x, params):
    """x: (B, 3, H, W) NCHW -> dict of named NCHW feature maps."""
    feats = {}
    h = conv3x3_relu(x, params["conv1_1_w"], params["conv1_1_b"])
    feats["relu1_1"] = h
    h = conv3x3_relu(h, params["conv1_2_w"], params["conv1_2_b"])
    feats["relu1_2"] = h
    h = maxpool2x2(h)
    h = conv3x3_relu(h, params["conv2_1_w"], params["conv2_1_b"])
    feats["relu2_1"] = h
    return feats


def init_vgg_params(key):
    ks = jax.random.split(key, 6)
    scale = 0.1
    return {
        "conv1_1_w": scale * jax.random.normal(ks[0], (8, 3, 3, 3), jnp.float32),
        "conv1_1_b": scale * jax.random.normal(ks[1], (8,), jnp.float32),
        "conv1_2_w": scale * jax.random.normal(ks[2], (8, 8, 3, 3), jnp.float32),
        "conv1_2_b": scale * jax.random.normal(ks[3], (8,), jnp.float32),
        "conv2_1_w": scale * jax.random.normal(ks[4], (16, 8, 3, 3), jnp.float32),
        "conv2_1_b": scale * jax.random.normal(ks[5], (16,), jnp.float32),
    }


# ----------------------------------------------------------------------------
# StyleLoss forward (faithful to the PyTorch module's semantics)
# ----------------------------------------------------------------------------
class StyleLoss:
    def __init__(self, wt_feat, wt_gram, feat_layers=(), gram_layers=(), params=None):
        self.wt_feat = wt_feat
        self.wt_gram = wt_gram
        self.feat_layers = list(feat_layers)
        self.gram_layers = list(gram_layers)
        self.params = params
        # loss='l2' -> MSE with mean reduction

    def __call__(self, x, y):
        B = x.shape[0]
        # Run the feature extractor ONCE on the concatenated batch (halves launches).
        z = jnp.concatenate([x, y], axis=0)
        feats = vgg_features(z, self.params)
        f1 = {k: v[:B] for k, v in feats.items()}
        f2 = {k: v[B:] for k, v in feats.items()}

        feat_loss = jnp.float32(0.0)
        for l, wt in self.feat_layers:
            feat_loss = feat_loss + mse_loss(f1[l], f2[l]) * wt

        gram_loss = jnp.float32(0.0)
        for l, wt in self.gram_layers:   # NOTE: original module ignores `wt` here — kept faithful
            gram_loss = gram_loss + gram_mse_loss(f1[l], f2[l])

        return feat_loss * self.wt_feat + gram_loss * self.wt_gram


# ----------------------------------------------------------------------------
if __name__ == "__main__":
    key = jax.random.PRNGKey(0)
    kp, kx, ky = jax.random.split(key, 3)

    params = init_vgg_params(kp)
    # small NCHW inputs, 3 channels like VGG
    x = jax.random.normal(kx, (2, 3, 16, 16), jnp.float32)
    y = jax.random.normal(ky, (2, 3, 16, 16), jnp.float32)

    style_loss = StyleLoss(
        wt_feat=1.0,
        wt_gram=10.0,
        feat_layers=[("relu1_1", 1.0), ("relu1_2", 0.5)],
        gram_layers=[("relu2_1", 1.0)],
        params=params,
    )

    total = jax.jit(style_loss.__call__)(x, y)
    jax.block_until_ready(total)
    assert total.shape == () and bool(jnp.isfinite(total))
    print("KERNEL_OK")
</pallas_src>

<mosaic_0001>
module attributes {stable_mosaic.version = 11 : i64} {
  func.func @_conv3x3_kernel(%arg0: i32, %arg1: memref<1x3x18x18xf32, #tpu.memory_space<vmem>>, %arg2: memref<8x27xbf16, #tpu.memory_space<vmem>>, %arg3: memref<8x1xf32, #tpu.memory_space<vmem>>, %arg4: memref<1x8x256xf32, #tpu.memory_space<vmem>>) attributes {dimension_semantics = [#tpu.dimension_semantics<parallel>], iteration_bounds = array<i64: 4>, scalar_prefetch = 0 : i64, scratch_operands = 0 : i64, tpu.core_type = #tpu.core_type<tc>, window_params = [{transform_indices = @transform_0, window_bounds = array<i64: 1, 3, 18, 18>}, {pipeline_mode = #tpu.pipeline_mode<synchronous>, transform_indices = @transform_1, window_bounds = array<i64: 8, 27>}, {pipeline_mode = #tpu.pipeline_mode<synchronous>, transform_indices = @transform_2, window_bounds = array<i64: 8, 1>}, {transform_indices = @transform_3, window_bounds = array<i64: 1, 8, 256>}]} {
    %c0 = arith.constant 0 : index
    %c0_0 = arith.constant 0 : index
    %c0_1 = arith.constant 0 : index
    %c0_2 = arith.constant 0 : index
    %0 = vector.load %arg1[%c0, %c0_0, %c0_1, %c0_2] : memref<1x3x18x18xf32, #tpu.memory_space<vmem>>, vector<1x3x18x18xf32>
    %1 = vector.shape_cast %0 : vector<1x3x18x18xf32> to vector<3x18x18xf32>
    %2 = vector.extract_strided_slice %1 {offsets = [0, 0, 0], sizes = [3, 16, 16], strides = [1, 1, 1]} : vector<3x18x18xf32> to vector<3x16x16xf32>
    %3 = vector.extract_strided_slice %1 {offsets = [0, 0, 1], sizes = [3, 16, 16], strides = [1, 1, 1]} : vector<3x18x18xf32> to vector<3x16x16xf32>
    %4 = vector.extract_strided_slice %1 {offsets = [0, 0, 2], sizes = [3, 16, 16], strides = [1, 1, 1]} : vector<3x18x18xf32> to vector<3x16x16xf32>
    %5 = vector.extract_strided_slice %1 {offsets = [0, 1, 0], sizes = [3, 16, 16], strides = [1, 1, 1]} : vector<3x18x18xf32> to vector<3x16x16xf32>
    %6 = vector.extract_strided_slice %1 {offsets = [0, 1, 1], sizes = [3, 16, 16], strides = [1, 1, 1]} : vector<3x18x18xf32> to vector<3x16x16xf32>
    %7 = vector.extract_strided_slice %1 {offsets = [0, 1, 2], sizes = [3, 16, 16], strides = [1, 1, 1]} : vector<3x18x18xf32> to vector<3x16x16xf32>
    %8 = vector.extract_strided_slice %1 {offsets = [0, 2, 0], sizes = [3, 16, 16], strides = [1, 1, 1]} : vector<3x18x18xf32> to vector<3x16x16xf32>
    %9 = vector.extract_strided_slice %1 {offsets = [0, 2, 1], sizes = [3, 16, 16], strides = [1, 1, 1]} : vector<3x18x18xf32> to vector<3x16x16xf32>
    %10 = vector.extract_strided_slice %1 {offsets = [0, 2, 2], sizes = [3, 16, 16], strides = [1, 1, 1]} : vector<3x18x18xf32> to vector<3x16x16xf32>
    %11 = tpu.concatenate %2, %3, %4, %5, %6, %7, %8, %9, %10 in 0 : vector<3x16x16xf32>, vector<3x16x16xf32>, vector<3x16x16xf32>, vector<3x16x16xf32>, vector<3x16x16xf32>, vector<3x16x16xf32>, vector<3x16x16xf32>, vector<3x16x16xf32>, vector<3x16x16xf32> -> vector<27x16x16xf32>
    %12 = vector.shape_cast %11 : vector<27x16x16xf32> to vector<27x256xf32>
    %13 = arith.truncf %12 : vector<27x256xf32> to vector<27x256xbf16>
    %c0_3 = arith.constant 0 : index
    %c0_4 = arith.constant 0 : index
    %14 = vector.load %arg2[%c0_3, %c0_4] : memref<8x27xbf16, #tpu.memory_space<vmem>>, vector<8x27xbf16>
    %cst = arith.constant dense<0.000000e+00> : vector<8x256xf32>
    %15 = tpu.matmul %14, %13, %cst {dimension_numbers = #tpu.dot_dimension_numbers<[1], [0], [0], [1], [0, 0, 1, 1], [], []>} : vector<8x27xbf16>, vector<27x256xbf16>, vector<8x256xf32> -> vector<8x256xf32>
    %c0_5 = arith.constant 0 : index
    %c0_6 = arith.constant 0 : index
    %16 = vector.load %arg3[%c0_5, %c0_6] : memref<8x1xf32, #tpu.memory_space<vmem>>, vector<8x1xf32>
    %17 = vector.broadcast %16 : vector<8x1xf32> to vector<8x256xf32>
    %18 = arith.addf %15, %17 : vector<8x256xf32>
    %cst_7 = arith.constant 0.000000e+00 : f32
    %19 = vector.broadcast %cst_7 : f32 to vector<8x256xf32>
    %20 = arith.maximumf %18, %19 : vector<8x256xf32>
    %c0_8 = arith.constant 0 : index
    %c0_9 = arith.constant 0 : index
    %c0_10 = arith.constant 0 : index
    %21 = vector.load %arg4[%c0_8, %c0_9, %c0_10] : memref<1x8x256xf32, #tpu.memory_space<vmem>>, vector<1x8x256xf32>
    %22 = vector.shape_cast %21 : vector<1x8x256xf32> to vector<8x256xf32>
    %23 = vector.shape_cast %20 : vector<8x256xf32> to vector<1x8x256xf32>
    tpu.vector_store %arg4[%c0_8, %c0_9, %c0_10], %23 {strides = array<i32>} : memref<1x8x256xf32, #tpu.memory_space<vmem>>, vector<1x8x256xf32>,
    return
  }
  func.func @transform_0(%arg0: i32) -> (i32, i32, i32, i32) {
    %c0_i32 = arith.constant 0 : i32
    %c0_i32_0 = arith.constant 0 : i32
    %c0_i32_1 = arith.constant 0 : i32
    %c0_i32_2 = arith.constant 0 : i32
    return %arg0, %c0_i32, %c0_i32_0, %c0_i32_1 : i32, i32, i32, i32
  }
  func.func @transform_1(%arg0: i32) -> (i32, i32) {
    %c0_i32 = arith.constant 0 : i32
    %c0_i32_0 = arith.constant 0 : i32
    %c0_i32_1 = arith.constant 0 : i32
    return %c0_i32, %c0_i32_0 : i32, i32
  }
  func.func @transform_2(%arg0: i32) -> (i32, i32) {
    %c0_i32 = arith.constant 0 : i32
    %c0_i32_0 = arith.constant 0 : i32
    %c0_i32_1 = arith.constant 0 : i32
    return %c0_i32, %c0_i32_0 : i32, i32
  }
  func.func @transform_3(%arg0: i32) -> (i32, i32, i32) {
    %c0_i32 = arith.constant 0 : i32
    %c0_i32_0 = arith.constant 0 : i32
    %c0_i32_1 = arith.constant 0 : i32
    return %arg0, %c0_i32, %c0_i32_0 : i32, i32, i32
  }
}

module attributes {stable_mosaic.version = 11 : i64} {
  func.func @_mse_sum_kernel(%arg0: i32, %arg1: memref<32x128xf32, #tpu.memory_space<vmem>>, %arg2: memref<32x128xf32, #tpu.memory_space<vmem>>, %arg3: memref<1x1xf32, #tpu.memory_space<vmem>>) attributes {dimension_semantics = [#tpu.dimension_semantics<arbitrary>], iteration_bounds = array<i64: 1>, scalar_prefetch = 0 : i64, scratch_operands = 0 : i64, tpu.core_type = #tpu.core_type<tc>, window_params = [{transform_indices = @transform_0, window_bounds = array<i64: 32, 128>}, {transform_indices = @transform_1, window_bounds = array<i64: 32, 128>}, {pipeline_mode = #tpu.pipeline_mode<synchronous>, transform_indices = @transform_2, window_bounds = array<i64: 1, 1>}]} {
    %c0_i32 = arith.constant 0 : i32
    %0 = arith.cmpi eq, %arg0, %c0_i32 : i32
    %1 = arith.extui %0 : i1 to i32
    %c0_i32_0 = arith.constant 0 : i32
    %2 = arith.cmpi ne, %1, %c0_i32_0 : i32
    scf.if %2 {
      %cst_8 = arith.constant 0.000000e+00 : f32
      %15 = vector.broadcast %cst_8 : f32 to vector<1x1xf32>
      %c0_9 = arith.constant 0 : index
      %c0_10 = arith.constant 0 : index
      %16 = vector.load %arg3[%c0_9, %c0_10] : memref<1x1xf32, #tpu.memory_space<vmem>>, vector<1x1xf32>
      tpu.vector_store %arg3[%c0_9, %c0_10], %15 {strides = array<i32>} : memref<1x1xf32, #tpu.memory_space<vmem>>, vector<1x1xf32>,
    } else {
    }
    %c0 = arith.constant 0 : index
    %c0_1 = arith.constant 0 : index
    %3 = vector.load %arg1[%c0, %c0_1] : memref<32x128xf32, #tpu.memory_space<vmem>>, vector<32x128xf32>
    %c0_2 = arith.constant 0 : index
    %c0_3 = arith.constant 0 : index
    %4 = vector.load %arg2[%c0_2, %c0_3] : memref<32x128xf32, #tpu.memory_space<vmem>>, vector<32x128xf32>
    %5 = arith.subf %3, %4 : vector<32x128xf32>
    %c0_4 = arith.constant 0 : index
    %c0_5 = arith.constant 0 : index
    %6 = vector.load %arg3[%c0_4, %c0_5] : memref<1x1xf32, #tpu.memory_space<vmem>>, vector<1x1xf32>
    %7 = arith.mulf %5, %5 : vector<32x128xf32>
    %8 = vector.shape_cast %7 : vector<32x128xf32> to vector<1x32x128xf32>
    %cst = arith.constant dense<0.000000e+00> : vector<1xf32>
    %9 = vector.multi_reduction <add>, %8, %cst [1, 2] : vector<1x32x128xf32> to vector<1xf32>
    %10 = vector.shape_cast %9 : vector<1xf32> to vector<1x1x1xf32>
    %11 = vector.extract %10[0, 0, 0] : f32 from vector<1x1x1xf32>
    %12 = vector.broadcast %11 : f32 to vector<1x1xf32>
    %13 = arith.addf %6, %12 : vector<1x1xf32>
    %c0_6 = arith.constant 0 : index
    %c0_7 = arith.constant 0 : index
    %14 = vector.load %arg3[%c0_6, %c0_7] : memref<1x1xf32, #tpu.memory_space<vmem>>, vector<1x1xf32>
    tpu.vector_store %arg3[%c0_6, %c0_7], %13 {strides = array<i32>} : memref<1x1xf32, #tpu.memory_space<vmem>>, vector<1x1xf32>,
    return
  }
  func.func @transform_0(%arg0: i32) -> (i32, i32) {
    %c0_i32 = arith.constant 0 : i32
    %c0_i32_0 = arith.constant 0 : i32
    return %arg0, %c0_i32 : i32, i32
  }
  func.func @transform_1(%arg0: i32) -> (i32, i32) {
    %c0_i32 = arith.constant 0 : i32
    %c0_i32_0 = arith.constant 0 : i32
    return %arg0, %c0_i32 : i32, i32
  }
  func.func @transform_2(%arg0: i32) -> (i32, i32) {
    %c0_i32 = arith.constant 0 : i32
    %c0_i32_0 = arith.constant 0 : i32
    %c0_i32_1 = arith.constant 0 : i32
    return %c0_i32, %c0_i32_0 : i32, i32
  }
}

module attributes {stable_mosaic.version = 11 : i64} {
  func.func @_conv3x3_kernel(%arg0: i32, %arg1: memref<1x8x18x18xf32, #tpu.memory_space<vmem>>, %arg2: memref<8x72xbf16, #tpu.memory_space<vmem>>, %arg3: memref<8x1xf32, #tpu.memory_space<vmem>>, %arg4: memref<1x8x256xf32, #tpu.memory_space<vmem>>) attributes {dimension_semantics = [#tpu.dimension_semantics<parallel>], iteration_bounds = array<i64: 4>, scalar_prefetch = 0 : i64, scratch_operands = 0 : i64, tpu.core_type = #tpu.core_type<tc>, window_params = [{transform_indices = @transform_0, window_bounds = array<i64: 1, 8, 18, 18>}, {pipeline_mode = #tpu.pipeline_mode<synchronous>, transform_indices = @transform_1, window_bounds = array<i64: 8, 72>}, {pipeline_mode = #tpu.pipeline_mode<synchronous>, transform_indices = @transform_2, window_bounds = array<i64: 8, 1>}, {transform_indices = @transform_3, window_bounds = array<i64: 1, 8, 256>}]} {
    %c0 = arith.constant 0 : index
    %c0_0 = arith.constant 0 : index
    %c0_1 = arith.constant 0 : index
    %c0_2 = arith.constant 0 : index
    %0 = vector.load %arg1[%c0, %c0_0, %c0_1, %c0_2] : memref<1x8x18x18xf32, #tpu.memory_space<vmem>>, vector<1x8x18x18xf32>
    %1 = vector.shape_cast %0 : vector<1x8x18x18xf32> to vector<8x18x18xf32>
    %2 = vector.extract_strided_slice %1 {offsets = [0, 0, 0], sizes = [8, 16, 16], strides = [1, 1, 1]} : vector<8x18x18xf32> to vector<8x16x16xf32>
    %3 = vector.extract_strided_slice %1 {offsets = [0, 0, 1], sizes = [8, 16, 16], strides = [1, 1, 1]} : vector<8x18x18xf32> to vector<8x16x16xf32>
    %4 = vector.extract_strided_slice %1 {offsets = [0, 0, 2], sizes = [8, 16, 16], strides = [1, 1, 1]} : vector<8x18x18xf32> to vector<8x16x16xf32>
    %5 = vector.extract_strided_slice %1 {offsets = [0, 1, 0], sizes = [8, 16, 16], strides = [1, 1, 1]} : vector<8x18x18xf32> to vector<8x16x16xf32>
    %6 = vector.extract_strided_slice %1 {offsets = [0, 1, 1], sizes = [8, 16, 16], strides = [1, 1, 1]} : vector<8x18x18xf32> to vector<8x16x16xf32>
    %7 = vector.extract_strided_slice %1 {offsets = [0, 1, 2], sizes = [8, 16, 16], strides = [1, 1, 1]} : vector<8x18x18xf32> to vector<8x16x16xf32>
    %8 = vector.extract_strided_slice %1 {offsets = [0, 2, 0], sizes = [8, 16, 16], strides = [1, 1, 1]} : vector<8x18x18xf32> to vector<8x16x16xf32>
    %9 = vector.extract_strided_slice %1 {offsets = [0, 2, 1], sizes = [8, 16, 16], strides = [1, 1, 1]} : vector<8x18x18xf32> to vector<8x16x16xf32>
    %10 = vector.extract_strided_slice %1 {offsets = [0, 2, 2], sizes = [8, 16, 16], strides = [1, 1, 1]} : vector<8x18x18xf32> to vector<8x16x16xf32>
    %11 = tpu.concatenate %2, %3, %4, %5, %6, %7, %8, %9, %10 in 0 : vector<8x16x16xf32>, vector<8x16x16xf32>, vector<8x16x16xf32>, vector<8x16x16xf32>, vector<8x16x16xf32>, vector<8x16x16xf32>, vector<8x16x16xf32>, vector<8x16x16xf32>, vector<8x16x16xf32> -> vector<72x16x16xf32>
    %12 = vector.shape_cast %11 : vector<72x16x16xf32> to vector<72x256xf32>
    %13 = arith.truncf %12 : vector<72x256xf32> to vector<72x256xbf16>
    %c0_3 = arith.constant 0 : index
    %c0_4 = arith.constant 0 : index
    %14 = vector.load %arg2[%c0_3, %c0_4] : memref<8x72xbf16, #tpu.memory_space<vmem>>, vector<8x72xbf16>
    %cst = arith.constant dense<0.000000e+00> : vector<8x256xf32>
    %15 = tpu.matmul %14, %13, %cst {dimension_numbers = #tpu.dot_dimension_numbers<[1], [0], [0], [1], [0, 0, 1, 1], [], []>} : vector<8x72xbf16>, vector<72x256xbf16>, vector<8x256xf32> -> vector<8x256xf32>
    %c0_5 = arith.constant 0 : index
    %c0_6 = arith.constant 0 : index
    %16 = vector.load %arg3[%c0_5, %c0_6] : memref<8x1xf32, #tpu.memory_space<vmem>>, vector<8x1xf32>
    %17 = vector.broadcast %16 : vector<8x1xf32> to vector<8x256xf32>
    %18 = arith.addf %15, %17 : vector<8x256xf32>
    %cst_7 = arith.constant 0.000000e+00 : f32
    %19 = vector.broadcast %cst_7 : f32 to vector<8x256xf32>
    %20 = arith.maximumf %18, %19 : vector<8x256xf32>
    %c0_8 = arith.constant 0 : index
    %c0_9 = arith.constant 0 : index
    %c0_10 = arith.constant 0 : index
    %21 = vector.load %arg4[%c0_8, %c0_9, %c0_10] : memref<1x8x256xf32, #tpu.memory_space<vmem>>, vector<1x8x256xf32>
    %22 = vector.shape_cast %21 : vector<1x8x256xf32> to vector<8x256xf32>
    %23 = vector.shape_cast %20 : vector<8x256xf32> to vector<1x8x256xf32>
    tpu.vector_store %arg4[%c0_8, %c0_9, %c0_10], %23 {strides = array<i32>} : memref<1x8x256xf32, #tpu.memory_space<vmem>>, vector<1x8x256xf32>,
    return
  }
  func.func @transform_0(%arg0: i32) -> (i32, i32, i32, i32) {
    %c0_i32 = arith.constant 0 : i32
    %c0_i32_0 = arith.constant 0 : i32
    %c0_i32_1 = arith.constant 0 : i32
    %c0_i32_2 = arith.constant 0 : i32
    return %arg0, %c0_i32, %c0_i32_0, %c0_i32_1 : i32, i32, i32, i32
  }
  func.func @transform_1(%arg0: i32) -> (i32, i32) {
    %c0_i32 = arith.constant 0 : i32
    %c0_i32_0 = arith.constant 0 : i32
    %c0_i32_1 = arith.constant 0 : i32
    return %c0_i32, %c0_i32_0 : i32, i32
  }
  func.func @transform_2(%arg0: i32) -> (i32, i32) {
    %c0_i32 = arith.constant 0 : i32
    %c0_i32_0 = arith.constant 0 : i32
    %c0_i32_1 = arith.constant 0 : i32
    return %c0_i32, %c0_i32_0 : i32, i32
  }
  func.func @transform_3(%arg0: i32) -> (i32, i32, i32) {
    %c0_i32 = arith.constant 0 : i32
    %c0_i32_0 = arith.constant 0 : i32
    %c0_i32_1 = arith.constant 0 : i32
    return %arg0, %c0_i32, %c0_i32_0 : i32, i32, i32
  }
}

module attributes {stable_mosaic.version = 11 : i64} {
  func.func @_gram_mse_kernel(%arg0: i32, %arg1: memref<2x16x64xf32, #tpu.memory_space<vmem>>, %arg2: memref<2x16x64xf32, #tpu.memory_space<vmem>>, %arg3: memref<1x1xf32, #tpu.memory_space<vmem>>) attributes {dimension_semantics = [#tpu.dimension_semantics<arbitrary>], iteration_bounds = array<i64: 1>, scalar_prefetch = 0 : i64, scratch_operands = 0 : i64, tpu.core_type = #tpu.core_type<tc>, window_params = [{pipeline_mode = #tpu.pipeline_mode<synchronous>, transform_indices = @transform_0, window_bounds = array<i64: 2, 16, 64>}, {pipeline_mode = #tpu.pipeline_mode<synchronous>, transform_indices = @transform_1, window_bounds = array<i64: 2, 16, 64>}, {pipeline_mode = #tpu.pipeline_mode<synchronous>, transform_indices = @transform_2, window_bounds = array<i64: 1, 1>}]} {
    %c0 = arith.constant 0 : index
    %c0_0 = arith.constant 0 : index
    %c0_1 = arith.constant 0 : index
    %0 = vector.load %arg1[%c0, %c0_0, %c0_1] : memref<2x16x64xf32, #tpu.memory_space<vmem>>, vector<1x16x64xf32>
    %1 = vector.shape_cast %0 : vector<1x16x64xf32> to vector<16x64xf32>
    %2 = arith.truncf %1 : vector<16x64xf32> to vector<16x64xbf16>
    %c0_2 = arith.constant 0 : index
    %c0_3 = arith.constant 0 : index
    %c0_4 = arith.constant 0 : index
    %3 = vector.load %arg2[%c0_2, %c0_3, %c0_4] : memref<2x16x64xf32, #tpu.memory_space<vmem>>, vector<1x16x64xf32>
    %4 = vector.shape_cast %3 : vector<1x16x64xf32> to vector<16x64xf32>
    %5 = arith.truncf %4 : vector<16x64xf32> to vector<16x64xbf16>
    %cst = arith.constant dense<0.000000e+00> : vector<16x16xf32>
    %6 = tpu.matmul %2, %2, %cst {dimension_numbers = #tpu.dot_dimension_numbers<[1], [1], [0], [0], [0, 0, 1, 0], [], []>} : vector<16x64xbf16>, vector<16x64xbf16>, vector<16x16xf32> -> vector<16x16xf32>
    %cst_5 = arith.constant dense<0.000000e+00> : vector<16x16xf32>
    %7 = tpu.matmul %5, %5, %cst_5 {dimension_numbers = #tpu.dot_dimension_numbers<[1], [1], [0], [0], [0, 0, 1, 0], [], []>} : vector<16x64xbf16>, vector<16x64xbf16>, vector<16x16xf32> -> vector<16x16xf32>
    %8 = arith.subf %6, %7 : vector<16x16xf32>
    %cst_6 = arith.constant 9.765625E-4 : f32
    %9 = vector.broadcast %cst_6 : f32 to vector<16x16xf32>
    %10 = arith.mulf %8, %9 : vector<16x16xf32>
    %11 = arith.mulf %10, %10 : vector<16x16xf32>
    %12 = vector.shape_cast %11 : vector<16x16xf32> to vector<1x16x16xf32>
    %cst_7 = arith.constant dense<0.000000e+00> : vector<1xf32>
    %13 = vector.multi_reduction <add>, %12, %cst_7 [1, 2] : vector<1x16x16xf32> to vector<1xf32>
    %14 = vector.shape_cast %13 : vector<1xf32> to vector<1x1x1xf32>
    %15 = vector.extract %14[0, 0, 0] : f32 from vector<1x1x1xf32>
    %cst_8 = arith.constant 0.000000e+00 : f32
    %16 = arith.addf %cst_8, %15 : f32
    %c1 = arith.constant 1 : index
    %c0_9 = arith.constant 0 : index
    %c0_10 = arith.constant 0 : index
    %17 = vector.load %arg1[%c1, %c0_9, %c0_10] : memref<2x16x64xf32, #tpu.memory_space<vmem>>, vector<1x16x64xf32>
    %18 = vector.shape_cast %17 : vector<1x16x64xf32> to vector<16x64xf32>
    %19 = arith.truncf %18 : vector<16x64xf32> to vector<16x64xbf16>
    %c1_11 = arith.constant 1 : index
    %c0_12 = arith.constant 0 : index
    %c0_13 = arith.constant 0 : index
    %20 = vector.load %arg2[%c1_11, %c0_12, %c0_13] : memref<2x16x64xf32, #tpu.memory_space<vmem>>, vector<1x16x64xf32>
    %21 = vector.shape_cast %20 : vector<1x16x64xf32> to vector<16x64xf32>
    %22 = arith.truncf %21 : vector<16x64xf32> to vector<16x64xbf16>
    %cst_14 = arith.constant dense<0.000000e+00> : vector<16x16xf32>
    %23 = tpu.matmul %19, %19, %cst_14 {dimension_numbers = #tpu.dot_dimension_numbers<[1], [1], [0], [0], [0, 0, 1, 0], [], []>} : vector<16x64xbf16>, vector<16x64xbf16>, vector<16x16xf32> -> vector<16x16xf32>
    %cst_15 = arith.constant dense<0.000000e+00> : vector<16x16xf32>
    %24 = tpu.matmul %22, %22, %cst_15 {dimension_numbers = #tpu.dot_dimension_numbers<[1], [1], [0], [0], [0, 0, 1, 0], [], []>} : vector<16x64xbf16>, vector<16x64xbf16>, vector<16x16xf32> -> vector<16x16xf32>
    %25 = arith.subf %23, %24 : vector<16x16xf32>
    %cst_16 = arith.constant 9.765625E-4 : f32
    %26 = vector.broadcast %cst_16 : f32 to vector<16x16xf32>
    %27 = arith.mulf %25, %26 : vector<16x16xf32>
    %28 = arith.mulf %27, %27 : vector<16x16xf32>
    %29 = vector.shape_cast %28 : vector<16x16xf32> to vector<1x16x16xf32>
    %cst_17 = arith.constant dense<0.000000e+00> : vector<1xf32>
    %30 = vector.multi_reduction <add>, %29, %cst_17 [1, 2] : vector<1x16x16xf32> to vector<1xf32>
    %31 = vector.shape_cast %30 : vector<1xf32> to vector<1x1x1xf32>
    %32 = vector.extract %31[0, 0, 0] : f32 from vector<1x1x1xf32>
    %33 = arith.addf %16, %32 : f32
    %34 = vector.broadcast %33 : f32 to vector<1x1xf32>
    %c0_18 = arith.constant 0 : index
    %c0_19 = arith.constant 0 : index
    %35 = vector.load %arg3[%c0_18, %c0_19] : memref<1x1xf32, #tpu.memory_space<vmem>>, vector<1x1xf32>
    tpu.vector_store %arg3[%c0_18, %c0_19], %34 {strides = array<i32>} : memref<1x1xf32, #tpu.memory_space<vmem>>, vector<1x1xf32>,
    return
  }
  func.func @transform_0(%arg0: i32) -> (i32, i32, i32) {
    %c0_i32 = arith.constant 0 : i32
    %c0_i32_0 = arith.constant 0 : i32
    %c0_i32_1 = arith.constant 0 : i32
    %c0_i32_2 = arith.constant 0 : i32
    return %c0_i32, %c0_i32_0, %c0_i32_1 : i32, i32, i32
  }
  func.func @transform_1(%arg0: i32) -> (i32, i32, i32) {
    %c0_i32 = arith.constant 0 : i32
    %c0_i32_0 = arith.constant 0 : i32
    %c0_i32_1 = arith.constant 0 : i32
    %c0_i32_2 = arith.constant 0 : i32
    return %c0_i32, %c0_i32_0, %c0_i32_1 : i32, i32, i32
  }
  func.func @transform_2(%arg0: i32) -> (i32, i32) {
    %c0_i32 = arith.constant 0 : i32
    %c0_i32_0 = arith.constant 0 : i32
    %c0_i32_1 = arith.constant 0 : i32
    return %c0_i32, %c0_i32_0 : i32, i32
  }
}

module attributes {stable_mosaic.version = 11 : i64} {
  func.func @_conv3x3_kernel(%arg0: i32, %arg1: memref<1x8x10x10xf32, #tpu.memory_space<vmem>>, %arg2: memref<16x72xbf16, #tpu.memory_space<vmem>>, %arg3: memref<16x1xf32, #tpu.memory_space<vmem>>, %arg4: memref<1x16x64xf32, #tpu.memory_space<vmem>>) attributes {dimension_semantics = [#tpu.dimension_semantics<parallel>], iteration_bounds = array<i64: 4>, scalar_prefetch = 0 : i64, scratch_operands = 0 : i64, tpu.core_type = #tpu.core_type<tc>, window_params = [{transform_indices = @transform_0, window_bounds = array<i64: 1, 8, 10, 10>}, {pipeline_mode = #tpu.pipeline_mode<synchronous>, transform_indices = @transform_1, window_bounds = array<i64: 16, 72>}, {pipeline_mode = #tpu.pipeline_mode<synchronous>, transform_indices = @transform_2, window_bounds = array<i64: 16, 1>}, {transform_indices = @transform_3, window_bounds = array<i64: 1, 16, 64>}]} {
    %c0 = arith.constant 0 : index
    %c0_0 = arith.constant 0 : index
    %c0_1 = arith.constant 0 : index
    %c0_2 = arith.constant 0 : index
    %0 = vector.load %arg1[%c0, %c0_0, %c0_1, %c0_2] : memref<1x8x10x10xf32, #tpu.memory_space<vmem>>, vector<1x8x10x10xf32>
    %1 = vector.shape_cast %0 : vector<1x8x10x10xf32> to vector<8x10x10xf32>
    %2 = vector.extract_strided_slice %1 {offsets = [0, 0, 0], sizes = [8, 8, 8], strides = [1, 1, 1]} : vector<8x10x10xf32> to vector<8x8x8xf32>
    %3 = vector.extract_strided_slice %1 {offsets = [0, 0, 1], sizes = [8, 8, 8], strides = [1, 1, 1]} : vector<8x10x10xf32> to vector<8x8x8xf32>
    %4 = vector.extract_strided_slice %1 {offsets = [0, 0, 2], sizes = [8, 8, 8], strides = [1, 1, 1]} : vector<8x10x10xf32> to vector<8x8x8xf32>
    %5 = vector.extract_strided_slice %1 {offsets = [0, 1, 0], sizes = [8, 8, 8], strides = [1, 1, 1]} : vector<8x10x10xf32> to vector<8x8x8xf32>
    %6 = vector.extract_strided_slice %1 {offsets = [0, 1, 1], sizes = [8, 8, 8], strides = [1, 1, 1]} : vector<8x10x10xf32> to vector<8x8x8xf32>
    %7 = vector.extract_strided_slice %1 {offsets = [0, 1, 2], sizes = [8, 8, 8], strides = [1, 1, 1]} : vector<8x10x10xf32> to vector<8x8x8xf32>
    %8 = vector.extract_strided_slice %1 {offsets = [0, 2, 0], sizes = [8, 8, 8], strides = [1, 1, 1]} : vector<8x10x10xf32> to vector<8x8x8xf32>
    %9 = vector.extract_strided_slice %1 {offsets = [0, 2, 1], sizes = [8, 8, 8], strides = [1, 1, 1]} : vector<8x10x10xf32> to vector<8x8x8xf32>
    %10 = vector.extract_strided_slice %1 {offsets = [0, 2, 2], sizes = [8, 8, 8], strides = [1, 1, 1]} : vector<8x10x10xf32> to vector<8x8x8xf32>
    %11 = tpu.concatenate %2, %3, %4, %5, %6, %7, %8, %9, %10 in 0 : vector<8x8x8xf32>, vector<8x8x8xf32>, vector<8x8x8xf32>, vector<8x8x8xf32>, vector<8x8x8xf32>, vector<8x8x8xf32>, vector<8x8x8xf32>, vector<8x8x8xf32>, vector<8x8x8xf32> -> vector<72x8x8xf32>
    %12 = vector.shape_cast %11 : vector<72x8x8xf32> to vector<72x64xf32>
    %13 = arith.truncf %12 : vector<72x64xf32> to vector<72x64xbf16>
    %c0_3 = arith.constant 0 : index
    %c0_4 = arith.constant 0 : index
    %14 = vector.load %arg2[%c0_3, %c0_4] : memref<16x72xbf16, #tpu.memory_space<vmem>>, vector<16x72xbf16>
    %cst = arith.constant dense<0.000000e+00> : vector<16x64xf32>
    %15 = tpu.matmul %14, %13, %cst {dimension_numbers = #tpu.dot_dimension_numbers<[1], [0], [0], [1], [0, 0, 1, 1], [], []>} : vector<16x72xbf16>, vector<72x64xbf16>, vector<16x64xf32> -> vector<16x64xf32>
    %c0_5 = arith.constant 0 : index
    %c0_6 = arith.constant 0 : index
    %16 = vector.load %arg3[%c0_5, %c0_6] : memref<16x1xf32, #tpu.memory_space<vmem>>, vector<16x1xf32>
    %17 = vector.broadcast %16 : vector<16x1xf32> to vector<16x64xf32>
    %18 = arith.addf %15, %17 : vector<16x64xf32>
    %cst_7 = arith.constant 0.000000e+00 : f32
    %19 = vector.broadcast %cst_7 : f32 to vector<16x64xf32>
    %20 = arith.maximumf %18, %19 : vector<16x64xf32>
    %c0_8 = arith.constant 0 : index
    %c0_9 = arith.constant 0 : index
    %c0_10 = arith.constant 0 : index
    %21 = vector.load %arg4[%c0_8, %c0_9, %c0_10] : memref<1x16x64xf32, #tpu.memory_space<vmem>>, vector<1x16x64xf32>
    %22 = vector.shape_cast %21 : vector<1x16x64xf32> to vector<16x64xf32>
    %23 = vector.shape_cast %20 : vector<16x64xf32> to vector<1x16x64xf32>
    tpu.vector_store %arg4[%c0_8, %c0_9, %c0_10], %23 {strides = array<i32>} : memref<1x16x64xf32, #tpu.memory_space<vmem>>, vector<1x16x64xf32>,
    return
  }
  func.func @transform_0(%arg0: i32) -> (i32, i32, i32, i32) {
    %c0_i32 = arith.constant 0 : i32
    %c0_i32_0 = arith.constant 0 : i32
    %c0_i32_1 = arith.constant 0 : i32
    %c0_i32_2 = arith.constant 0 : i32
    return %arg0, %c0_i32, %c0_i32_0, %c0_i32_1 : i32, i32, i32, i32
  }
  func.func @transform_1(%arg0: i32) -> (i32, i32) {
    %c0_i32 = arith.constant 0 : i32
    %c0_i32_0 = arith.constant 0 : i32
    %c0_i32_1 = arith.constant 0 : i32
    return %c0_i32, %c0_i32_0 : i32, i32
  }
  func.func @transform_2(%arg0: i32) -> (i32, i32) {
    %c0_i32 = arith.constant 0 : i32
    %c0_i32_0 = arith.constant 0 : i32
    %c0_i32_1 = arith.constant 0 : i32
    return %c0_i32, %c0_i32_0 : i32, i32
  }
  func.func @transform_3(%arg0: i32) -> (i32, i32, i32) {
    %c0_i32 = arith.constant 0 : i32
    %c0_i32_0 = arith.constant 0 : i32
    %c0_i32_1 = arith.constant 0 : i32
    return %arg0, %c0_i32, %c0_i32_0 : i32, i32, i32
  }
}

</mosaic_0001>

<bundles_post_ra>
// kernel: a_call__.9
= control target key start
LH: loop header
LB: loop body
LE: loop exit
PB: predicated region body
PF: predicated region fallthrough
CT: control target
= control target key end

     0   :  { %s148_s0 = inlined_call_operand.vmem [shape: f32[32,128], index: 0, kind: input, shape index: {}]   ;;  %s149_s1 = inlined_call_operand.vmem [shape: f32[32,128], index: 1, kind: input, shape index: {}]   ;;  %s150_s2 = inlined_call_operand.hbm [shape: f32[1,1], index: 2, kind: output, shape index: {}]  }
   0x1   :  { %v18_v0 = vld [vmem:[%s148_s0] sm:$0xff]  ;;  %v19_v1 = vld [vmem:[%s148_s0 + $0x8] sm:$0xff]  ;;  %v20_v2 = vld [vmem:[%s148_s0 + $0x10] sm:$0xff] }
   0x2   :  { %v21_v3 = vld [vmem:[%s148_s0 + $0x18] sm:$0xff]  ;;  %v22_v4 = vld [vmem:[%s149_s1] sm:$0xff]  ;;  %v23_v5 = vld [vmem:[%s149_s1 + $0x8] sm:$0xff] }
   0x3   :  { %v24_v6 = vld [vmem:[%s149_s1 + $0x10] sm:$0xff]  ;;  %v25_v7 = vld [vmem:[%s149_s1 + $0x18] sm:$0xff]  ;;  %v26_v8 = vsub.f32 %v18_v0, %v22_v4  ;;  %v27_v9 = vsub.f32 %v19_v1, %v23_v5 }
   0x4   :  { %7 = vsyncpa [#allocation3], 0  ;;  %v28_v10 = vsub.f32 %v20_v2, %v24_v6  ;;  %v29_v11 = vsub.f32 %v21_v3, %v25_v7  ;;  %vm16_vm0 = vcmask 0   ;;  %v93_v19 = vmov 0.0   ;;  %s94_s0 = smov [#allocation2]  }
   0x5   :  { %v31_v12 = vmul.f32 %v26_v8, %v26_v8  ;;  %v32_v13 = vmul.f32 %v27_v9, %v27_v9  ;;  %17 = vst.msk [vmem:[#allocation2] sm:$0x1] %vm16_vm0, %v93_v19  ;;  %s57_s1 = sshll.u32 %s94_s0, 4  ;;  %s58_s1 = int_to_ptr.vmem [resolvable:$true] %s57_s1 }
   0x6   :  { %v33_v14 = vmul.f32 %v28_v10, %v28_v10  ;;  %v34_v15 = vmul.f32 %v29_v11, %v29_v11  ;;  %s69_s26 = scalar_lea.vmem %s58_s1, 16  ;;  %s73_s27 = scalar_lea.vmem %s58_s1, 32 }
   0x7   :  { %v35_v16 = vadd.f32 %v32_v13, %v31_v12  ;;  %p70_p0 = scmp.ne.s32.totalorder %s58_s1, %s69_s26  ;;  %p74_p1 = scmp.lt.s32.totalorder %s58_s1, %s58_s1 }
   0x8   :  { %p75_p2 = scmp.lt.s32.totalorder %s73_s27, %s69_s26 }
   0x9   :  { %v36_v17 = vadd.f32 %v35_v16, %v33_v14 }
   0xa   :  { %p76_p3 = por %p75_p2, %p74_p1 }
   0xb   :  { %v37_v18 = vadd.f32 %v36_v17, %v34_v15 }
   0xc   :  { %v30_v27 = vld [vmem:[#allocation2] sm:$0x1]  ;;  %p77_p4 = pnand %p76_p3, %p70_p0 }
   0xd   :  { %38 = vadd.xlane.f32.xlu0 %v37_v18 }
  0x9a   :  { %v39_v20 = vpop.xlane.xlu0 %38 }
  0x9b   :  { %v40_v21 = vrot.slane %v39_v20, 4 }
  0x9d   :  { %v41_v22 = vadd.f32 %v40_v21, %v39_v20 }
  0x9f   :  { %v42_v23 = vrot.slane %v41_v22, 2 }
  0xa1   :  { %v43_v24 = vadd.f32 %v42_v23, %v41_v22 }
  0xa3   :  { %v44_v25 = vrot.slane %v43_v24, 1 }
  0xa5   :  { %v45_v26 = vadd.f32 %v44_v25, %v43_v24 }
  0xa7   :  { %65 = vpush %v45_v26 }
  0xd8   :  { %s66_s25 = spop %65 }
  0xd9   :  { %v47_v28 = vstv %s66_s25 }
  0xda   :  { %v48_v29 = vadd.f32 %v47_v28, %v30_v27 }
  0xdc   :  { %50 = vst.msk [vmem:[#allocation2] sm:$0x1] %vm16_vm0, %v48_v29 }
  0xdd   :  { %80 = shalt.err (!%p77_p4)
}
  0xde   :  { %s81_s30 = scalar_lea.hbm %s150_s2, 16 }
  0xdf   :  { %p82_p5 = scmp.ne.s32.totalorder %s150_s2, %s81_s30  ;;  %p85_p6 = scmp.lt.u32.totalorder %s81_s30, %s150_s2 }
  0xe1   :  { %p87_p7 = pnand %p85_p6, %p82_p5 }
  0xe3   :  { %90 = shalt.err (!%p87_p7)
}
  0xe4   :  { %60 = dma.vmem_to_hbm [thread:$0]  %s58_s1, 16, %s150_s2, [#allocation3]  }
  0xe5   :  { %91 = dma.done.wait [#allocation3], 16  }
  0xe6   :  { %92 = vsyncadd [#allocation3], 4294967280 }
  0xe7   :  { %64 = vsyncpa [#allocation3], 1 }

// kernel: a_call__.6
= control target key start
LH: loop header
LB: loop body
LE: loop exit
PB: predicated region body
PF: predicated region fallthrough
CT: control target
= control target key end

     0   :  { %s1925_s12 = smov 0   ;;  %s2625_s0 = inlined_call_operand.vmem [shape: f32[4,3,18,18], index: 0, kind: input, shape index: {}]   ;;  %s2626_s1 = inlined_call_operand.vmem [shape: bf16[8,27], index: 1, kind: input, shape index: {}]   ;;  %s2627_s2 = inlined_call_operand.vmem [shape: f32[8,1], index: 2, kind: input, shape index: {}]   ;;  %s2628_s3 = inlined_call_operand.vmem [shape: f32[4,8,256], index: 3, kind: output, shape index: {}]  }
   0x1 LB: > { %s1703_s13 = sadd.s32 4294967295, %s1889_s12   ;;  %p1707_p0 = scmp.ge.s32.totalorder %s1889_s12, 1  ;;  %s1889_s12 = sphi %s1925_s12, %s13_s12  }
   0x2   : > { %p137_p1 = scmp.lt.s32.totalorder %s1889_s12, 5 }
   0x4   : > { %p138_p2 = pnand %p1707_p0, %p137_p1 }
   0x6   : > { %141 = sbr.rel (%p138_p2) target bundleno = 601 (0x259), region = 32 }
   0xd   : > { %p161_p3 = scmp.lt.s32.totalorder %s1703_s13, 3  ;;  %s1891_s18 = smov 127   ;;  %vm226_vm0 = vcmask 1046528   ;;  %vm284_vm1 = vcmask 1045504   ;;  %v1893_v47 = vmov 1983009808   ;;  %v347_v49 = vlaneseq }
   0xe   : > { %s1892_s19 = smov 126   ;;  %v345_v48 = vunpack.c.l.s4 %v1893_v47  ;;  %v1894_v54 = vmov 1934713408   ;;  %s1895_s20 = smov 16   ;;  %vm1516_vm2 = vcmask 130048   ;;  %vm1521_vm3 = vcmask 261120  }
   0xf   : > { %s2642_s13 = smov (!%p161_p3, %s1703_s13), 3  ;;  %v348_v51 = vshrl.u32 %v347_v49, 7  ;;  %v409_v55 = vunpack.c.l.s4 %v1894_v54  ;;  %s1896_s21 = smov 32   ;;  %vm1526_vm4 = vcmask 392192   ;;  %vm1531_vm5 = vcmask 523264  }
  0x10   : > { %s1715_s14 = smul.u32 72, %s2642_s13  ;;  %v346_v50 = vunpack.c.0.s8 %v345_v48  ;;  %s1897_s22 = smov 48   ;;  %vm1536_vm6 = vcmask 654336   ;;  %vm1541_vm7 = vcmask 785408   ;;  %vm1546_vm8 = vcmask 916480  }
  0x11   : > { %v410_v60 = vunpack.c.0.s8 %v409_v55  ;;  %s1898_s23 = smov 64   ;;  %s1899_s24 = smov 80   ;;  %vm1594_vm9 = vcmask 1044480   ;;  %vm1590_vm10 = vcmask 220160  }
  0x12   : > { %s1939_s17 = scalar_lea.vmem %s2625_s0, %s1715_s14  ;;  %v2098_v56 = vsub.s32 %v346_v50, %v348_v51  ;;  %s1901_s25 = smov 96  }
  0x13   : > { %v1942_v0 = vld [vmem:[%s1939_s17 + $0x38] sm:$0xff]  ;;  %v1945_v1 = vld [vmem:[%s1939_s17 + $0x8] sm:$0xff]  ;;  %v1952_v2 = vld [vmem:[%s1939_s17 + $0x20] sm:$0xff]  ;;  %s1902_s26 = smov 112   ;;  %s1714_s4 = sshll.u32 %s2642_s13, 4 }
  0x14   : > { %197 = vrot.lane.b32.xlu1 %v1942_v0, %s1891_s18  ;;  %189 = vrot.lane.b32.xlu0 %v1945_v1, %s1891_s18  ;;  %v174_v3 = vld [vmem:[%s1939_s17 + $0x10] sm:$0x3]  ;;  %v228_v4 = vrot.slane %v1945_v1, 1  ;;  %v817_v5 = vcombine.low %v1945_v1, %v1942_v0  ;;  %v818_v6 = vcombine.high %v1945_v1, %v1942_v0  ;;  %v177_v7 = vld [vmem:[%s1939_s17 + $0x28] sm:$0x3]  ;;  %v238_v10 = vrot.slane %v1942_v0, 1  ;;  %s170_s7 = scalar_lea.vmem %s2628_s3, %s1714_s4 }
  0x15   : > { %v230_v8 = vrot.slane %v174_v3, 1  ;;  %v180_v9 = vld [vmem:[%s1939_s17 + $0x40] sm:$0x3]  ;;  %v1967_v13 = vld [vmem:[%s1939_s17 + $0x30] sm:$0xff]  ;;  %v233_v16 = vrot.slane %v1952_v2, 1  ;;  %v235_v17 = vrot.slane %v177_v7, 1 }
  0x16   : > { %v240_v11 = vrot.slane %v180_v9, 1  ;;  %v1964_v12 = vld [vmem:[%s1939_s17] sm:$0xff]  ;;  %v237_v15 = vrot.slane %v1967_v13, 1  ;;  %v2016_v29 = vld [vmem:[%s1939_s17 + $0x18] sm:$0xff]  ;;  %v291_v32 = vrot.slane %v1952_v2, 2  ;;  %v293_v33 = vrot.slane %v177_v7, 2 }
  0x17   : > { %v227_v14 = vrot.slane %v1964_v12, 1  ;;  %v1977_v18 = vsel %vm226_vm0, %v228_v4, %v230_v8  ;;  %v2001_v26 = vsel %vm226_vm0, %v233_v16, %v235_v17  ;;  %v342_v27 = vcombine.low %v1964_v12, %v1967_v13 }
  0x18   : > { %207 = vrot.lane.b32.xlu1 %v1945_v1, %s1892_s19  ;;  %193 = vrot.lane.b32.xlu0 %v1952_v2, %s1891_s18  ;;  %v1980_v19 = vsel %vm226_vm0, %v238_v10, %v240_v11  ;;  %v1990_v23 = vsel %vm226_vm0, %v237_v15, %v238_v10  ;;  %v343_v28 = vcombine.high %v1964_v12, %v1967_v13  ;;  %v232_v30 = vrot.slane %v2016_v29, 1 }
  0x19   : > { %v969_v20 = vcombine.low %v1977_v18, %v1980_v19  ;;  %v970_v21 = vcombine.high %v1977_v18, %v1980_v19  ;;  %v1987_v22 = vsel %vm226_vm0, %v227_v14, %v228_v4  ;;  %v286_v34 = vrot.slane %v1945_v1, 2 }
  0x1a   : > { %v494_v24 = vcombine.low %v1987_v22, %v1990_v23  ;;  %v495_v25 = vcombine.high %v1987_v22, %v1990_v23  ;;  %v2032_v31 = vsel %vm226_vm0, %v232_v30, %v233_v16  ;;  %v288_v35 = vrot.slane %v174_v3, 2 }
  0x1b   : > { %v2049_v36 = vsel %vm284_vm1, %v291_v32, %v293_v33  ;;  %v296_v38 = vrot.slane %v1942_v0, 2  ;;  %v298_v39 = vrot.slane %v180_v9, 2  ;;  %v285_v41 = vrot.slane %v1964_v12, 2 }
  0x1c   : > { %215 = vrot.lane.b32.xlu1 %v1942_v0, %s1892_s19  ;;  %211 = vrot.lane.b32.xlu0 %v1952_v2, %s1892_s19  ;;  %v2052_v37 = vsel %vm284_vm1, %v286_v34, %v288_v35  ;;  %v295_v43 = vrot.slane %v1967_v13, 2  ;;  %v290_v44 = vrot.slane %v2016_v29, 2  ;;  %v825_v61 = vrot.slane %v817_v5, %v2098_v56 }
  0x1d   : > { %v2060_v40 = vsel %vm284_vm1, %v296_v38, %v298_v39  ;;  %v2072_v42 = vsel %vm284_vm1, %v285_v41, %v286_v34  ;;  %v2107_v9 = vsub.s32 %v410_v60, %v348_v51  ;;  %v832_v11 = vrot.slane %v818_v6, %v2098_v56 }
  0x1e   : > { %v2081_v45 = vsel %vm284_vm1, %v295_v43, %v296_v38  ;;  %v2084_v46 = vsel %vm284_vm1, %v290_v44, %v291_v32  ;;  %v977_v34 = vrot.slane %v969_v20, %v2098_v56  ;;  %v2126_v0 = vrot.slane %v970_v21, %v2098_v56 }
  0x20   : > { %254 = vrot.lane.b32.xlu1 %v2001_v26, %s1891_s18  ;;  %250 = vrot.lane.b32.xlu0 %v1977_v18, %s1891_s18 }
  0x24   : > { %268 = vrot.lane.b32.xlu1 %v1977_v18, %s1892_s19  ;;  %258 = vrot.lane.b32.xlu0 %v1980_v19, %s1891_s18  ;;  %v2142_v18 = vrot.slane %v343_v28, %v2098_v56 }
  0x28   : > { %191 = vrot.lane.b32.xlu1 %v2016_v29, %s1891_s18  ;;  %187 = vrot.lane.b32.xlu0 %v1964_v12, %s1891_s18 }
  0x2c   : > { %205 = vrot.lane.b32.xlu1 %v1964_v12, %s1892_s19  ;;  %195 = vrot.lane.b32.xlu0 %v1967_v13, %s1891_s18 }
  0x30   : > { %213 = vrot.lane.b32.xlu1 %v1967_v13, %s1892_s19  ;;  %209 = vrot.lane.b32.xlu0 %v2016_v29, %s1892_s19 }
  0x34   : > { %252 = vrot.lane.b32.xlu1 %v2032_v31, %s1891_s18  ;;  %248 = vrot.lane.b32.xlu0 %v1987_v22, %s1891_s18 }
  0x38   : > { %266 = vrot.lane.b32.xlu1 %v1987_v22, %s1892_s19  ;;  %256 = vrot.lane.b32.xlu0 %v1990_v23, %s1891_s18 }
  0x3c   : > { %276 = vrot.lane.b32.xlu1 %v1980_v19, %s1892_s19  ;;  %272 = vrot.lane.b32.xlu0 %v2001_v26, %s1892_s19 }
  0x40   : > { %312 = vrot.lane.b32.xlu1 %v2049_v36, %s1891_s18  ;;  %308 = vrot.lane.b32.xlu0 %v2052_v37, %s1891_s18 }
  0x44   : > { %326 = vrot.lane.b32.xlu1 %v2052_v37, %s1892_s19  ;;  %316 = vrot.lane.b32.xlu0 %v2060_v40, %s1891_s18 }
  0x48   : > { %270 = vrot.lane.b32.xlu1 %v2032_v31, %s1892_s19  ;;  %334 = vrot.lane.b32.xlu0 %v2060_v40, %s1892_s19 }
  0x4c   : > { %306 = vrot.lane.b32.xlu1 %v2072_v42, %s1891_s18  ;;  %274 = vrot.lane.b32.xlu0 %v1990_v23, %s1892_s19 }
  0x50   : > { %314 = vrot.lane.b32.xlu1 %v2081_v45, %s1891_s18  ;;  %310 = vrot.lane.b32.xlu0 %v2084_v46, %s1891_s18 }
  0x54   : > { %332 = vrot.lane.b32.xlu1 %v2081_v45, %s1892_s19  ;;  %324 = vrot.lane.b32.xlu0 %v2072_v42, %s1892_s19 }
  0x58   : > { %328 = vrot.lane.b32.xlu1 %v2084_v46, %s1892_s19  ;;  %330 = vrot.lane.b32.xlu0 %v2049_v36, %s1892_s19 }
  0x86   : > { %v198_v52 = vpop.permute.xlu1 %197  ;;  %v190_v53 = vpop.permute.xlu0 %189 }
  0x87   : > { %v833_v57 = vcombine.low %v1952_v2, %v190_v53  ;;  %v834_v62 = vcombine.high %v1952_v2, %v190_v53 }
  0x89   : > { %v841_v63 = vrot.slane %v833_v57, %v2098_v56  ;;  %v848_v14 = vrot.slane %v834_v62, %v2098_v56 }
  0x8a   : > { %v208_v58 = vpop.permute.xlu1 %207  ;;  %v194_v59 = vpop.permute.xlu0 %193 }
  0x8b   : > { %v849_v3 = vcombine.low %v194_v59, %v208_v58  ;;  %v881_v5 = vcombine.low %v825_v61, %v841_v63  ;;  %v882_v15 = vcombine.high %v825_v61, %v841_v63  ;;  %v850_v1 = vcombine.high %v194_v59, %v208_v58 }
  0x8c   : > { %v897_v20 = vcombine.low %v832_v11, %v848_v14  ;;  %v898_v39 = vcombine.high %v832_v11, %v848_v14 }
  0x8d   : > { %v857_v16 = vrot.slane %v849_v3, %v2098_v56  ;;  %v2136_v38 = vrot.slane %v881_v5, %v2107_v9  ;;  %v2145_v19 = vrot.slane %v882_v15, %v2107_v9  ;;  %v864_v12 = vrot.slane %v850_v1, %v2098_v56 }
  0x8e   : > { %v216_v4 = vpop.permute.xlu1 %215  ;;  %v212_v7 = vpop.permute.xlu0 %211  ;;  %v905_v57 = vrot.slane %v897_v20, %v2107_v9  ;;  %v2167_v63 = vrot.slane %v898_v39, %v2107_v9 }
  0x8f   : > { %v865_v8 = vcombine.low %v198_v52, %v212_v7  ;;  %v953_v10 = vcombine.low %v216_v4, %v2001_v26  ;;  %v954_v17 = vcombine.high %v216_v4, %v2001_v26  ;;  %v866_v30 = vcombine.high %v198_v52, %v212_v7 }
  0x90   : > { %v2133_v26 = vrot.slane %v342_v27, %v2098_v56 }
  0x91   : > { %v873_v2 = vrot.slane %v865_v8, %v2098_v56  ;;  %v961_v6 = vrot.slane %v953_v10, %v2098_v56  ;;  %v2148_v21 = vrot.slane %v954_v17, %v2098_v56  ;;  %v880_v27 = vrot.slane %v866_v30, %v2098_v56 }
  0x92   : > { %v255_v32 = vpop.permute.xlu1 %254  ;;  %v251_v33 = vpop.permute.xlu0 %250 }
  0x93   : > { %v913_v35 = vcombine.low %v857_v16, %v873_v2  ;;  %v1017_v13 = vcombine.low %v961_v6, %v977_v34  ;;  %v914_v28 = vcombine.high %v857_v16, %v873_v2  ;;  %v1018_v58 = vcombine.high %v961_v6, %v977_v34 }
  0x94   : > { %v1033_v59 = vcombine.low %v2148_v21, %v2126_v0  ;;  %v929_v60 = vcombine.low %v864_v12, %v880_v27  ;;  %v1034_v3 = vcombine.high %v2148_v21, %v2126_v0  ;;  %v930_v10 = vcombine.high %v864_v12, %v880_v27 }
  0x95   : > { %v2152_v41 = vrot.slane %v913_v35, %v2107_v9  ;;  %v928_v8 = vrot.slane %v914_v28, %v2107_v9  ;;  %v2174_v5 = vrot.slane %v1017_v13, %v2107_v9  ;;  %v1032_v17 = vrot.slane %v1018_v58, %v2107_v9 }
  0x96   : > { %v269_v43 = vpop.permute.xlu1 %268  ;;  %v259_v44 = vpop.permute.xlu0 %258  ;;  %v1041_v30 = vrot.slane %v1033_v59, %v2107_v9  ;;  %v2192_v20 = vrot.slane %v930_v10, %v2107_v9 }
  0x97   : > { %v1001_v47 = vcombine.low %v255_v32, %v269_v43  ;;  %v1002_v48 = vcombine.high %v255_v32, %v269_v43  ;;  %v985_v49 = vcombine.low %v251_v33, %v259_v44  ;;  %v986_v50 = vcombine.high %v251_v33, %v259_v44 }
  0x98   : > { %v937_v32 = vrot.slane %v929_v60, %v2107_v9  ;;  %v946_v35 = vcombine.high %v2136_v38, %v2152_v41  ;;  %v947_v21 = vcombine.low %v2145_v19, %v928_v8  ;;  %v948_v27 = vcombine.high %v2145_v19, %v928_v8 }
  0x99   : > { %v1009_v52 = vrot.slane %v1001_v47, %v2098_v56  ;;  %v1016_v53 = vrot.slane %v1002_v48, %v2098_v56  ;;  %v993_v54 = vrot.slane %v985_v49, %v2098_v56  ;;  %v1000_v55 = vrot.slane %v986_v50, %v2098_v56 }
  0x9a   : > { %v2164_v61 = vpop.permute.xlu1 %191  ;;  %v188_v62 = vpop.permute.xlu0 %187  ;;  %v949_v28 = vcombine.low %v905_v57, %v937_v32 }
  0x9b   : > { %v1049_v4 = vcombine.low %v993_v54, %v1009_v52  ;;  %v1050_v7 = vcombine.high %v993_v54, %v1009_v52  ;;  %v1065_v11 = vcombine.low %v1000_v55, %v1016_v53  ;;  %v358_v14 = vcombine.low %v2016_v29, %v188_v62 }
  0x9c   : > { %v359_v16 = vcombine.high %v2016_v29, %v188_v62  ;;  %v1066_v33 = vcombine.high %v1000_v55, %v1016_v53  ;;  %v950_v52 = vcombine.high %v905_v57, %v937_v32 }
  0x9d   : > { %v2177_v2 = vrot.slane %v1049_v4, %v2107_v9  ;;  %v1064_v15 = vrot.slane %v1050_v7, %v2107_v9  ;;  %v366_v6 = vrot.slane %v358_v14, %v2098_v56  ;;  %v1073_v39 = vrot.slane %v1065_v11, %v2107_v9 }
  0x9e   : > { %v206_v34 = vpop.permute.xlu1 %205  ;;  %v196_v0 = vpop.permute.xlu0 %195  ;;  %v2198_v43 = vrot.slane %v359_v16, %v2098_v56  ;;  %v2202_v49 = vrot.slane %v1066_v33, %v2107_v9 }
  0x9f   : > { %v1082_v29 = vcombine.high %v2174_v5, %v2177_v2  ;;  %v374_v44 = vcombine.low %v2164_v61, %v206_v34  ;;  %v1083_v48 = vcombine.low %v1032_v17, %v1064_v15  ;;  %v375_v50 = vcombine.high %v2164_v61, %v206_v34 }
  0xa0   : > { %v406_v53 = vcombine.low %v2133_v26, %v366_v6  ;;  %v407_v19 = vcombine.high %v2133_v26, %v366_v6  ;;  %v1084_v59 = vcombine.high %v1032_v17, %v1064_v15  ;;  %v1085_v60 = vcombine.low %v1041_v30, %v1073_v39 }
  0xa1   : > { %v1738_v47 = vpack.i.bf16 %v1082_v29, %v946_v35  ;;  %v1748_v58 = vpack.i.bf16 %v1083_v48, %v947_v21  ;;  %v1086_v62 = vcombine.high %v1041_v30, %v1073_v39  ;;  %v422_v61 = vcombine.low %v2142_v18, %v2198_v43 }
  0xa2   : > { %v214_v12 = vpop.permute.xlu1 %213  ;;  %v210_v13 = vpop.permute.xlu0 %209  ;;  %v382_v4 = vrot.slane %v374_v44, %v2098_v56  ;;  %v2214_v11 = vpack.i.bf16 %v1084_v59, %v948_v27  ;;  %v2216_v14 = vpack.i.bf16 %v1085_v60, %v949_v28  ;;  %v2221_v15 = vrot.slane %v1034_v3, %v2107_v9 }
  0xa3   : > { %v478_v54 = vcombine.low %v214_v12, %v2032_v31  ;;  %v390_v55 = vcombine.low %v196_v0, %v210_v13  ;;  %1739 = vrot.lane.b32.xlu0 %v1738_v47, %s1895_s20  ;;  %v479_v57 = vcombine.high %v214_v12, %v2032_v31  ;;  %v391_v26 = vcombine.high %v196_v0, %v210_v13 }
  0xa4   : > { %v2218_v16 = vpack.i.bf16 %v1086_v62, %v950_v52  ;;  %v502_v17 = vrot.slane %v494_v24, %v2098_v56  ;;  %v509_v31 = vrot.slane %v495_v25, %v2098_v56  ;;  %v951_v30 = vcombine.low %v2167_v63, %v2192_v20 }
  0xa5   : > { %v398_v7 = vrot.slane %v390_v55, %v2098_v56  ;;  %v423_v3 = vcombine.high %v2142_v18, %v2198_v43  ;;  %v486_v32 = vrot.slane %v478_v54, %v2098_v56  ;;  %v952_v24 = vcombine.high %v2167_v63, %v2192_v20 }
  0xa6   : > { %v253_v8 = vpop.permute.xlu1 %252  ;;  %v249_v10 = vpop.permute.xlu0 %248  ;;  %v2240_v34 = vrot.slane %v406_v53, %v2107_v9  ;;  %v2243_v22 = vrot.slane %v407_v19, %v2107_v9  ;;  %v2246_v23 = vrot.slane %v422_v61, %v2107_v9  ;;  %v389_v25 = vrot.slane %v375_v50, %v2098_v56 }
  0xa7   : > { %1749 = vrot.lane.b32.xlu0 %v1748_v58, %s1896_s21  ;;  %v438_v33 = vcombine.low %v382_v4, %v398_v7  ;;  %v493_v0 = vrot.slane %v479_v57, %v2098_v56  ;;  %v405_v18 = vrot.slane %v391_v26, %v2098_v56  ;;  %v1087_v39 = vcombine.low %v2221_v15, %v2202_v49 }
  0xa8   : > { %v542_v47 = vcombine.low %v486_v32, %v502_v17  ;;  %v543_v48 = vcombine.high %v486_v32, %v502_v17  ;;  %v439_v12 = vcombine.high %v382_v4, %v398_v7  ;;  %v2269_v62 = vrot.slane %v423_v3, %v2107_v9 }
  0xa9   : > { %v2252_v6 = vrot.slane %v438_v33, %v2107_v9  ;;  %v558_v19 = vcombine.low %v493_v0, %v509_v31  ;;  %v454_v54 = vcombine.low %v389_v25, %v405_v18  ;;  %v455_v55 = vcombine.high %v389_v25, %v405_v18 }
  0xaa   : > { %v267_v35 = vpop.permute.xlu1 %266  ;;  %v257_v29 = vpop.permute.xlu0 %256  ;;  %v2266_v60 = vpack.i.bf16 %v1087_v39, %v951_v30  ;;  %v559_v61 = vcombine.high %v493_v0, %v509_v31  ;;  %v2272_v7 = vrot.slane %v542_v47, %v2107_v9  ;;  %v453_v26 = vrot.slane %v439_v12, %v2107_v9 }
  0xab   : > { %v526_v21 = vcombine.low %v253_v8, %v267_v35  ;;  %v527_v27 = vcombine.high %v253_v8, %v267_v35  ;;  %v510_v43 = vcombine.low %v249_v10, %v257_v29  ;;  %v511_v44 = vcombine.high %v249_v10, %v257_v29 }
  0xac   : > { %v557_v3 = vrot.slane %v543_v48, %v2107_v9  ;;  %v566_v33 = vrot.slane %v558_v19, %v2107_v9  ;;  %v462_v25 = vrot.slane %v454_v54, %v2107_v9  ;;  %v469_v0 = vrot.slane %v455_v55, %v2107_v9 }
  0xad   : > { %v534_v13 = vrot.slane %v526_v21, %v2098_v56  ;;  %v541_v28 = vrot.slane %v527_v27, %v2098_v56  ;;  %v518_v52 = vrot.slane %v510_v43, %v2098_v56  ;;  %v525_v53 = vrot.slane %v511_v44, %v2098_v56 }
  0xae   : > { %v2262_v58 = vpop.permute.xlu1 %276  ;;  %v2264_v59 = vpop.permute.xlu0 %272  ;;  %v471_v21 = vcombine.high %v2240_v34, %v2252_v6  ;;  %v573_v43 = vrot.slane %v559_v61, %v2107_v9  ;;  %v472_v48 = vcombine.low %v2243_v22, %v453_v26  ;;  %v473_v54 = vcombine.high %v2243_v22, %v453_v26 }
  0xaf   : > { %v574_v4 = vcombine.low %v518_v52, %v534_v13  ;;  %v575_v57 = vcombine.high %v518_v52, %v534_v13  ;;  %v590_v8 = vcombine.low %v525_v53, %v541_v28  ;;  %v591_v10 = vcombine.high %v525_v53, %v541_v28 }
  0xb0   : > { %v1105_v30 = vcombine.low %v2262_v58, %v2049_v36  ;;  %v1089_v31 = vcombine.low %v2264_v59, %v2052_v37  ;;  %v474_v55 = vcombine.low %v2246_v23, %v462_v25  ;;  %v475_v61 = vcombine.high %v2246_v23, %v462_v25 }
  0xb1   : > { %v2276_v17 = vrot.slane %v574_v4, %v2107_v9  ;;  %v589_v32 = vrot.slane %v575_v57, %v2107_v9  ;;  %v598_v44 = vrot.slane %v590_v8, %v2107_v9  ;;  %v605_v47 = vrot.slane %v591_v10, %v2107_v9 }
  0xb2   : > { %v2287_v18 = vpop.permute.xlu1 %312  ;;  %v2289_v35 = vpop.permute.xlu0 %308  ;;  %v2304_v12 = vrot.slane %v1105_v30, %v2098_v56  ;;  %v2307_v13 = vrot.slane %v1089_v31, %v2098_v56  ;;  %v476_v4 = vcombine.low %v2269_v62, %v469_v0  ;;  %v1088_v22 = vcombine.high %v2221_v15, %v2202_v49 }
  0xb3   : > { %v1121_v39 = vcombine.low %v2060_v40, %v2287_v18  ;;  %v607_v27 = vcombine.high %v2272_v7, %v2276_v17  ;;  %v608_v52 = vcombine.low %v557_v3, %v589_v32  ;;  %v609_v30 = vcombine.high %v557_v3, %v589_v32 }
  0xb4   : > { %v610_v31 = vcombine.low %v566_v33, %v598_v44  ;;  %v1153_v23 = vcombine.low %v2307_v13, %v2304_v12  ;;  %v2339_v3 = vpack.i.bf16 %v1088_v22, %v952_v24  ;;  %v477_v24 = vcombine.high %v2269_v62, %v469_v0 }
  0xb5   : > { %v1743_v28 = vpack.i.bf16 %v607_v27, %v471_v21  ;;  %v2318_v57 = vrot.slane %v1121_v39, %v2098_v56  ;;  %v1753_v10 = vpack.i.bf16 %v608_v52, %v472_v48  ;;  %v611_v21 = vcombine.high %v566_v33, %v598_v44 }
  0xb6   : > { %v2309_v53 = vpop.permute.xlu1 %326  ;;  %v2311_v19 = vpop.permute.xlu0 %316  ;;  %v612_v27 = vcombine.low %v573_v43, %v605_v47  ;;  %v1773_v25 = vpack.i.bf16 %v609_v30, %v473_v54  ;;  %v2345_v15 = vrot.slane %v1153_v23, %v2107_v9  ;;  %v1900_v50 = vmov 0.0  }
  0xb7   : > { %v1137_v8 = vcombine.low %v2289_v35, %v2311_v19  ;;  %1744 = vrot.lane.b32.xlu1 %v1743_v28, %s1895_s20  ;;  %v1793_v28 = vpack.i.bf16 %v610_v31, %v474_v55  ;;  %v1813_v48 = vpack.i.bf16 %v611_v21, %v475_v61  ;;  %v613_v55 = vcombine.high %v573_v43, %v605_v47 }
  0xb8   : > { %v2334_v32 = vpack.i.bf16 %v612_v27, %v476_v4  ;;  %2631 = vst [vmem:[#allocation2_spill] sm:$0xff] %v2345_v15  ;;  %v1154_v51 = vcombine.high %v2307_v13, %v2304_v12 }
  0xb9   : > { %v2328_v26 = vrot.slane %v1137_v8, %v2098_v56  ;;  %v2367_v30 = vpack.i.bf16 %v613_v55, %v477_v24 }
  0xba   : > { %v2330_v39 = vpop.permute.xlu1 %270  ;;  %v2332_v29 = vpop.permute.xlu0 %334 }
  0xbb   : > { %v1185_v49 = vcombine.low %v2318_v57, %v2328_v26  ;;  %1754 = vrot.lane.b32.xlu1 %v1753_v10, %s1896_s21  ;;  %v614_v44 = vcombine.low %v2330_v39, %v2072_v42  ;;  %v1225_v22 = vcombine.low %v2309_v53, %v2332_v29 }
  0xbd   : > { %v2348_v33 = vrot.slane %v1185_v49, %v2107_v9  ;;  %v2362_v61 = vrot.slane %v614_v44, %v2098_v56 }
  0xbe   : > { %v307_v52 = vpop.permute.xlu1 %306  ;;  %v2352_v54 = vpop.permute.xlu0 %274 }
  0xbf   : > { %2632 = vst [vmem:[#allocation3_spill] sm:$0xff] %v2348_v33  ;;  %v630_v20 = vcombine.low %v2352_v54, %v2084_v46  ;;  %1764 = vrot.lane.b32.xlu1 %v2214_v11, %s1897_s22 }
  0xc1   : > { %v2365_v4 = vrot.slane %v630_v20, %v2098_v56 }
  0xc2   : > { %v315_v8 = vpop.permute.xlu1 %314  ;;  %v311_v10 = vpop.permute.xlu0 %310 }
  0xc3   : > { %1774 = vrot.lane.b32.xlu1 %v1773_v25, %s1897_s22  ;;  %v662_v31 = vcombine.low %v307_v52, %v315_v8  ;;  %v646_v21 = vcombine.low %v2081_v45, %v311_v10  ;;  %v678_v11 = vcombine.low %v2362_v61, %v2365_v4 }
  0xc5   : > { %v670_v62 = vrot.slane %v662_v31, %v2098_v56  ;;  %v654_v0 = vrot.slane %v646_v21, %v2098_v56  ;;  %v2383_v25 = vrot.slane %v678_v11, %v2107_v9 }
  0xc6   : > { %v2375_v43 = vpop.permute.xlu1 %332  ;;  %v325_v47 = vpop.permute.xlu0 %324 }
  0xc7   : > { %v750_v27 = vcombine.low %v325_v47, %v2375_v43  ;;  %1784 = vrot.lane.b32.xlu1 %v2216_v14, %s1898_s23  ;;  %v710_v23 = vcombine.low %v654_v0, %v670_v62  ;;  %v1233_v14 = vrot.slane %v1225_v22, %v2098_v56  ;;  %v1218_v22 = vcombine.high %v2345_v15, %v2348_v33 }
  0xc8   : > { %v631_v33 = vcombine.high %v2352_v54, %v2084_v46  ;;  %v711_v13 = vcombine.high %v654_v0, %v670_v62  ;;  %v751_v46 = vcombine.high %v325_v47, %v2375_v43  ;;  %v1122_v0 = vcombine.high %v2060_v40, %v2287_v18 }
  0xc9   : > { %v2386_v49 = vrot.slane %v710_v23, %v2107_v9  ;;  %v758_v24 = vrot.slane %v750_v27, %v2098_v56  ;;  %v1106_v43 = vcombine.high %v2262_v58, %v2049_v36 }
  0xca   : > { %v329_v44 = vpop.permute.xlu1 %328  ;;  %v331_v20 = vpop.permute.xlu0 %330  ;;  %v765_v47 = vrot.slane %v751_v46, %v2098_v56 }
  0xcb   : > { %v773_v55 = vrot.slane %v329_v44, %v2098_v56  ;;  %v1248_v31 = vrot.slane %v331_v20, %v2098_v56  ;;  %1794 = vrot.lane.b32.xlu1 %v1793_v28, %s1898_s23  ;;  %v1186_v28 = vcombine.high %v2318_v57, %v2328_v26  ;;  %v615_v26 = vcombine.high %v2330_v39, %v2072_v42 }
  0xcc   : > { %v766_v15 = vcombine.high %v329_v44, %v1900_v50  ;;  %v1226_v44 = vcombine.high %v2309_v53, %v2332_v29 }
  0xcd   : > { %v781_v11 = vcombine.low %v758_v24, %v773_v55  ;;  %v1256_v63 = vcombine.low %v1233_v14, %v1248_v31  ;;  %v1200_v12 = vrot.slane %v1186_v28, %v2107_v9  ;;  %v782_v39 = vcombine.high %v758_v24, %v773_v55 }
  0xce   : > { %v2442_v62 = vrot.slane %v766_v15, %v2098_v56  ;;  %v1120_v24 = vrot.slane %v1106_v43, %v2098_v56 }
  0xcf   : > { %1804 = vrot.lane.b32.xlu1 %v2218_v16, %s1899_s24  ;;  %v2398_v23 = vrot.slane %v781_v11, %v2107_v9  ;;  %v2401_v27 = vrot.slane %v1256_v63, %v2107_v9  ;;  %v663_v16 = vcombine.high %v307_v52, %v315_v8  ;;  %v647_v11 = vcombine.high %v2081_v45, %v311_v10 }
  0xd0   : > { %v1257_v63 = vcombine.high %v1233_v14, %v1248_v31  ;;  %v743_v45 = vcombine.high %v2383_v25, %v2386_v49  ;;  %v645_v10 = vrot.slane %v631_v33, %v2098_v56  ;;  %v1090_v33 = vcombine.high %v2264_v59, %v2052_v37 }
  0xd1   : > { %v1288_v21 = vcombine.high %v2401_v27, %v1900_v50  ;;  %v813_v57 = vcombine.high %v2398_v23, %v1900_v50  ;;  %v2426_v52 = vrot.slane %v663_v16, %v2098_v56  ;;  %v2429_v42 = vrot.slane %v647_v11, %v2098_v56 }
  0xd2   : > { %v1271_v54 = vrot.slane %v1257_v63, %v2107_v9  ;;  %v796_v18 = vrot.slane %v782_v39, %v2107_v9  ;;  %v798_v58 = vcombine.high %v765_v47, %v2442_v62  ;;  %v1136_v37 = vrot.slane %v1122_v0, %v2098_v56 }
  0xd3   : > { %1814 = vrot.lane.b32.xlu1 %v1813_v48, %s1899_s24  ;;  %v1758_v1 = vpack.i.bf16 %v1288_v21, %v1218_v22  ;;  %v1168_v48 = vrot.slane %v1154_v51, %v2107_v9  ;;  %v1768_v8 = vpack.i.bf16 %v813_v57, %v743_v45  ;;  %v2438_v51 = vrot.slane %v615_v26, %v2098_v56 }
  0xd4   : > { %v727_v15 = vcombine.high %v2429_v42, %v2426_v52  ;;  %v1104_v55 = vrot.slane %v1090_v33, %v2098_v56  ;;  %v1289_v21 = vcombine.high %v1271_v54, %v1900_v50  ;;  %v812_v53 = vrot.slane %v798_v58, %v2107_v9 }
  0xd5   : > { %1759 = vrot.lane.b32.xlu0 %v1758_v1, %s1895_s20  ;;  %v679_v1 = vcombine.high %v2362_v61, %v2365_v4  ;;  %v725_v61 = vrot.slane %v711_v13, %v2107_v9  ;;  %v1219_v4 = vcombine.low %v1168_v48, %v1200_v12  ;;  %v695_v36 = vcombine.high %v2438_v51, %v645_v10 }
  0xd6   : > { %v1240_v22 = vrot.slane %v1226_v44, %v2098_v56  ;;  %v1220_v16 = vcombine.high %v1168_v48, %v1200_v12  ;;  %v1169_v11 = vcombine.low %v1104_v55, %v1120_v24  ;;  %v814_v26 = vcombine.high %v796_v18, %v1900_v50 }
  0xd7   : > { %1824 = vrot.lane.b32.xlu1 %v2266_v60, %s1901_s25  ;;  %v1138_v60 = vcombine.high %v2289_v35, %v2311_v19  ;;  %v693_v40 = vrot.slane %v679_v1, %v2107_v9  ;;  %v1241_v35 = vcombine.high %v331_v20, %v1900_v50  ;;  %v1778_v19 = vpack.i.bf16 %v1271_v54, %v1219_v4 }
  0xd8   : > { %v741_v20 = vrot.slane %v727_v15, %v2107_v9  ;;  %v709_v29 = vrot.slane %v695_v36, %v2107_v9  ;;  %v1798_v57 = vpack.i.bf16 %v1289_v21, %v1220_v16  ;;  %v816_v45 = vcombine.high %v812_v53, %v1900_v50 }
  0xd9   : > { %1769 = vrot.lane.b32.xlu0 %v1768_v8, %s1895_s20  ;;  %v1152_v59 = vrot.slane %v1138_v60, %v2098_v56  ;;  %v1255_v31 = vrot.slane %v1241_v35, %v2098_v56  ;;  %v726_v56 = vcombine.low %v2429_v42, %v2426_v52  ;;  %v745_v12 = vcombine.high %v693_v40, %v725_v61 }
  0xda   : > { %v1177_v48 = vrot.slane %v1169_v11, %v2107_v9  ;;  %v694_v1 = vcombine.low %v2438_v51, %v645_v10  ;;  %v797_v39 = vcombine.low %v765_v47, %v2442_v62  ;;  %v1170_v15 = vcombine.high %v1104_v55, %v1120_v24 }
  0xdb   : > { %1834 = vrot.lane.b32.xlu1 %v2334_v32, %s1901_s25  ;;  %v744_v32 = vcombine.low %v693_v40, %v725_v61  ;;  %v1201_v28 = vcombine.low %v1136_v37, %v1152_v59  ;;  %v1272_v63 = vcombine.low %v1240_v22, %v1255_v31  ;;  %v1808_v54 = vpack.i.bf16 %v814_v26, %v745_v12 }
  0xdc   : > { %v734_v60 = vrot.slane %v726_v56, %v2107_v9  ;;  %v702_v42 = vrot.slane %v694_v1, %v2107_v9  ;;  %v805_v4 = vrot.slane %v797_v39, %v2107_v9  ;;  %v1202_v43 = vcombine.high %v1136_v37, %v1152_v59 }
  0xdd   : > { %1779 = vrot.lane.b32.xlu0 %v1778_v19, %s1896_s21  ;;  %v1788_v14 = vpack.i.bf16 %v796_v18, %v744_v32  ;;  %v1209_v46 = vrot.slane %v1201_v28, %v2107_v9  ;;  %v1280_v8 = vrot.slane %v1272_v63, %v2107_v9  ;;  %v1273_v47 = vcombine.high %v1240_v22, %v1255_v31  ;;  %v1584_v31 = vld [vmem:[%s2627_s2] sm:$0xff] }
  0xde   : > { %v746_v51 = vcombine.low %v702_v42, %v734_v60  ;;  %v815_v18 = vcombine.high %v805_v4, %v1900_v50  ;;  %v1216_v35 = vrot.slane %v1202_v43, %v2107_v9  ;;  %v747_v19 = vcombine.high %v702_v42, %v734_v60 }
  0xdf   : > { %1844 = vrot.lane.b32.xlu1 %v2339_v3, %s1902_s26  ;;  %v748_v3 = vcombine.low %v709_v29, %v741_v20  ;;  %v1221_v52 = vcombine.low %v1177_v48, %v1209_v46  ;;  %v1290_v62 = vcombine.high %v1280_v8, %v1900_v50  ;;  %v1222_v33 = vcombine.high %v1177_v48, %v1209_v46 }
  0xe0   : > { %v1828_v10 = vpack.i.bf16 %v805_v4, %v746_v51  ;;  %v1184_v36 = vrot.slane %v1170_v15, %v2107_v9  ;;  %v1848_v58 = vpack.i.bf16 %v815_v18, %v747_v19  ;;  %v1287_v44 = vrot.slane %v1273_v47, %v2107_v9 }
  0xe1   : > { %1789 = vrot.lane.b32.xlu0 %v1788_v14, %s1896_s21  ;;  %v1863_v13 = vpack.i.bf16 %v812_v53, %v748_v3  ;;  %v1818_v61 = vpack.i.bf16 %v1280_v8, %v1221_v52  ;;  %v1838_v40 = vpack.i.bf16 %v1290_v62, %v1222_v33  ;;  %v1903_v55 = vmov 0  }
  0xe2   : > { %v1223_v37 = vcombine.low %v1184_v36, %v1216_v35  ;;  %v1291_v32 = vcombine.high %v1287_v44, %v1900_v50  ;;  %v1224_v24 = vcombine.high %v1184_v36, %v1216_v35  ;;  %1635 = vmatprep.mubr.bf16.mxu0 %v1903_v55  ;;  %1878 = vset.pattern.permute.xlu0 %v1903_v55 }
  0xe3   : > { %1854 = vrot.lane.b32.xlu1 %v2367_v30, %s1902_s26  ;;  %v749_v30 = vcombine.high %v709_v29, %v741_v20  ;;  %v2633_v39 = vcombine.low %v2174_v5, %v2177_v2  ;;  %v2634_v8 = vcombine.low %v2136_v38, %v2152_v41  ;;  %v2636_v51 = vcombine.low %v2272_v7, %v2276_v17 }
  0xe4   : > { %v1858_v59 = vpack.i.bf16 %v1287_v44, %v1223_v37  ;;  %v1868_v20 = vpack.i.bf16 %v1291_v32, %v1224_v24 }
  0xe5   : > { %1799 = vrot.lane.b32.xlu0 %v1798_v57, %s1897_s22  ;;  %v1873_v0 = vpack.i.bf16 %v816_v45, %v749_v30 }
  0xe7   : > { %1864 = vrot.lane.b32.xlu1 %v1863_v13, %s1901_s25 }
  0xe9   : > { %1809 = vrot.lane.b32.xlu0 %v1808_v54, %s1897_s22 }
  0xeb   : > { %1874 = vrot.lane.b32.xlu1 %v1873_v0, %s1902_s26 }
  0xed   : > { %1819 = vrot.lane.b32.xlu0 %v1818_v61, %s1898_s23  ;;  %v2635_v61 = vcombine.low %v2240_v34, %v2252_v6 }
  0xf1   : > { %1829 = vrot.lane.b32.xlu0 %v1828_v10, %s1898_s23 }
  0xf5   : > { %1839 = vrot.lane.b32.xlu0 %v1838_v40, %s1899_s24 }
  0xf9   : > { %1849 = vrot.lane.b32.xlu0 %v1848_v58, %s1899_s24 }
  0xfd   : > { %1859 = vrot.lane.b32.xlu0 %v1858_v59, %s1901_s25 }
 0x101   : > { %1869 = vrot.lane.b32.xlu0 %v1868_v20, %s1902_s26 }
 0x105   : > { %1587 = vperm.xlu0 %1878, %v1584_v31  }
 0x115   : > { %v1740_v28 = vpop.permute.xlu0 %1739 }
 0x116   : > { %v1742_v3 = vunpack.i.h.bf16 %v1740_v28  ;;  %v1741_v63 = vunpack.i.l.bf16 %v1740_v28 }
 0x118   : > { %v1552_v54 = vsel %vm1516_vm2, %v2633_v39, %v1742_v3  ;;  %v1551_v0 = vsel %vm1516_vm2, %v2634_v8, %v1741_v63 }
 0x119   : > { %v1750_v16 = vpop.permute.xlu0 %1749 }
 0x11a   : > { %v1752_v46 = vunpack.i.h.bf16 %v1750_v16  ;;  %v1751_v56 = vunpack.i.l.bf16 %v1750_v16 }
 0x11c   : > { %v1555_v38 = vsel %vm1521_vm3, %v1551_v0, %v1751_v56  ;;  %v1556_v41 = vsel %vm1521_vm3, %v1552_v54, %v1752_v46 }
 0x129   : > { %v1745_v9 = vpop.permute.xlu1 %1744 }
 0x12a   : > { %v1747_v26 = vunpack.i.h.bf16 %v1745_v9  ;;  %v1746_v13 = vunpack.i.l.bf16 %v1745_v9 }
 0x12c   : > { %v1517_v4 = vsel %vm1516_vm2, %v2635_v61, %v1746_v13  ;;  %v1518_v5 = vsel %vm1516_vm2, %v2636_v51, %v1747_v26 }
 0x12d   : > { %v1755_v14 = vpop.permute.xlu1 %1754 }
 0x12e   : > { %v1757_v12 = vunpack.i.h.bf16 %v1755_v14  ;;  %v1756_v48 = vunpack.i.l.bf16 %v1755_v14 }
 0x130   : > { %v1522_v43 = vsel %vm1521_vm3, %v1517_v4, %v1756_v48  ;;  %v1523_v33 = vsel %vm1521_vm3, %v1518_v5, %v1757_v12 }
 0x131   : > { %v1765_v21 = vpop.permute.xlu1 %1764 }
 0x132   : > { %v1767_v30 = vunpack.i.h.bf16 %v1765_v21  ;;  %v1766_v1 = vunpack.i.l.bf16 %v1765_v21 }
 0x134   : > { %v1560_v34 = vsel %vm1526_vm4, %v1556_v41, %v1767_v30  ;;  %v1559_v6 = vsel %vm1526_vm4, %v1555_v38, %v1766_v1 }
 0x135   : > { %v2513_v29 = vpop.permute.xlu1 %1774 }
 0x136   : > { %v1777_v7 = vunpack.i.h.bf16 %v2513_v29  ;;  %v1776_v17 = vunpack.i.l.bf16 %v2513_v29 }
 0x138   : > { %v1527_v21 = vsel %vm1526_vm4, %v1522_v43, %v1776_v17  ;;  %v1528_v29 = vsel %vm1526_vm4, %v1523_v33, %v1777_v7  ;;  %v2637_v33 = vld [vmem:[#allocation2_spill] sm:$0xff] }
 0x139   : > { %v1785_v50 = vpop.permute.xlu1 %1784 }
 0x13a   : > { %v1787_v60 = vunpack.i.h.bf16 %v1785_v50  ;;  %v1786_v52 = vunpack.i.l.bf16 %v1785_v50 }
 0x13c   : > { %v1563_v40 = vsel %vm1531_vm5, %v1559_v6, %v1786_v52  ;;  %v1564_v18 = vsel %vm1531_vm5, %v1560_v34, %v1787_v60  ;;  %v2638_v34 = vld [vmem:[#allocation3_spill] sm:$0xff] }
 0x13d   : > { %v2515_v53 = vpop.permute.xlu1 %1794  ;;  %v2639_v6 = vcombine.low %v2637_v33, %v2638_v34 }
 0x13e   : > { %v1797_v19 = vunpack.i.h.bf16 %v2515_v53  ;;  %v1796_v36 = vunpack.i.l.bf16 %v2515_v53 }
 0x140   : > { %v1533_v16 = vsel %vm1531_vm5, %v1528_v29, %v1797_v19 }
 0x141   : > { %v1805_v22 = vpop.permute.xlu1 %1804 }
 0x142   : > { %v1807_v2 = vunpack.i.h.bf16 %v1805_v22  ;;  %v1806_v10 = vunpack.i.l.bf16 %v1805_v22  ;;  %v1532_v22 = vsel %vm1531_vm5, %v1527_v21, %v1796_v36 }
 0x144   : > { %v1567_v44 = vsel %vm1536_vm6, %v1563_v40, %v1806_v10  ;;  %v1568_v37 = vsel %vm1536_vm6, %v1564_v18, %v1807_v2 }
 0x145   : > { %v2517_v11 = vpop.permute.xlu1 %1814 }
 0x146   : > { %v1817_v59 = vunpack.i.h.bf16 %v2517_v11  ;;  %v1816_v32 = vunpack.i.l.bf16 %v2517_v11 }
 0x147   : > { %v2519_v57 = vpop.permute.xlu0 %1759 }
 0x148   : > { %v1537_v63 = vsel %vm1536_vm6, %v1532_v22, %v1816_v32  ;;  %v1538_v26 = vsel %vm1536_vm6, %v1533_v16, %v1817_v59  ;;  %v1762_v0 = vunpack.i.h.bf16 %v2519_v57  ;;  %v1761_v60 = vunpack.i.l.bf16 %v2519_v57 }
 0x149   : > { %v1825_v45 = vpop.permute.xlu1 %1824 }
 0x14a   : > { %v1827_v15 = vunpack.i.h.bf16 %v1825_v45  ;;  %v1826_v47 = vunpack.i.l.bf16 %v1825_v45  ;;  %v1554_v43 = vsel %vm1516_vm2, %v2401_v27, %v1762_v0  ;;  %v1553_v57 = vsel %vm1516_vm2, %v2639_v6, %v1761_v60 }
 0x14b   : > { %v2529_v42 = vpop.permute.xlu0 %1769 }
 0x14c   : > { %v1571_v9 = vsel %vm1541_vm7, %v1567_v44, %v1826_v47  ;;  %v1572_v14 = vsel %vm1541_vm7, %v1568_v37, %v1827_v15  ;;  %v1772_v52 = vunpack.i.h.bf16 %v2529_v42  ;;  %v1771_v61 = vunpack.i.l.bf16 %v2529_v42 }
 0x14d   : > { %v1835_v62 = vpop.permute.xlu1 %1834  ;;  %v2640_v15 = vcombine.low %v2383_v25, %v2386_v49 }
 0x14e   : > { %v1837_v20 = vunpack.i.h.bf16 %v1835_v62  ;;  %v1836_v31 = vunpack.i.l.bf16 %v1835_v62  ;;  %v1520_v42 = vsel %vm1516_vm2, %v2398_v23, %v1772_v52 }
 0x14f   : > { %v2549_v35 = vpop.permute.xlu0 %1779  ;;  %v1519_v47 = vsel %vm1516_vm2, %v2640_v15, %v1771_v61 }
 0x150   : > { %v1542_v46 = vsel %vm1541_vm7, %v1537_v63, %v1836_v31  ;;  %v1543_v56 = vsel %vm1541_vm7, %v1538_v26, %v1837_v20  ;;  %v1782_v7 = vunpack.i.h.bf16 %v2549_v35  ;;  %v1781_v17 = vunpack.i.l.bf16 %v2549_v35 }
 0x151   : > { %v1845_v58 = vpop.permute.xlu1 %1844 }
 0x152   : > { %v1847_v24 = vunpack.i.h.bf16 %v1845_v58  ;;  %v1846_v55 = vunpack.i.l.bf16 %v1845_v58  ;;  %v1557_v20 = vsel %vm1521_vm3, %v1553_v57, %v1781_v17  ;;  %v1558_v31 = vsel %vm1521_vm3, %v1554_v43, %v1782_v7 }
 0x153   : > { %v1790_v50 = vpop.permute.xlu0 %1789 }
 0x154   : > { %v1575_v53 = vsel %vm1546_vm8, %v1571_v9, %v1846_v55  ;;  %v1576_v28 = vsel %vm1546_vm8, %v1572_v14, %v1847_v24  ;;  %v1792_v4 = vunpack.i.h.bf16 %v1790_v50  ;;  %v1791_v51 = vunpack.i.l.bf16 %v1790_v50 }
 0x155   : > { %v1855_v11 = vpop.permute.xlu1 %1854  ;;  %v1580_v3 = vpack.c.bf16 %v1576_v28, %v1575_v53 }
 0x156   : > { %v1857_v13 = vunpack.i.h.bf16 %v1855_v11  ;;  %v1856_v45 = vunpack.i.l.bf16 %v1855_v11  ;;  %v1524_v40 = vsel %vm1521_vm3, %v1519_v47, %v1791_v51  ;;  %v1525_v27 = vsel %vm1521_vm3, %v1520_v42, %v1792_v4 }
 0x157   : > { %1603 = vmatprep.subr.bf16.mxu0 %v1580_v3  ;;  %v1800_v12 = vpop.permute.xlu0 %1799 }
 0x158   : > { %v1547_v48 = vsel %vm1546_vm8, %v1542_v46, %v1856_v45  ;;  %v1548_v30 = vsel %vm1546_vm8, %v1543_v56, %v1857_v13  ;;  %v1802_v44 = vunpack.i.h.bf16 %v1800_v12  ;;  %v1801_v37 = vunpack.i.l.bf16 %v1800_v12 }
 0x159   : > { %v1579_v1 = vpack.c.bf16 %v1548_v30, %v1547_v48  ;;  %v1865_v2 = vpop.permute.xlu1 %1864  ;;  %v1904_v13 = vmov 65535  }
 0x15a   : > { %v1867_v59 = vunpack.i.h.bf16 %v1865_v2  ;;  %v1866_v32 = vunpack.i.l.bf16 %v1865_v2  ;;  %v1561_v63 = vsel %vm1526_vm4, %v1557_v20, %v1801_v37  ;;  %v1562_v26 = vsel %vm1526_vm4, %v1558_v31, %v1802_v44 }
 0x15b   : > { %1604 = vmatpush1.bf16.msra.mxu0 %v1579_v1  ;;  %v1810_v39 = vpop.permute.xlu0 %1809  ;;  %v1595_v45 = vsel %vm1594_vm9, 4294967295, %v1904_v13 }
 0x15c   : > { %v1812_v10 = vunpack.i.h.bf16 %v1810_v39  ;;  %v1811_v62 = vunpack.i.l.bf16 %v1810_v39 }
 0x15d   : > { %v1875_v35 = vpop.permute.xlu1 %1874 }
 0x15e   : > { %v1529_v19 = vsel %vm1526_vm4, %v1524_v40, %v1811_v62  ;;  %v1530_v36 = vsel %vm1526_vm4, %v1525_v27, %v1812_v10  ;;  %v1877_v22 = vunpack.i.h.bf16 %v1875_v35  ;;  %v1876_v16 = vunpack.i.l.bf16 %v1875_v35  ;;  %v1583_v62 = vld [vmem:[%s2626_s1] sm:$0xf] }
 0x15f   : > { %v1820_v54 = vpop.permute.xlu0 %1819 }
 0x160   : > { %v1822_v9 = vunpack.i.h.bf16 %v1820_v54  ;;  %v1821_v14 = vunpack.i.l.bf16 %v1820_v54 }
 0x162   : > { %v1565_v46 = vsel %vm1531_vm5, %v1561_v63, %v1821_v14  ;;  %v1566_v56 = vsel %vm1531_vm5, %v1562_v26, %v1822_v9 }
 0x163   : > { %v1830_v8 = vpop.permute.xlu0 %1829 }
 0x164   : > { %v1832_v38 = vunpack.i.h.bf16 %v1830_v8  ;;  %v1831_v41 = vunpack.i.l.bf16 %v1830_v8 }
 0x166   : > { %v1534_v25 = vsel %vm1531_vm5, %v1529_v19, %v1831_v41  ;;  %v1535_v49 = vsel %vm1531_vm5, %v1530_v36, %v1832_v38 }
 0x167   : > { %v1840_v5 = vpop.permute.xlu0 %1839 }
 0x168   : > { %v1842_v29 = vunpack.i.h.bf16 %v1840_v5  ;;  %v1841_v50 = vunpack.i.l.bf16 %v1840_v5  ;;  %v1596_v5 = vsel %vm284_vm1, %v1595_v45, 0 }
 0x16a   : > { %v1569_v1 = vsel %vm1536_vm6, %v1565_v46, %v1841_v50  ;;  %v1570_v39 = vsel %vm1536_vm6, %v1566_v56, %v1842_v29 }
 0x16b   : > { %v1850_v18 = vpop.permute.xlu0 %1849 }
 0x16c   : > { %v1852_v58 = vunpack.i.h.bf16 %v1850_v18  ;;  %v1851_v23 = vunpack.i.l.bf16 %v1850_v18 }
 0x16e   : > { %v1539_v24 = vsel %vm1536_vm6, %v1534_v25, %v1851_v23  ;;  %v1540_v55 = vsel %vm1536_vm6, %v1535_v49, %v1852_v58 }
 0x16f   : > { %v1860_v21 = vpop.permute.xlu0 %1859  ;;  %v1544_v53 = vsel %vm1541_vm7, %v1539_v24, %v1866_v32  ;;  %v1545_v28 = vsel %vm1541_vm7, %v1540_v55, %v1867_v59 }
 0x170   : > { %v1862_v11 = vunpack.i.h.bf16 %v1860_v21  ;;  %v1861_v3 = vunpack.i.l.bf16 %v1860_v21  ;;  %v1549_v48 = vsel %vm1546_vm8, %v1544_v53, %v1876_v16  ;;  %v1550_v30 = vsel %vm1546_vm8, %v1545_v28, %v1877_v22 }
 0x171   : > { %v1581_v4 = vpack.c.bf16 %v1550_v30, %v1549_v48 }
 0x172   : > { %v1573_v0 = vsel %vm1541_vm7, %v1569_v1, %v1861_v3  ;;  %v1574_v60 = vsel %vm1541_vm7, %v1570_v39, %v1862_v11 }
 0x173   : > { %v1870_v12 = vpop.permute.xlu0 %1869  ;;  %v1598_v10 = vand.u32 %v1596_v5, %v1581_v4 }
 0x174   : > { %v1872_v54 = vunpack.i.h.bf16 %v1870_v12  ;;  %v1871_v8 = vunpack.i.l.bf16 %v1870_v12 }
 0x176   : > { %v1577_v52 = vsel %vm1546_vm8, %v1573_v0, %v1871_v8  ;;  %v1578_v61 = vsel %vm1546_vm8, %v1574_v60, %v1872_v54 }
 0x177   : > { %v1582_v51 = vpack.c.bf16 %v1578_v61, %v1577_v52 }
 0x179   : > { %v1601_v2 = vand.u32 %v1596_v5, %v1582_v51 }
 0x17b   : > { %1605 = vmatprep.subr.bf16.mxu0 %v1601_v2 }
 0x17c   : > { %1606 = vmatpush1.bf16.msra.mxu0 %v1598_v10 }
 0x17f   : > { %1711 = vmatmul.mubr.msk.bf16.vlgmr.msra.gmra.mrb[0].mxu0 %vm1590_vm10, %v1583_v62 }
 0x184   : > { %v1588_v38 = vpop.permute.xlu0 %1587 }
 0x252   : > { %v1637_v41 = vpop.f32.mrb[0].mxu0 }
 0x253   : > { %v1638_v43 = vadd.f32 %v1637_v41, %v1588_v38  ;;  %v1639_v33 = vpop.f32.mrb[1].mxu0 }
 0x254   : > { %v1640_v34 = vadd.f32 %v1639_v33, %v1588_v38  ;;  %v1641_v6 = vpop.f32.mrb[2].mxu0 }
 0x255   : > { %v1644_v57 = vmax.f32 %v1638_v43, 0.0  ;;  %v1642_v42 = vpop.f32.mrb[3].mxu0 }
 0x256   : > { %v1645_v15 = vmax.f32 %v1640_v34, 0.0 }
 0x257   : > { %1646 = vst [vmem:[%s170_s7] sm:$0xff] %v1644_v57 }
 0x258   : > { %1647 = vst [vmem:[%s170_s7 + $0x8] sm:$0xff] %v1645_v15 }
 0x259 PF: > { %s13_s12 = sadd.s32 1, %s1889_s12  }
 0x25a   : > { %p10_p4 = scmp.ge.s32.totalorder %s13_s12, 6  }
 0x25c   :  { %12 = sbr.rel (!%p10_p4) target bundleno = 1 (0x1), region = 62 }

// kernel: a_call__.7
= control target key start
LH: loop header
LB: loop body
LE: loop exit
PB: predicated region body
PF: predicated region fallthrough
CT: control target
= control target key end

     0   :  { %s4242_s12 = smov 0   ;;  %s6804_s0 = inlined_call_operand.vmem [shape: f32[4,8,18,18], index: 0, kind: input, shape index: {}]   ;;  %s6805_s1 = inlined_call_operand.vmem [shape: bf16[8,72], index: 1, kind: input, shape index: {}]   ;;  %s6806_s2 = inlined_call_operand.vmem [shape: f32[8,1], index: 2, kind: input, shape index: {}]   ;;  %s6807_s3 = inlined_call_operand.vmem [shape: f32[4,8,256], index: 3, kind: output, shape index: {}]  }
   0x1 LB: > { %s3835_s13 = sadd.s32 4294967295, %s4208_s12   ;;  %p3839_p0 = scmp.ge.s32.totalorder %s4208_s12, 1  ;;  %s4208_s12 = sphi %s4242_s12, %s13_s12  }
   0x2   : > { %p137_p1 = scmp.lt.s32.totalorder %s4208_s12, 5 }
   0x4   : > { %p138_p2 = pnand %p3839_p0, %p137_p1 }
   0x6   : > { %141 = sbr.rel (%p138_p2) target bundleno = 711 (0x2c7), region = 32 }
   0xd   : > { %p161_p3 = scmp.lt.s32.totalorder %s3835_s13, 3  ;;  %s4210_s18 = smov 127   ;;  %vm469_vm0 = vcmask 1045504   ;;  %v627_v51 = vlaneseq  ;;  %v4212_v54 = vmov 1983009808   ;;  %vm316_vm1 = vcmask 1046528  }
   0xe   : > { %s4211_s19 = smov 126   ;;  %v625_v55 = vunpack.c.l.s4 %v4212_v54  ;;  %v4213_v62 = vmov 1934713408   ;;  %s4214_s20 = smov 16   ;;  %vm3574_vm2 = vcmask 130048   ;;  %vm3584_vm3 = vcmask 261120  }
   0xf   : > { %s7238_s13 = smov (!%p161_p3, %s3835_s13), 3  ;;  %v689_v63 = vunpack.c.l.s4 %v4213_v62  ;;  %s4215_s21 = smov 32   ;;  %vm3594_vm4 = vcmask 392192   ;;  %vm3604_vm5 = vcmask 523264   ;;  %vm3614_vm6 = vcmask 654336  }
  0x10   : > { %s3848_s14 = smul.u32 192, %s7238_s13  ;;  %s4216_s22 = smov 48   ;;  %vm3624_vm7 = vcmask 785408   ;;  %vm3634_vm8 = vcmask 916480   ;;  %vm3728_vm9 = vcmask 1043456   ;;  %vm3724_vm10 = vcmask 588800  }
  0x11   : > { %s4217_s23 = smov 64   ;;  %s4218_s24 = smov 80  }
  0x12   : > { %s4256_s17 = scalar_lea.vmem %s6804_s0, %s3848_s14  ;;  %s4219_s25 = smov 96  }
  0x13   : > { %v4259_v0 = vld [vmem:[%s4256_s17 + $0x18] sm:$0xff]  ;;  %v4262_v1 = vld [vmem:[%s4256_s17] sm:$0xff]  ;;  %v4272_v3 = vld [vmem:[%s4256_s17 + $0x8] sm:$0xff]  ;;  %s4220_s26 = smov 112   ;;  %s3847_s4 = sshll.u32 %s7238_s13, 4 }
  0x14   : > { %216 = vrot.lane.b32.xlu1 %v4259_v0, %s4210_s18  ;;  %212 = vrot.lane.b32.xlu0 %v4262_v1, %s4210_s18  ;;  %v4269_v2 = vld [vmem:[%s4256_s17 + $0x20] sm:$0xff]  ;;  %v4279_v4 = vld [vmem:[%s4256_s17 + $0x38] sm:$0xff]  ;;  %v471_v17 = vrot.slane %v4272_v3, 2  ;;  %v475_v47 = vrot.slane %v4259_v0, 2  ;;  %v470_v48 = vrot.slane %v4262_v1, 2  ;;  %s170_s7 = scalar_lea.vmem %s6807_s3, %s3847_s4 }
  0x15   : > { %v4282_v5 = vld [vmem:[%s4256_s17 + $0x30] sm:$0xff]  ;;  %v4292_v7 = vld [vmem:[%s4256_s17 + $0x48] sm:$0xff]  ;;  %v4302_v9 = vld [vmem:[%s4256_s17 + $0x60] sm:$0xff]  ;;  %v476_v10 = vrot.slane %v4269_v2, 2  ;;  %v481_v26 = vrot.slane %v4279_v4, 2 }
  0x16   : > { %v4289_v6 = vld [vmem:[%s4256_s17 + $0x50] sm:$0xff]  ;;  %v4299_v8 = vld [vmem:[%s4256_s17 + $0x68] sm:$0xff]  ;;  %v4313_v12 = vld [vmem:[%s4256_s17 + $0x80] sm:$0xff]  ;;  %v485_v50 = vrot.slane %v4292_v7, 2  ;;  %v4413_v53 = vsel %vm469_vm0, %v470_v48, %v471_v17  ;;  %v480_v57 = vrot.slane %v4282_v5, 2  ;;  %v490_v60 = vrot.slane %v4302_v9, 2 }
  0x17   : > { %v4310_v11 = vld [vmem:[%s4256_s17 + $0x28] sm:$0x3]  ;;  %v4316_v13 = vld [vmem:[%s4256_s17 + $0x78] sm:$0xff]  ;;  %v4331_v18 = vld [vmem:[%s4256_s17 + $0x90] sm:$0xff]  ;;  %v486_v23 = vrot.slane %v4289_v6, 2  ;;  %v496_v28 = vrot.slane %v4313_v12, 2  ;;  %v4410_v52 = vsel %vm469_vm0, %v475_v47, %v476_v10  ;;  %v1846_v47 = vcombine.low %v4272_v3, %v4279_v4 }
  0x18   : > { %218 = vrot.lane.b32.xlu1 %v4269_v2, %s4210_s18  ;;  %214 = vrot.lane.b32.xlu0 %v4272_v3, %s4210_s18  ;;  %v478_v14 = vrot.slane %v4310_v11, 2  ;;  %v4327_v16 = vld [vmem:[%s4256_s17 + $0x98] sm:$0xff]  ;;  %v4334_v19 = vld [vmem:[%s4256_s17 + $0x10] sm:$0x3]  ;;  %v491_v39 = vrot.slane %v4299_v8, 2  ;;  %6959 = vst [vmem:[#allocation10_spill] sm:$0xff] %v4410_v52  ;;  %v4424_v58 = vsel %vm469_vm0, %v480_v57, %v481_v26 }
  0x19   : > { %v4337_v20 = vld [vmem:[%s4256_s17 + $0x58] sm:$0x3]  ;;  %v4340_v21 = vld [vmem:[%s4256_s17 + $0x40] sm:$0x3]  ;;  %v473_v22 = vrot.slane %v4334_v19, 2  ;;  %v4363_v32 = vld [vmem:[%s4256_s17 + $0xb0] sm:$0xff]  ;;  %v4416_v56 = vsel %vm469_vm0, %v485_v50, %v486_v23  ;;  %v1878_v54 = vcombine.low %v4299_v8, %v4327_v16 }
  0x1a   : > { %v4320_v15 = vsel %vm469_vm0, %v476_v10, %v478_v14  ;;  %v488_v24 = vrot.slane %v4337_v20, 2  ;;  %v4346_v25 = vld [vmem:[%s4256_s17 + $0x88] sm:$0x3]  ;;  %v483_v27 = vrot.slane %v4340_v21, 2  ;;  %v4375_v36 = vld [vmem:[%s4256_s17 + $0x70] sm:$0x3]  ;;  %v626_v10 = vunpack.c.0.s8 %v625_v55 }
  0x1b   : > { %6951 = vst [vmem:[#allocation2_spill] sm:$0xff] %v4320_v15  ;;  %v4356_v29 = vsel %vm469_vm0, %v471_v17, %v473_v22  ;;  %v498_v31 = vrot.slane %v4346_v25, 2  ;;  %v4366_v33 = vld [vmem:[%s4256_s17 + $0xa8] sm:$0xff]  ;;  %v4378_v37 = vld [vmem:[%s4256_s17 + $0xb8] sm:$0x3]  ;;  %v493_v40 = vrot.slane %v4375_v36, 2  ;;  %v4433_v22 = vsel %vm469_vm0, %v490_v60, %v491_v39 }
  0x1c   : > { %222 = vrot.lane.b32.xlu1 %v4279_v4, %s4210_s18  ;;  %220 = vrot.lane.b32.xlu0 %v4282_v5, %s4210_s18  ;;  %6952 = vst [vmem:[#allocation3_spill] sm:$0xff] %v4356_v29  ;;  %v4359_v30 = vsel %vm469_vm0, %v486_v23, %v488_v24  ;;  %v4369_v34 = vsel %vm469_vm0, %v481_v26, %v483_v27  ;;  %v4385_v38 = vld [vmem:[%s4256_s17 + $0xa0] sm:$0x3]  ;;  %v506_v41 = vrot.slane %v4363_v32, 2  ;;  %v508_v42 = vrot.slane %v4378_v37, 2 }
  0x1d   : > { %6953 = vst [vmem:[#allocation4_spill] sm:$0xff] %v4359_v30  ;;  %6954 = vst [vmem:[#allocation5_spill] sm:$0xff] %v4369_v34  ;;  %v4372_v35 = vsel %vm469_vm0, %v496_v28, %v498_v31  ;;  %v501_v43 = vrot.slane %v4327_v16, 2  ;;  %v503_v44 = vrot.slane %v4385_v38, 2  ;;  %v4394_v45 = vsel %vm469_vm0, %v491_v39, %v493_v40 }
  0x1e   : > { %6955 = vst [vmem:[#allocation6_spill] sm:$0xff] %v4372_v35  ;;  %6956 = vst [vmem:[#allocation7_spill] sm:$0xff] %v4394_v45  ;;  %v4397_v46 = vsel %vm469_vm0, %v506_v41, %v508_v42  ;;  %v495_v59 = vrot.slane %v4316_v13, 2  ;;  %v505_v61 = vrot.slane %v4366_v33, 2  ;;  %v628_v14 = vshrl.u32 %v627_v51, 7 }
  0x1f   : > { %6957 = vst [vmem:[#allocation8_spill] sm:$0xff] %v4397_v46  ;;  %v4406_v49 = vsel %vm469_vm0, %v501_v43, %v503_v44  ;;  %6960 = vst [vmem:[#allocation11_spill] sm:$0xff] %v4413_v53  ;;  %v500_v24 = vrot.slane %v4331_v18, 2  ;;  %v690_v26 = vunpack.c.0.s8 %v689_v63  ;;  %v638_v31 = vcombine.low %v4259_v0, %v4292_v7 }
  0x20   : > { %226 = vrot.lane.b32.xlu1 %v4289_v6, %s4210_s18  ;;  %224 = vrot.lane.b32.xlu0 %v4292_v7, %s4210_s18  ;;  %6958 = vst [vmem:[#allocation9_spill] sm:$0xff] %v4406_v49  ;;  %6961 = vst [vmem:[#allocation12_spill] sm:$0xff] %v4416_v56  ;;  %v4430_v17 = vsel %vm469_vm0, %v495_v59, %v496_v28  ;;  %v4436_v23 = vsel %vm469_vm0, %v505_v61, %v506_v41  ;;  %v317_v55 = vrot.slane %v4262_v1, 1 }
  0x21   : > { %6962 = vst [vmem:[#allocation13_spill] sm:$0xff] %v4424_v58  ;;  %6963 = vst [vmem:[#allocation14_spill] sm:$0xff] %v4430_v17  ;;  %v4444_v27 = vsel %vm469_vm0, %v500_v24, %v501_v43  ;;  %v622_v28 = vcombine.low %v4262_v1, %v4282_v5  ;;  %v4450_v39 = vsub.s32 %v626_v10, %v628_v14 }
  0x22   : > { %6964 = vst [vmem:[#allocation15_spill] sm:$0xff] %v4433_v22  ;;  %6965 = vst [vmem:[#allocation16_spill] sm:$0xff] %v4436_v23  ;;  %v654_v42 = vcombine.low %v4302_v9, %v4331_v18  ;;  %v4460_v43 = vsub.s32 %v690_v26, %v628_v14  ;;  %v670_v44 = vcombine.low %v4316_v13, %v4366_v33 }
  0x23   : > { %6966 = vst [vmem:[#allocation17_spill] sm:$0xff] %v4444_v27  ;;  %v630_v40 = vrot.slane %v622_v28, %v4450_v39  ;;  %v646_v41 = vrot.slane %v638_v31, %v4450_v39  ;;  %v1862_v51 = vcombine.low %v4269_v2, %v4289_v6  ;;  %v1854_v61 = vrot.slane %v1846_v47, %v4450_v39 }
  0x24   : > { %230 = vrot.lane.b32.xlu1 %v4299_v8, %s4210_s18  ;;  %228 = vrot.lane.b32.xlu0 %v4302_v9, %s4210_s18  ;;  %v662_v48 = vrot.slane %v654_v42, %v4450_v39  ;;  %v678_v59 = vrot.slane %v670_v44, %v4450_v39  ;;  %v1886_v63 = vrot.slane %v1878_v54, %v4450_v39  ;;  %v328_v27 = vrot.slane %v4279_v4, 1 }
  0x25   : > { %v686_v50 = vcombine.low %v630_v40, %v646_v41  ;;  %v1870_v62 = vrot.slane %v1862_v51, %v4450_v39  ;;  %v1894_v10 = vcombine.low %v4313_v12, %v4363_v32  ;;  %v687_v14 = vcombine.high %v630_v40, %v646_v41 }
  0x26   : > { %v718_v24 = vcombine.low %v662_v48, %v678_v59  ;;  %v719_v26 = vcombine.high %v662_v48, %v678_v59  ;;  %v623_v28 = vcombine.high %v4262_v1, %v4282_v5  ;;  %v639_v31 = vcombine.high %v4259_v0, %v4292_v7 }
  0x27   : > { %v4479_v60 = vrot.slane %v686_v50, %v4460_v43  ;;  %v1902_v42 = vrot.slane %v1894_v10, %v4450_v39  ;;  %v1910_v44 = vcombine.low %v1854_v61, %v1870_v62  ;;  %v4492_v47 = vrot.slane %v687_v14, %v4460_v43 }
  0x28   : > { %234 = vrot.lane.b32.xlu1 %v4313_v12, %s4210_s18  ;;  %232 = vrot.lane.b32.xlu0 %v4316_v13, %s4210_s18  ;;  %v1911_v50 = vcombine.high %v1854_v61, %v1870_v62  ;;  %v318_v40 = vrot.slane %v4272_v3, 1  ;;  %v4503_v41 = vrot.slane %v719_v26, %v4460_v43  ;;  %v637_v48 = vrot.slane %v623_v28, %v4450_v39 }
  0x29   : > { %6967 = vst [vmem:[#allocation18_spill] sm:$0xff] %v4479_v60  ;;  %6968 = vst [vmem:[#allocation19_spill] sm:$0xff] %v4492_v47  ;;  %v4507_v51 = vrot.slane %v1910_v44, %v4460_v43  ;;  %v1942_v54 = vcombine.low %v1886_v63, %v1902_v42  ;;  %v1943_v61 = vcombine.high %v1886_v63, %v1902_v42 }
  0x2a   : > { %6970 = vst [vmem:[#allocation21_spill] sm:$0xff] %v4503_v41  ;;  %v4510_v59 = vrot.slane %v1911_v50, %v4460_v43  ;;  %v655_v63 = vcombine.high %v4302_v9, %v4331_v18  ;;  %v671_v42 = vcombine.high %v4316_v13, %v4366_v33  ;;  %v1847_v50 = vcombine.high %v4272_v3, %v4279_v4 }
  0x2b   : > { %6971 = vst [vmem:[#allocation22_spill] sm:$0xff] %v4507_v51  ;;  %v4520_v26 = vrot.slane %v1942_v54, %v4460_v43  ;;  %v4523_v28 = vrot.slane %v1943_v61, %v4460_v43  ;;  %v1863_v54 = vcombine.high %v4269_v2, %v4289_v6  ;;  %v4550_v47 = vsel %vm316_vm1, %v317_v55, %v318_v40 }
  0x2c   : > { %238 = vrot.lane.b32.xlu1 %v4327_v16, %s4210_s18  ;;  %236 = vrot.lane.b32.xlu0 %v4331_v18, %s4210_s18  ;;  %6972 = vst [vmem:[#allocation23_spill] sm:$0xff] %v4510_v59  ;;  %v669_v62 = vrot.slane %v655_v63, %v4450_v39  ;;  %v685_v57 = vrot.slane %v671_v42, %v4450_v39 }
  0x2d   : > { %6973 = vst [vmem:[#allocation24_spill] sm:$0xff] %v4520_v26  ;;  %6974 = vst [vmem:[#allocation25_spill] sm:$0xff] %v4523_v28  ;;  %v1877_v41 = vrot.slane %v1863_v54, %v4450_v39  ;;  %v1879_v61 = vcombine.high %v4299_v8, %v4327_v16  ;;  %v1895_v14 = vcombine.high %v4313_v12, %v4363_v32  ;;  %v6976_v28 = vrot.slane %v4269_v2, 1 }
  0x2e   : > { %v734_v63 = vcombine.low %v669_v62, %v685_v57 }
  0x2f   : > { %v1893_v54 = vrot.slane %v1879_v61, %v4450_v39  ;;  %v1909_v10 = vrot.slane %v1895_v14, %v4450_v39  ;;  %v330_v14 = vrot.slane %v4340_v21, 1 }
  0x30   : > { %242 = vrot.lane.b32.xlu1 %v4363_v32, %s4210_s18  ;;  %240 = vrot.lane.b32.xlu0 %v4366_v33, %s4210_s18 }
  0x31   : > { %v1959_v61 = vcombine.high %v1893_v54, %v1909_v10 }
  0x34   : > { %262 = vrot.lane.b32.xlu1 %v4272_v3, %s4211_s19  ;;  %260 = vrot.lane.b32.xlu0 %v4262_v1, %s4211_s19  ;;  %v4500_v1 = vrot.slane %v718_v24, %v4460_v43  ;;  %v653_v24 = vrot.slane %v639_v31, %v4450_v39  ;;  %v320_v31 = vrot.slane %v4334_v19, 1  ;;  %v322_v19 = vrot.slane %v4259_v0, 1 }
  0x35   : > { %v1861_v3 = vrot.slane %v1847_v50, %v4450_v39  ;;  %v325_v50 = vrot.slane %v4310_v11, 1  ;;  %v1958_v11 = vcombine.low %v1893_v54, %v1909_v10 }
  0x36   : > { %6969 = vst [vmem:[#allocation20_spill] sm:$0xff] %v4500_v1  ;;  %v702_v44 = vcombine.low %v637_v48, %v653_v24  ;;  %v4564_v55 = vsel %vm316_vm1, %v318_v40, %v320_v31  ;;  %v4572_v59 = vsel %vm316_vm1, %v322_v19, %v6976_v28  ;;  %v327_v40 = vrot.slane %v4282_v5, 1 }
  0x37   : > { %v1926_v42 = vcombine.low %v1861_v3, %v1877_v41  ;;  %v1927_v23 = vcombine.high %v1861_v3, %v1877_v41  ;;  %v4597_v10 = vsel %vm316_vm1, %v6976_v28, %v325_v50  ;;  %v4600_v19 = vrot.slane %v1958_v11, %v4460_v43 }
  0x38   : > { %266 = vrot.lane.b32.xlu1 %v4269_v2, %s4211_s19  ;;  %264 = vrot.lane.b32.xlu0 %v4259_v0, %s4211_s19  ;;  %v4561_v0 = vrot.slane %v702_v44, %v4460_v43  ;;  %v4576_v44 = vrot.slane %v734_v63, %v4460_v43  ;;  %v4603_v3 = vrot.slane %v1959_v61, %v4460_v43  ;;  %v335_v11 = vrot.slane %v4337_v20, 1 }
  0x39   : > { %v4580_v31 = vrot.slane %v1926_v42, %v4460_v43  ;;  %6980 = vst [vmem:[#allocation30_spill] sm:$0xff] %v4600_v19  ;;  %v703_v21 = vcombine.high %v637_v48, %v653_v24  ;;  %v735_v63 = vcombine.high %v669_v62, %v685_v57  ;;  %v333_v57 = vrot.slane %v4289_v6, 1 }
  0x3a   : > { %6975 = vst [vmem:[#allocation26_spill] sm:$0xff] %v4561_v0  ;;  %6977 = vst [vmem:[#allocation27_spill] sm:$0xff] %v4576_v44  ;;  %v4625_v24 = vsel %vm316_vm1, %v328_v27, %v330_v14  ;;  %v4628_v54 = vsel %vm316_vm1, %v327_v40, %v328_v27  ;;  %v332_v61 = vrot.slane %v4292_v7, 1  ;;  %v340_v40 = vrot.slane %v4375_v36, 1 }
  0x3b   : > { %6978 = vst [vmem:[#allocation28_spill] sm:$0xff] %v4580_v31  ;;  %6981 = vst [vmem:[#allocation31_spill] sm:$0xff] %v4603_v3  ;;  %v4612_v50 = vrot.slane %v703_v21, %v4460_v43  ;;  %v4620_v48 = vrot.slane %v735_v63, %v4460_v43  ;;  %v4646_v20 = vsel %vm316_vm1, %v333_v57, %v335_v11  ;;  %v337_v63 = vrot.slane %v4302_v9, 1 }
  0x3c   : > { %270 = vrot.lane.b32.xlu1 %v4279_v4, %s4211_s19  ;;  %268 = vrot.lane.b32.xlu0 %v4282_v5, %s4211_s19  ;;  %v4592_v5 = vrot.slane %v1927_v23, %v4460_v43  ;;  %v4649_v27 = vsel %vm316_vm1, %v332_v61, %v333_v57  ;;  %v350_v36 = vrot.slane %v4385_v38, 1  ;;  %v353_v61 = vrot.slane %v4363_v32, 1 }
  0x3d   : > { %6982 = vst [vmem:[#allocation32_spill] sm:$0xff] %v4612_v50  ;;  %6983 = vst [vmem:[#allocation33_spill] sm:$0xff] %v4620_v48  ;;  %v352_v38 = vrot.slane %v4366_v33, 1 }
  0x3e   : > { %6979 = vst [vmem:[#allocation29_spill] sm:$0xff] %v4592_v5 }
  0x40   : > { %274 = vrot.lane.b32.xlu1 %v4289_v6, %s4211_s19  ;;  %272 = vrot.lane.b32.xlu0 %v4292_v7, %s4211_s19  ;;  %v338_v7 = vrot.slane %v4299_v8, 1  ;;  %v348_v6 = vrot.slane %v4327_v16, 1 }
  0x42   : > { %v4660_v11 = vsel %vm316_vm1, %v338_v7, %v340_v40  ;;  %v4663_v57 = vsel %vm316_vm1, %v337_v63, %v338_v7  ;;  %v355_v7 = vrot.slane %v4378_v37, 1  ;;  %v347_v40 = vrot.slane %v4331_v18, 1 }
  0x44   : > { %278 = vrot.lane.b32.xlu1 %v4299_v8, %s4211_s19  ;;  %276 = vrot.lane.b32.xlu0 %v4302_v9, %s4211_s19  ;;  %v343_v8 = vrot.slane %v4313_v12, 1  ;;  %v345_v9 = vrot.slane %v4346_v25, 1  ;;  %v4684_v25 = vsel %vm316_vm1, %v353_v61, %v355_v7  ;;  %v4716_v63 = vsel %vm316_vm1, %v347_v40, %v348_v6 }
  0x48   : > { %282 = vrot.lane.b32.xlu1 %v4313_v12, %s4211_s19  ;;  %280 = vrot.lane.b32.xlu0 %v4316_v13, %s4211_s19  ;;  %v4675_v12 = vsel %vm316_vm1, %v343_v8, %v345_v9 }
  0x4c   : > { %286 = vrot.lane.b32.xlu1 %v4327_v16, %s4211_s19  ;;  %284 = vrot.lane.b32.xlu0 %v4331_v18, %s4211_s19  ;;  %v4672_v16 = vsel %vm316_vm1, %v348_v6, %v350_v36 }
  0x50   : > { %290 = vrot.lane.b32.xlu1 %v4363_v32, %s4211_s19  ;;  %288 = vrot.lane.b32.xlu0 %v4366_v33, %s4211_s19  ;;  %v342_v32 = vrot.slane %v4316_v13, 1  ;;  %v4713_v13 = vsel %vm316_vm1, %v352_v38, %v353_v61 }
  0x52   : > { %v4704_v37 = vsel %vm316_vm1, %v342_v32, %v343_v8 }
  0x54   : > { %375 = vrot.lane.b32.xlu1 %v4564_v55, %s4210_s18  ;;  %373 = vrot.lane.b32.xlu0 %v4550_v47, %s4210_s18 }
  0x58   : > { %379 = vrot.lane.b32.xlu1 %v4597_v10, %s4210_s18  ;;  %377 = vrot.lane.b32.xlu0 %v4572_v59, %s4210_s18 }
  0x5c   : > { %383 = vrot.lane.b32.xlu1 %v4625_v24, %s4210_s18  ;;  %381 = vrot.lane.b32.xlu0 %v4628_v54, %s4210_s18 }
  0x60   : > { %387 = vrot.lane.b32.xlu1 %v4646_v20, %s4210_s18  ;;  %385 = vrot.lane.b32.xlu0 %v4649_v27, %s4210_s18 }
  0x64   : > { %391 = vrot.lane.b32.xlu1 %v4660_v11, %s4210_s18  ;;  %389 = vrot.lane.b32.xlu0 %v4663_v57, %s4210_s18 }
  0x68   : > { %399 = vrot.lane.b32.xlu1 %v4672_v16, %s4210_s18  ;;  %395 = vrot.lane.b32.xlu0 %v4675_v12, %s4210_s18 }
  0x6c   : > { %423 = vrot.lane.b32.xlu1 %v4564_v55, %s4211_s19  ;;  %403 = vrot.lane.b32.xlu0 %v4684_v25, %s4210_s18 }
  0x70   : > { %431 = vrot.lane.b32.xlu1 %v4625_v24, %s4211_s19  ;;  %427 = vrot.lane.b32.xlu0 %v4597_v10, %s4211_s19 }
  0x74   : > { %439 = vrot.lane.b32.xlu1 %v4660_v11, %s4211_s19  ;;  %435 = vrot.lane.b32.xlu0 %v4646_v20, %s4211_s19 }
  0x78   : > { %447 = vrot.lane.b32.xlu1 %v4672_v16, %s4211_s19  ;;  %443 = vrot.lane.b32.xlu0 %v4675_v12, %s4211_s19 }
  0x7c   : > { %393 = vrot.lane.b32.xlu1 %v4704_v37, %s4210_s18  ;;  %451 = vrot.lane.b32.xlu0 %v4684_v25, %s4211_s19 }
  0x80   : > { %401 = vrot.lane.b32.xlu1 %v4713_v13, %s4210_s18  ;;  %397 = vrot.lane.b32.xlu0 %v4716_v63, %s4210_s18 }
  0x84   : > { %425 = vrot.lane.b32.xlu1 %v4572_v59, %s4211_s19  ;;  %421 = vrot.lane.b32.xlu0 %v4550_v47, %s4211_s19 }
  0x86   : > { %v4726_v18 = vpop.permute.xlu1 %216  ;;  %v4728_v33 = vpop.permute.xlu0 %212 }
  0x88   : > { %433 = vrot.lane.b32.xlu1 %v4649_v27, %s4211_s19  ;;  %429 = vrot.lane.b32.xlu0 %v4628_v54, %s4211_s19 }
  0x8a   : > { %v4734_v6 = vpop.permute.xlu1 %218  ;;  %v4736_v8 = vpop.permute.xlu0 %214 }
  0x8c   : > { %441 = vrot.lane.b32.xlu1 %v4704_v37, %s4211_s19  ;;  %437 = vrot.lane.b32.xlu0 %v4663_v57, %s4211_s19 }
  0x8e   : > { %v4742_v36 = vpop.permute.xlu1 %222  ;;  %v4744_v9 = vpop.permute.xlu0 %220 }
  0x8f   : > { %v1982_v41 = vcombine.low %v4736_v8, %v4742_v36  ;;  %v758_v23 = vcombine.low %v4728_v33, %v4744_v9 }
  0x90   : > { %449 = vrot.lane.b32.xlu1 %v4713_v13, %s4211_s19  ;;  %445 = vrot.lane.b32.xlu0 %v4716_v63, %s4211_s19 }
  0x91   : > { %v4805_v19 = vrot.slane %v1982_v41, %v4450_v39  ;;  %v4812_v44 = vrot.slane %v758_v23, %v4450_v39 }
  0x92   : > { %v4750_v61 = vpop.permute.xlu1 %226  ;;  %v4752_v7 = vpop.permute.xlu0 %224 }
  0x93   : > { %v1998_v14 = vcombine.low %v4734_v6, %v4750_v61  ;;  %v774_v62 = vcombine.low %v4726_v18, %v4752_v7  ;;  %6986 = vst [vmem:[#allocation36_spill] sm:$0xff] %v4805_v19  ;;  %6987 = vst [vmem:[#allocation37_spill] sm:$0xff] %v4812_v44 }
  0x94   : > { %532 = vrot.lane.b32.xlu1 %v4320_v15, %s4210_s18  ;;  %528 = vrot.lane.b32.xlu0 %v4356_v29, %s4210_s18 }
  0x95   : > { %v4789_v42 = vrot.slane %v1998_v14, %v4450_v39  ;;  %v4796_v48 = vrot.slane %v774_v62, %v4450_v39 }
  0x96   : > { %v4758_v32 = vpop.permute.xlu1 %230  ;;  %v4760_v38 = vpop.permute.xlu0 %228 }
  0x97   : > { %6984 = vst [vmem:[#allocation34_spill] sm:$0xff] %v4789_v42  ;;  %6985 = vst [vmem:[#allocation35_spill] sm:$0xff] %v4796_v48  ;;  %v2046_v62 = vcombine.low %v4805_v19, %v4789_v42  ;;  %v822_v23 = vcombine.low %v4812_v44, %v4796_v48 }
  0x98   : > { %540 = vrot.lane.b32.xlu1 %v4359_v30, %s4210_s18  ;;  %536 = vrot.lane.b32.xlu0 %v4369_v34, %s4210_s18 }
  0x99   : > { %v4857_v44 = vrot.slane %v822_v23, %v4460_v43  ;;  %v1030_v23 = vcombine.low %v4550_v47, %v4628_v54 }
  0x9a   : > { %v4766_v40 = vpop.permute.xlu1 %234  ;;  %v4768_v28 = vpop.permute.xlu0 %232 }
  0x9b   : > { %6997 = vst [vmem:[#allocation47_spill] sm:$0xff] %v4857_v44  ;;  %v2254_v44 = vcombine.low %v4564_v55, %v4625_v24 }
  0x9c   : > { %548 = vrot.lane.b32.xlu1 %v4372_v35, %s4210_s18  ;;  %544 = vrot.lane.b32.xlu0 %v4394_v45, %s4210_s18 }
  0x9d   : > { %v2262_v19 = vrot.slane %v2254_v44, %v4450_v39 }
  0x9e   : > { %v4778_v21 = vpop.permute.xlu1 %238  ;;  %v4780_v2 = vpop.permute.xlu0 %236 }
  0x9f   : > { %v2014_v4 = vcombine.low %v4758_v32, %v4778_v21  ;;  %v790_v50 = vcombine.low %v4760_v38, %v4780_v2 }
  0xa0   : > { %556 = vrot.lane.b32.xlu1 %v4397_v46, %s4210_s18  ;;  %552 = vrot.lane.b32.xlu0 %v4406_v49, %s4210_s18 }
  0xa1   : > { %v4819_v0 = vrot.slane %v2014_v4, %v4450_v39  ;;  %v4832_v51 = vrot.slane %v790_v50, %v4450_v39 }
  0xa2   : > { %v4800_v3 = vpop.permute.xlu1 %242  ;;  %v4802_v5 = vpop.permute.xlu0 %240 }
  0xa3   : > { %v2030_v14 = vcombine.low %v4766_v40, %v4800_v3  ;;  %v806_v31 = vcombine.low %v4768_v28, %v4802_v5  ;;  %6988 = vst [vmem:[#allocation38_spill] sm:$0xff] %v4819_v0  ;;  %6990 = vst [vmem:[#allocation40_spill] sm:$0xff] %v4832_v51 }
  0xa4   : > { %530 = vrot.lane.b32.xlu1 %v4410_v52, %s4210_s18  ;;  %526 = vrot.lane.b32.xlu0 %v4413_v53, %s4210_s18 }
  0xa5   : > { %v4822_v41 = vrot.slane %v2030_v14, %v4450_v39  ;;  %v4825_v26 = vrot.slane %v806_v31, %v4450_v39  ;;  %v4847_v14 = vrot.slane %v2046_v62, %v4460_v43  ;;  %v1031_v62 = vcombine.high %v4550_v47, %v4628_v54 }
  0xa6   : > { %v4834_v1 = vpop.permute.xlu1 %262  ;;  %v4836_v60 = vpop.permute.xlu0 %260  ;;  %v2270_v47 = vcombine.low %v4597_v10, %v4646_v20  ;;  %v2286_v54 = vcombine.low %v4660_v11, %v4672_v16 }
  0xa7   : > { %6989 = vst [vmem:[#allocation39_spill] sm:$0xff] %v4822_v41  ;;  %6991 = vst [vmem:[#allocation41_spill] sm:$0xff] %v4834_v1  ;;  %v2078_v4 = vcombine.low %v4819_v0, %v4822_v41  ;;  %v854_v31 = vcombine.low %v4832_v51, %v4825_v26  ;;  %v7001_v0 = vld [vmem:[#allocation16_spill] sm:$0xff] }
  0xa8   : > { %6992 = vst [vmem:[#allocation42_spill] sm:$0xff] %v4836_v60  ;;  %538 = vrot.lane.b32.xlu1 %v4416_v56, %s4210_s18  ;;  %534 = vrot.lane.b32.xlu0 %v4424_v58, %s4210_s18  ;;  %6993 = vst [vmem:[#allocation43_spill] sm:$0xff] %v4847_v14  ;;  %v7002_v14 = vld [vmem:[#allocation17_spill] sm:$0xff]  ;;  %v2294_v44 = vrot.slane %v2286_v54, %v4450_v39  ;;  %v2678_v54 = vcombine.low %v4320_v15, %v4359_v30 }
  0xa9   : > { %v4850_v50 = vrot.slane %v2078_v4, %v4460_v43  ;;  %v4860_v48 = vrot.slane %v854_v31, %v4460_v43  ;;  %v1046_v31 = vcombine.low %v4572_v59, %v4649_v27 }
  0xaa   : > { %v4852_v1 = vpop.permute.xlu1 %266  ;;  %v4854_v60 = vpop.permute.xlu0 %264 }
  0xab   : > { %6994 = vst [vmem:[#allocation44_spill] sm:$0xff] %v4850_v50  ;;  %6995 = vst [vmem:[#allocation45_spill] sm:$0xff] %v4852_v1  ;;  %v1047_v50 = vcombine.high %v4572_v59, %v4649_v27  ;;  %v4895_v1 = vrot.slane %v1030_v23, %v4450_v39  ;;  %v4898_v41 = vrot.slane %v1046_v31, %v4450_v39 }
  0xac   : > { %6996 = vst [vmem:[#allocation46_spill] sm:$0xff] %v4854_v60  ;;  %6998 = vst [vmem:[#allocation48_spill] sm:$0xff] %v4860_v48  ;;  %546 = vrot.lane.b32.xlu1 %v4430_v17, %s4210_s18  ;;  %542 = vrot.lane.b32.xlu0 %v4433_v22, %s4210_s18  ;;  %v2255_v48 = vcombine.high %v4564_v55, %v4625_v24  ;;  %v2271_v59 = vcombine.high %v4597_v10, %v4646_v20 }
  0xad   : > { %v2302_v55 = vcombine.low %v4675_v12, %v4684_v25  ;;  %v1078_v24 = vcombine.low %v4704_v37, %v4713_v13  ;;  %v1062_v27 = vcombine.low %v4663_v57, %v4716_v63  ;;  %v4917_v10 = vrot.slane %v1031_v62, %v4450_v39 }
  0xae   : > { %v4870_v4 = vpop.permute.xlu1 %270  ;;  %v4872_v60 = vpop.permute.xlu0 %268  ;;  %v4920_v20 = vrot.slane %v1047_v50, %v4450_v39  ;;  %v2287_v23 = vcombine.high %v4660_v11, %v4672_v16  ;;  %v2303_v31 = vcombine.high %v4675_v12, %v4684_v25  ;;  %v4932_v42 = vrot.slane %v2255_v48, %v4450_v39 }
  0xaf   : > { %6999 = vst [vmem:[#allocation49_spill] sm:$0xff] %v4870_v4  ;;  %7000 = vst [vmem:[#allocation50_spill] sm:$0xff] %v4872_v60  ;;  %v1094_v62 = vcombine.low %v4895_v1, %v4898_v41  ;;  %v2278_v50 = vrot.slane %v2270_v47, %v4450_v39  ;;  %v4938_v51 = vrot.slane %v2271_v59, %v4450_v39 }
  0xb0   : > { %554 = vrot.lane.b32.xlu1 %v7001_v0, %s4210_s18  ;;  %550 = vrot.lane.b32.xlu0 %v7002_v14, %s4210_s18  ;;  %7005 = vst [vmem:[#allocation53_spill] sm:$0xff] %v4917_v10  ;;  %7006 = vst [vmem:[#allocation54_spill] sm:$0xff] %v4920_v20  ;;  %v1079_v11 = vcombine.high %v4704_v37, %v4713_v13  ;;  %v1063_v16 = vcombine.high %v4663_v57, %v4716_v63 }
  0xb1   : > { %v2310_v48 = vrot.slane %v2302_v55, %v4450_v39  ;;  %v1086_v12 = vrot.slane %v1078_v24, %v4450_v39  ;;  %v1070_v25 = vrot.slane %v1062_v27, %v4450_v39  ;;  %v1095_v37 = vcombine.high %v4895_v1, %v4898_v41 }
  0xb2   : > { %v4886_v4 = vpop.permute.xlu1 %274  ;;  %v4888_v60 = vpop.permute.xlu0 %272  ;;  %v1110_v57 = vcombine.low %v4917_v10, %v4920_v20  ;;  %v4957_v13 = vrot.slane %v2287_v23, %v4450_v39  ;;  %v4960_v63 = vrot.slane %v2303_v31, %v4450_v39  ;;  %v2662_v55 = vcombine.low %v4356_v29, %v4369_v34 }
  0xb3   : > { %7003 = vst [vmem:[#allocation51_spill] sm:$0xff] %v4886_v4  ;;  %7004 = vst [vmem:[#allocation52_spill] sm:$0xff] %v4888_v60  ;;  %v2710_v1 = vcombine.low %v4372_v35, %v4397_v46  ;;  %v2694_v41 = vcombine.low %v4394_v45, %v4406_v49  ;;  %v2318_v24 = vcombine.low %v2262_v19, %v2278_v50 }
  0xb4   : > { %576 = vrot.lane.b32.xlu1 %v4356_v29, %s4211_s19  ;;  %574 = vrot.lane.b32.xlu0 %v4413_v53, %s4211_s19  ;;  %v4977_v23 = vrot.slane %v1079_v11, %v4450_v39  ;;  %v4980_v31 = vrot.slane %v1063_v16, %v4450_v39  ;;  %v2319_v29 = vcombine.high %v2262_v19, %v2278_v50 }
  0xb5   : > { %v2350_v46 = vcombine.low %v2294_v44, %v2310_v48  ;;  %v2351_v11 = vcombine.high %v2294_v44, %v2310_v48  ;;  %v2366_v16 = vcombine.low %v4957_v13, %v4960_v63  ;;  %v1127_v20 = vcombine.high %v1070_v25, %v1086_v12 }
  0xb6   : > { %v4926_v60 = vpop.permute.xlu1 %278  ;;  %v4928_v4 = vpop.permute.xlu0 %276  ;;  %v4997_v19 = vrot.slane %v2678_v54, %v4450_v39  ;;  %v5000_v50 = vrot.slane %v2662_v55, %v4450_v39  ;;  %v5006_v27 = vrot.slane %v2694_v41, %v4450_v39  ;;  %v1142_v44 = vcombine.low %v4980_v31, %v4977_v23 }
  0xb7   : > { %7007 = vst [vmem:[#allocation55_spill] sm:$0xff] %v4926_v60  ;;  %7008 = vst [vmem:[#allocation56_spill] sm:$0xff] %v4928_v4  ;;  %v1126_v4 = vcombine.low %v1070_v25, %v1086_v12  ;;  %v5003_v60 = vrot.slane %v2710_v1, %v4450_v39  ;;  %v1454_v48 = vcombine.low %v4410_v52, %v4416_v56 }
  0xb8   : > { %580 = vrot.lane.b32.xlu1 %v4320_v15, %s4211_s19  ;;  %578 = vrot.lane.b32.xlu0 %v4410_v52, %s4211_s19  ;;  %v2334_v15 = vcombine.low %v4932_v42, %v4938_v51  ;;  %7012 = vst [vmem:[#allocation60_spill] sm:$0xff] %v4997_v19  ;;  %7013 = vst [vmem:[#allocation61_spill] sm:$0xff] %v5000_v50  ;;  %v1438_v12 = vcombine.low %v4413_v53, %v4424_v58 }
  0xb9   : > { %7014 = vst [vmem:[#allocation62_spill] sm:$0xff] %v5003_v60  ;;  %7015 = vst [vmem:[#allocation63_spill] sm:$0xff] %v5006_v27  ;;  %v1486_v25 = vcombine.low %v4430_v17, %v7001_v0  ;;  %v5021_v54 = vrot.slane %v2318_v24, %v4460_v43  ;;  %v5024_v55 = vrot.slane %v2350_v46, %v4460_v43  ;;  %v7046_v60 = vld [vmem:[#allocation48_spill] sm:$0xff]  ;;  %v7047_v27 = vld [vmem:[#allocation47_spill] sm:$0xff] }
  0xba   : > { %v4962_v47 = vpop.permute.xlu1 %282  ;;  %v4964_v59 = vpop.permute.xlu0 %280  ;;  %v5027_v1 = vrot.slane %v1094_v62, %v4460_v43  ;;  %v5030_v41 = vrot.slane %v1126_v4, %v4460_v43  ;;  %v5041_v24 = vrot.slane %v2319_v29, %v4460_v43  ;;  %v5044_v46 = vrot.slane %v2351_v11, %v4460_v43 }
  0xbb   : > { %7009 = vst [vmem:[#allocation57_spill] sm:$0xff] %v4964_v59  ;;  %7016 = vst [vmem:[#allocation64_spill] sm:$0xff] %v5021_v54  ;;  %v5051_v53 = vrot.slane %v1095_v37, %v4460_v43  ;;  %v5060_v29 = vrot.slane %v1438_v12, %v4450_v39  ;;  %v5065_v11 = vrot.slane %v1110_v57, %v4460_v43  ;;  %v7037_v12 = vld [vmem:[#allocation35_spill] sm:$0xff] }
  0xbc   : > { %584 = vrot.lane.b32.xlu1 %v4369_v34, %s4211_s19  ;;  %582 = vrot.lane.b32.xlu0 %v4424_v58, %s4211_s19  ;;  %7017 = vst [vmem:[#allocation65_spill] sm:$0xff] %v5024_v55  ;;  %7018 = vst [vmem:[#allocation66_spill] sm:$0xff] %v5027_v1  ;;  %v5054_v58 = vrot.slane %v1127_v20, %v4460_v43  ;;  %v5068_v62 = vrot.slane %v1142_v44, %v4460_v43  ;;  %v7058_v1 = vld [vmem:[#allocation20_spill] sm:$0xff] }
  0xbd   : > { %7019 = vst [vmem:[#allocation67_spill] sm:$0xff] %v5030_v41  ;;  %7021 = vst [vmem:[#allocation69_spill] sm:$0xff] %v5041_v24  ;;  %v5071_v37 = vrot.slane %v1486_v25, %v4450_v39  ;;  %v1983_v57 = vcombine.high %v4736_v8, %v4742_v36  ;;  %v759_v44 = vcombine.high %v4728_v33, %v4744_v9  ;;  %v7036_v8 = vld [vmem:[#allocation38_spill] sm:$0xff] }
  0xbe   : > { %v4992_v10 = vpop.permute.xlu1 %286  ;;  %v4994_v34 = vpop.permute.xlu0 %284  ;;  %7022 = vst [vmem:[#allocation70_spill] sm:$0xff] %v5044_v46  ;;  %7023 = vst [vmem:[#allocation71_spill] sm:$0xff] %v5051_v53  ;;  %v1999_v25 = vcombine.high %v4734_v6, %v4750_v61  ;;  %v2015_v6 = vcombine.high %v4758_v32, %v4778_v21  ;;  %v791_v36 = vcombine.high %v4760_v38, %v4780_v2  ;;  %v7053_v46 = vld [vmem:[#allocation42_spill] sm:$0xff] }
  0xbf   : > { %7010 = vst [vmem:[#allocation58_spill] sm:$0xff] %v4992_v10  ;;  %7011 = vst [vmem:[#allocation59_spill] sm:$0xff] %v4994_v34  ;;  %v5110_v9 = vrot.slane %v2334_v15, %v4460_v43  ;;  %v2031_v61 = vcombine.high %v4766_v40, %v4800_v3  ;;  %v5119_v2 = vrot.slane %v2366_v16, %v4460_v43  ;;  %v7033_v16 = vld [vmem:[#allocation34_spill] sm:$0xff] }
  0xc0   : > { %588 = vrot.lane.b32.xlu1 %v4359_v30, %s4211_s19  ;;  %586 = vrot.lane.b32.xlu0 %v4416_v56, %s4211_s19  ;;  %7024 = vst [vmem:[#allocation72_spill] sm:$0xff] %v5054_v58  ;;  %v5057_v30 = vrot.slane %v1454_v48, %v4450_v39  ;;  %7026 = vst [vmem:[#allocation74_spill] sm:$0xff] %v5060_v29  ;;  %v775_v48 = vcombine.high %v4726_v18, %v4752_v7  ;;  %v7034_v18 = vld [vmem:[#allocation36_spill] sm:$0xff]  ;;  %v7057_v41 = vld [vmem:[#allocation18_spill] sm:$0xff] }
  0xc1   : > { %7027 = vst [vmem:[#allocation75_spill] sm:$0xff] %v5065_v11  ;;  %7028 = vst [vmem:[#allocation76_spill] sm:$0xff] %v5068_v62  ;;  %v807_v7 = vcombine.high %v4768_v28, %v4802_v5  ;;  %v5124_v32 = vrot.slane %v1983_v57, %v4450_v39  ;;  %v5127_v15 = vrot.slane %v759_v44, %v4450_v39  ;;  %v7031_v5 = vld [vmem:[#allocation40_spill] sm:$0xff]  ;;  %v7035_v57 = vld [vmem:[#allocation39_spill] sm:$0xff] }
  0xc2   : > { %v5036_v52 = vpop.permute.xlu1 %290  ;;  %v5038_v56 = vpop.permute.xlu0 %288  ;;  %7025 = vst [vmem:[#allocation73_spill] sm:$0xff] %v5057_v30  ;;  %7029 = vst [vmem:[#allocation77_spill] sm:$0xff] %v5071_v37  ;;  %v5130_v3 = vrot.slane %v1999_v25, %v4450_v39  ;;  %v855_v28 = vcombine.high %v7031_v5, %v4825_v26  ;;  %v2047_v33 = vcombine.high %v7034_v18, %v7033_v16  ;;  %v7039_v16 = vld [vmem:[#allocation51_spill] sm:$0xff]  ;;  %v7050_v11 = vld [vmem:[#allocation44_spill] sm:$0xff] }
  0xc3   : > { %7020 = vst [vmem:[#allocation68_spill] sm:$0xff] %v5038_v56  ;;  %v5141_v21 = vrot.slane %v775_v48, %v4450_v39  ;;  %v2079_v44 = vcombine.high %v7036_v8, %v7035_v57  ;;  %v2166_v25 = vcombine.low %v4962_v47, %v5036_v52  ;;  %v5150_v26 = vrot.slane %v2015_v6, %v4450_v39  ;;  %v7041_v6 = vld [vmem:[#allocation55_spill] sm:$0xff] }
  0xc4   : > { %592 = vrot.lane.b32.xlu1 %v4394_v45, %s4211_s19  ;;  %590 = vrot.lane.b32.xlu0 %v4433_v22, %s4211_s19  ;;  %v7038_v45 = vld [vmem:[#allocation37_spill] sm:$0xff]  ;;  %v5153_v5 = vrot.slane %v791_v36, %v4450_v39  ;;  %v942_v18 = vcombine.low %v4964_v59, %v5038_v56  ;;  %v5160_v48 = vrot.slane %v2031_v61, %v4450_v39  ;;  %v7044_v61 = vld [vmem:[#allocation56_spill] sm:$0xff] }
  0xc5   : > { %v5163_v8 = vrot.slane %v807_v7, %v4450_v39  ;;  %v2150_v57 = vcombine.low %v7041_v6, %v4992_v10  ;;  %v5172_v36 = vrot.slane %v855_v28, %v4460_v43  ;;  %v926_v29 = vcombine.low %v7044_v61, %v4994_v34  ;;  %v7049_v22 = vld [vmem:[#allocation41_spill] sm:$0xff]  ;;  %v7070_v6 = vld [vmem:[#allocation19_spill] sm:$0xff] }
  0xc6   : > { %v5087_v4 = vpop.permute.xlu1 %375  ;;  %v5089_v20 = vpop.permute.xlu0 %373  ;;  %v887_v19 = vcombine.high %v7047_v27, %v7046_v60  ;;  %v5185_v50 = vrot.slane %v2079_v44, %v4460_v43  ;;  %v5190_v62 = vrot.slane %v2166_v25, %v4450_v39  ;;  %v2061_v58 = vrot.slane %v2047_v33, %v4460_v43  ;;  %v7054_v44 = vld [vmem:[#allocation8_spill] sm:$0xff] }
  0xc7   : > { %7030 = vst [vmem:[#allocation78_spill] sm:$0xff] %v5089_v20  ;;  %v7051_v20 = vld [vmem:[#allocation43_spill] sm:$0xff]  ;;  %v5199_v60 = vrot.slane %v942_v18, %v4450_v39  ;;  %v2094_v25 = vcombine.low %v5150_v26, %v5160_v48  ;;  %v870_v27 = vcombine.low %v5153_v5, %v5163_v8  ;;  %v5219_v18 = vrot.slane %v926_v29, %v4450_v39 }
  0xc8   : > { %596 = vrot.lane.b32.xlu1 %v4372_v35, %s4211_s19  ;;  %594 = vrot.lane.b32.xlu0 %v4430_v17, %s4211_s19  ;;  %v823_v17 = vcombine.high %v7038_v45, %v7037_v12  ;;  %v7040_v45 = vld [vmem:[#allocation45_spill] sm:$0xff]  ;;  %v7042_v35 = vld [vmem:[#allocation52_spill] sm:$0xff]  ;;  %v2112_v59 = vcombine.low %v2061_v58, %v5185_v50 }
  0xc9   : > { %v2134_v12 = vcombine.low %v7040_v45, %v7039_v16 }
  0xca   : > { %v5134_v38 = vpop.permute.xlu1 %379  ;;  %v5136_v40 = vpop.permute.xlu0 %377  ;;  %v837_v53 = vrot.slane %v823_v17, %v4460_v43  ;;  %v5211_v17 = vrot.slane %v2150_v57, %v4450_v39 }
  0xcb   : > { %7032 = vst [vmem:[#allocation40_spill] sm:$0xff] %v5136_v40  ;;  %v2111_v40 = vcombine.high %v7051_v20, %v7050_v11  ;;  %v5208_v11 = vrot.slane %v2134_v12, %v4450_v39  ;;  %v7059_v12 = vcombine.high %v7057_v41, %v7058_v1 }
  0xcc   : > { %600 = vrot.lane.b32.xlu1 %v4406_v49, %s4211_s19  ;;  %598 = vrot.lane.b32.xlu0 %v7002_v14, %s4211_s19  ;;  %v7043_v49 = vld [vmem:[#allocation46_spill] sm:$0xff]  ;;  %v7048_v14 = vld [vmem:[#allocation49_spill] sm:$0xff]  ;;  %v888_v57 = vcombine.low %v837_v53, %v5172_v36  ;;  %v889_v10 = vcombine.high %v837_v53, %v5172_v36  ;;  %v7078_v36 = vcombine.high %v4980_v31, %v4977_v23 }
  0xcd   : > { %v910_v37 = vcombine.low %v7043_v49, %v7042_v35  ;;  %v2118_v28 = vcombine.low %v7049_v22, %v7048_v14  ;;  %v3874_v61 = vpack.i.bf16 %v887_v19, %v7059_v12  ;;  %v7061_v49 = vld [vmem:[#allocation24_spill] sm:$0xff]  ;;  %v990_v19 = vcombine.low %v5219_v18, %v5199_v60 }
  0xce   : > { %v5178_v7 = vpop.permute.xlu1 %383  ;;  %v5180_v30 = vpop.permute.xlu0 %381 }
  0xcf   : > { %7045 = vst [vmem:[#allocation34_spill] sm:$0xff] %v5180_v30  ;;  %v7052_v30 = vld [vmem:[#allocation50_spill] sm:$0xff]  ;;  %v5216_v33 = vrot.slane %v910_v37, %v4450_v39  ;;  %v5230_v34 = vrot.slane %v2118_v28, %v4450_v39  ;;  %v2214_v37 = vcombine.low %v5211_v17, %v5190_v62  ;;  %v7064_v28 = vcombine.high %v4932_v42, %v4938_v51 }
  0xd0   : > { %v894_v24 = vcombine.low %v7053_v46, %v7052_v30  ;;  %604 = vrot.lane.b32.xlu1 %v7054_v44, %s4211_s19  ;;  %602 = vrot.lane.b32.xlu0 %v7001_v0, %s4211_s19  ;;  %v7060_v0 = vld [vmem:[#allocation22_spill] sm:$0xff]  ;;  %v5296_v16 = vrot.slane %v990_v19, %v4460_v43 }
  0xd1   : > { %7055 = vst [vmem:[#allocation36_spill] sm:$0xff] %v5216_v33  ;;  %v7062_v29 = vcombine.high %v7060_v0, %v7061_v49  ;;  %v5250_v12 = vrot.slane %v7064_v28, %v4460_v43  ;;  %v7067_v0 = vld [vmem:[#allocation54_spill] sm:$0xff]  ;;  %v5270_v28 = vrot.slane %v870_v27, %v4460_v43  ;;  %v7074_v27 = vld [vmem:[#allocation23_spill] sm:$0xff] }
  0xd2   : > { %v5221_v20 = vpop.permute.xlu1 %387  ;;  %v5223_v44 = vpop.permute.xlu0 %385  ;;  %v5241_v1 = vrot.slane %v894_v24, %v4450_v39  ;;  %v7065_v24 = vcombine.high %v4957_v13, %v4960_v63  ;;  %v7071_v13 = vld [vmem:[#allocation21_spill] sm:$0xff]  ;;  %7077 = vst [vmem:[#allocation49_spill] sm:$0xff] %v5296_v16 }
  0xd3   : > { %7056 = vst [vmem:[#allocation39_spill] sm:$0xff] %v5223_v44  ;;  %v3869_v35 = vpack.i.bf16 %v2111_v40, %v7062_v29  ;;  %v838_v44 = vcombine.low %v5127_v15, %v5141_v21  ;;  %v2062_v40 = vcombine.low %v5124_v32, %v5130_v3  ;;  %v2182_v29 = vcombine.low %v5230_v34, %v5208_v11 }
  0xd4   : > { %7063 = vst [vmem:[#allocation38_spill] sm:$0xff] %v5241_v1  ;;  %3875 = vrot.lane.b32.xlu1 %v3874_v61, %s4214_s20  ;;  %v5261_v49 = vrot.slane %v7065_v24, %v4460_v43  ;;  %v7066_v61 = vld [vmem:[#allocation53_spill] sm:$0xff]  ;;  %v958_v41 = vcombine.low %v5241_v1, %v5216_v33  ;;  %v7072_v63 = vcombine.low %v7070_v6, %v7071_v13 }
  0xd5   : > { %3870 = vrot.lane.b32.xlu0 %v3869_v35, %s4214_s20  ;;  %v7068_v51 = vcombine.high %v7066_v61, %v7067_v0  ;;  %v5283_v0 = vrot.slane %v2094_v25, %v4460_v43  ;;  %v5286_v61 = vrot.slane %v2214_v37, %v4460_v43  ;;  %v2113_v33 = vcombine.high %v2061_v58, %v5185_v50 }
  0xd6   : > { %v5274_v56 = vpop.permute.xlu1 %391  ;;  %v5276_v35 = vpop.permute.xlu0 %389  ;;  %v3884_v24 = vpack.i.bf16 %v888_v57, %v7072_v63  ;;  %v5305_v25 = vrot.slane %v7078_v36, %v4460_v43  ;;  %v2063_v58 = vcombine.high %v5124_v32, %v5130_v3  ;;  %v5311_v50 = vrot.slane %v2182_v29, %v4460_v43 }
  0xd7   : > { %v5267_v42 = vrot.slane %v7068_v51, %v4460_v43  ;;  %7069 = vst [vmem:[#allocation35_spill] sm:$0xff] %v5276_v35  ;;  %7073 = vst [vmem:[#allocation37_spill] sm:$0xff] %v5286_v61  ;;  %v7075_v51 = vld [vmem:[#allocation25_spill] sm:$0xff]  ;;  %v5293_v35 = vrot.slane %v838_v44, %v4460_v43  ;;  %v839_v44 = vcombine.high %v5127_v15, %v5141_v21 }
  0xd8   : > { %v7076_v45 = vcombine.low %v7074_v27, %v7075_v51  ;;  %3885 = vrot.lane.b32.xlu1 %v3884_v24, %s4215_s21  ;;  %7079 = vst [vmem:[#allocation41_spill] sm:$0xff] %v5311_v50  ;;  %v5319_v23 = vrot.slane %v958_v41, %v4460_v43  ;;  %v7081_v32 = vcombine.high %v7070_v6, %v7071_v13 }
  0xd9   : > { %v2406_v37 = vcombine.low %v5134_v38, %v5221_v20  ;;  %v7082_v21 = vcombine.high %v7074_v27, %v7075_v51  ;;  %v5348_v29 = vrot.slane %v2063_v58, %v4460_v43  ;;  %v2390_v13 = vcombine.low %v5087_v4, %v5178_v7  ;;  %v7083_v27 = vld [vmem:[#allocation26_spill] sm:$0xff]  ;;  %v7084_v51 = vld [vmem:[#allocation27_spill] sm:$0xff] }
  0xda   : > { %v3879_v1 = vpack.i.bf16 %v2112_v59, %v7076_v45  ;;  %v2070_v59 = vrot.slane %v2062_v40, %v4460_v43  ;;  %7080 = vst [vmem:[#allocation50_spill] sm:$0xff] %v5319_v23  ;;  %v5321_v31 = vpop.permute.xlu1 %399  ;;  %v5323_v57 = vpop.permute.xlu0 %395  ;;  %v3894_v3 = vpack.i.bf16 %v889_v10, %v7081_v32  ;;  %v2095_v40 = vcombine.high %v5150_v26, %v5160_v48 }
  0xdb   : > { %v3889_v15 = vpack.i.bf16 %v2113_v33, %v7082_v21  ;;  %v871_v10 = vcombine.high %v5153_v5, %v5163_v8  ;;  %v2422_v26 = vcombine.low %v5274_v56, %v5321_v31  ;;  %v5358_v48 = vrot.slane %v839_v44, %v4460_v43  ;;  %v7086_v21 = vld [vmem:[#allocation28_spill] sm:$0xff]  ;;  %v7101_v5 = vld [vmem:[#allocation38_spill] sm:$0xff] }
  0xdc   : > { %3880 = vrot.lane.b32.xlu0 %v3879_v1, %s4215_s21  ;;  %v890_v1 = vcombine.low %v5293_v35, %v5270_v28  ;;  %v2114_v41 = vcombine.low %v2070_v59, %v5283_v0  ;;  %3895 = vrot.lane.b32.xlu1 %v3894_v3, %s4216_s22  ;;  %v2215_v8 = vcombine.high %v5211_v17, %v5190_v62 }
  0xdd   : > { %v7085_v36 = vcombine.low %v7083_v27, %v7084_v51  ;;  %v2115_v32 = vcombine.high %v2070_v59, %v5283_v0  ;;  %v5371_v3 = vrot.slane %v2406_v37, %v4450_v39  ;;  %v2247_v17 = vcombine.high %v5311_v50, %v5286_v61 }
  0xde   : > { %v5362_v63 = vpop.permute.xlu1 %423  ;;  %v5364_v24 = vpop.permute.xlu0 %403  ;;  %v5381_v19 = vrot.slane %v2095_v40, %v4460_v43  ;;  %v2119_v0 = vcombine.high %v7049_v22, %v7048_v14  ;;  %v891_v59 = vcombine.high %v5293_v35, %v5270_v28  ;;  %v2183_v37 = vcombine.high %v5230_v34, %v5208_v11 }
  0xdf   : > { %v3904_v58 = vpack.i.bf16 %v890_v1, %v7085_v36  ;;  %v2438_v44 = vcombine.low %v5323_v57, %v5364_v24  ;;  %v5384_v1 = vrot.slane %v871_v10, %v4460_v43  ;;  %v5397_v40 = vrot.slane %v2422_v26, %v4450_v39  ;;  %v7095_v36 = vld [vmem:[#allocation45_spill] sm:$0xff] }
  0xe0   : > { %3890 = vrot.lane.b32.xlu0 %v3889_v15, %s4216_s22  ;;  %v7087_v15 = vld [vmem:[#allocation30_spill] sm:$0xff]  ;;  %v2167_v22 = vcombine.high %v4962_v47, %v5036_v52  ;;  %v5406_v14 = vrot.slane %v2215_v8, %v4460_v43  ;;  %v991_v34 = vcombine.high %v5219_v18, %v5199_v60  ;;  %v7093_v47 = vcombine.high %v5021_v54, %v5024_v55  ;;  %v7094_v8 = vld [vmem:[#allocation51_spill] sm:$0xff] }
  0xe1   : > { %v7088_v33 = vcombine.low %v7086_v21, %v7087_v15  ;;  %3905 = vrot.lane.b32.xlu1 %v3904_v58, %s4217_s23  ;;  %7089 = vst [vmem:[#allocation42_spill] sm:$0xff] %v5397_v40  ;;  %v5400_v10 = vrot.slane %v2438_v44, %v4450_v39  ;;  %v7092_v35 = vcombine.high %v7086_v21, %v7087_v15  ;;  %v7097_v44 = vld [vmem:[#allocation55_spill] sm:$0xff]  ;;  %v7098_v15 = vld [vmem:[#allocation68_spill] sm:$0xff] }
  0xe2   : > { %v5410_v11 = vpop.permute.xlu1 %431  ;;  %v5412_v28 = vpop.permute.xlu0 %427  ;;  %v3909_v26 = vpack.i.bf16 %v7093_v47, %v2247_v17  ;;  %v1023_v60 = vcombine.high %v5319_v23, %v5296_v16  ;;  %v895_v18 = vcombine.high %v7053_v46, %v7052_v30  ;;  %v2135_v58 = vcombine.high %v7095_v36, %v7094_v8  ;;  %v7100_v47 = vld [vmem:[#allocation36_spill] sm:$0xff]  ;;  %v7117_v23 = vld [vmem:[#allocation69_spill] sm:$0xff] }
  0xe3   : > { %v3899_v62 = vpack.i.bf16 %v2114_v41, %v7088_v33  ;;  %v5394_v41 = vrot.slane %v2390_v13, %v4450_v39  ;;  %7090 = vst [vmem:[#allocation53_spill] sm:$0xff] %v5400_v10  ;;  %7091 = vst [vmem:[#allocation54_spill] sm:$0xff] %v5412_v28  ;;  %v3914_v33 = vpack.i.bf16 %v2115_v32, %v7092_v35  ;;  %v7096_v32 = vld [vmem:[#allocation58_spill] sm:$0xff]  ;;  %v7104_v36 = vld [vmem:[#allocation52_spill] sm:$0xff] }
  0xe4   : > { %v2486_v52 = vcombine.low %v5397_v40, %v5400_v10  ;;  %v2151_v21 = vcombine.high %v7097_v44, %v7096_v32  ;;  %v5436_v17 = vrot.slane %v2183_v37, %v4460_v43  ;;  %v959_v6 = vcombine.high %v7101_v5, %v7100_v47  ;;  %v7105_v32 = vld [vmem:[#allocation46_spill] sm:$0xff] }
  0xe5   : > { %3900 = vrot.lane.b32.xlu0 %v3899_v62, %s4217_s23  ;;  %v2454_v13 = vcombine.low %v5394_v41, %v5371_v3  ;;  %v7099_v62 = vld [vmem:[#allocation57_spill] sm:$0xff]  ;;  %3915 = vrot.lane.b32.xlu1 %v3914_v33, %s4218_s24  ;;  %v7103_v46 = vcombine.high %v7083_v27, %v7084_v51  ;;  %v911_v44 = vcombine.high %v7105_v32, %v7104_v36  ;;  %v7107_v33 = vld [vmem:[#allocation56_spill] sm:$0xff]  ;;  %v7110_v51 = vld [vmem:[#allocation66_spill] sm:$0xff] }
  0xe6   : > { %v943_v35 = vcombine.high %v7099_v62, %v7098_v15  ;;  %v5441_v30 = vrot.slane %v2486_v52, %v4460_v43  ;;  %v7106_v15 = vld [vmem:[#allocation59_spill] sm:$0xff]  ;;  %v5452_v37 = vrot.slane %v2167_v22, %v4450_v39  ;;  %v5454_v45 = vpop.permute.xlu1 %439  ;;  %v5456_v5 = vpop.permute.xlu0 %435  ;;  %v2116_v52 = vcombine.low %v5348_v29, %v5381_v19 }
  0xe7   : > { %v3924_v8 = vpack.i.bf16 %v891_v59, %v7103_v46  ;;  %v927_v62 = vcombine.high %v7107_v33, %v7106_v15  ;;  %7108 = vst [vmem:[#allocation21_spill] sm:$0xff] %v5454_v45  ;;  %v5464_v27 = vrot.slane %v2454_v13, %v4460_v43  ;;  %v7111_v59 = vld [vmem:[#allocation67_spill] sm:$0xff]  ;;  %v2248_v22 = vcombine.low %v5436_v17, %v5406_v14 }
  0xe8   : > { %7102 = vst [vmem:[#allocation19_spill] sm:$0xff] %v5441_v30  ;;  %v7112_v47 = vcombine.high %v7110_v51, %v7111_v59  ;;  %v2133_v36 = vrot.slane %v2119_v0, %v4450_v39  ;;  %v2149_v32 = vrot.slane %v2135_v58, %v4450_v39  ;;  %v5474_v15 = vrot.slane %v2151_v21, %v4450_v39  ;;  %v7121_v58 = vld [vmem:[#allocation33_spill] sm:$0xff] }
  0xe9   : > { %3910 = vrot.lane.b32.xlu0 %v3909_v26, %s4214_s20  ;;  %v5461_v26 = vrot.slane %v991_v34, %v4460_v43  ;;  %7109 = vst [vmem:[#allocation23_spill] sm:$0xff] %v5464_v27  ;;  %v5477_v34 = vrot.slane %v943_v35, %v4450_v39  ;;  %3925 = vrot.lane.b32.xlu1 %v3924_v8, %s4218_s24 }
  0xea   : > { %v3919_v46 = vpack.i.bf16 %v7112_v47, %v1023_v60  ;;  %v5481_v13 = vrot.slane %v959_v6, %v4460_v43  ;;  %v892_v60 = vcombine.low %v5358_v48, %v5384_v1  ;;  %v2117_v0 = vcombine.high %v5348_v29, %v5381_v19  ;;  %v5494_v6 = vpop.permute.xlu1 %447  ;;  %v5496_v33 = vpop.permute.xlu0 %443  ;;  %v7114_v47 = vld [vmem:[#allocation29_spill] sm:$0xff]  ;;  %v7118_v19 = vld [vmem:[#allocation70_spill] sm:$0xff] }
  0xeb   : > { %v925_v21 = vrot.slane %v911_v44, %v4450_v39  ;;  %v941_v35 = vrot.slane %v927_v62, %v4450_v39  ;;  %v2230_v8 = vcombine.low %v5474_v15, %v5452_v37  ;;  %7113 = vst [vmem:[#allocation25_spill] sm:$0xff] %v5494_v6  ;;  %v7119_v29 = vcombine.low %v7117_v23, %v7118_v19 }
  0xec   : > { %v1024_v44 = vcombine.low %v5481_v13, %v5461_v26  ;;  %v909_v50 = vrot.slane %v895_v18, %v4450_v39  ;;  %v2198_v51 = vcombine.low %v2133_v36, %v2149_v32 }
  0xed   : > { %3920 = vrot.lane.b32.xlu0 %v3919_v46, %s4214_s20  ;;  %v7115_v46 = vld [vmem:[#allocation31_spill] sm:$0xff]  ;;  %v3929_v61 = vpack.i.bf16 %v7119_v29, %v2248_v22  ;;  %v1006_v59 = vcombine.low %v941_v35, %v5477_v34  ;;  %v2558_v22 = vcombine.low %v5454_v45, %v5494_v6  ;;  %v7120_v29 = vld [vmem:[#allocation32_spill] sm:$0xff] }
  0xee   : > { %v7116_v53 = vcombine.low %v7114_v47, %v7115_v46  ;;  %v7122_v18 = vcombine.low %v7120_v29, %v7121_v58  ;;  %v7123_v54 = vcombine.high %v7114_v47, %v7115_v46  ;;  %v974_v40 = vcombine.low %v909_v50, %v925_v21  ;;  %v7125_v45 = vld [vmem:[#allocation72_spill] sm:$0xff] }
  0xef   : > { %v975_v10 = vcombine.high %v909_v50, %v925_v21  ;;  %v2249_v50 = vcombine.high %v5436_v17, %v5406_v14  ;;  %v7127_v21 = vcombine.high %v7120_v29, %v7121_v58  ;;  %v1007_v46 = vcombine.high %v941_v35, %v5477_v34 }
  0xf0   : > { %v3934_v16 = vpack.i.bf16 %v2116_v52, %v7116_v53  ;;  %v893_v53 = vcombine.high %v5358_v48, %v5384_v1  ;;  %v2542_v52 = vcombine.low %v5412_v28, %v5456_v5  ;;  %v3944_v62 = vpack.i.bf16 %v892_v60, %v7122_v18  ;;  %v5529_v1 = vpop.permute.xlu1 %393  ;;  %v5531_v28 = vpop.permute.xlu0 %451  ;;  %v7124_v18 = vld [vmem:[#allocation71_spill] sm:$0xff] }
  0xf1   : > { %3930 = vrot.lane.b32.xlu0 %v3929_v61, %s4215_s21  ;;  %v3954_v55 = vpack.i.bf16 %v2117_v0, %v7123_v54  ;;  %v5527_v48 = vrot.slane %v2230_v8, %v4460_v43  ;;  %v2526_v61 = vcombine.low %v5362_v63, %v5410_v11  ;;  %v2574_v60 = vcombine.low %v5496_v33, %v5531_v28 }
  0xf2   : > { %3935 = vrot.lane.b32.xlu1 %v3934_v16, %s4219_s25  ;;  %v2199_v16 = vcombine.high %v2133_v36, %v2149_v32  ;;  %v7126_v47 = vcombine.low %v7124_v18, %v7125_v45  ;;  %v2206_v36 = vrot.slane %v2198_v51, %v4460_v43  ;;  %v2231_v32 = vcombine.high %v5474_v15, %v5452_v37 }
  0xf3   : > { %v5546_v0 = vrot.slane %v1006_v59, %v4460_v43  ;;  %v3964_v8 = vpack.i.bf16 %v893_v53, %v7127_v21  ;;  %v5557_v14 = vrot.slane %v2558_v22, %v4450_v39  ;;  %v5560_v17 = vrot.slane %v2574_v60, %v4450_v39  ;;  %v7133_v22 = vld [vmem:[#allocation40_spill] sm:$0xff]  ;;  %v7134_v60 = vld [vmem:[#allocation35_spill] sm:$0xff] }
  0xf4   : > { %v3939_v54 = vpack.i.bf16 %v7126_v47, %v1024_v44  ;;  %v5554_v44 = vrot.slane %v2542_v52, %v4450_v39  ;;  %v5564_v37 = vrot.slane %v2199_v16, %v4460_v43  ;;  %v982_v51 = vrot.slane %v974_v40, %v4460_v43  ;;  %v5570_v15 = vpop.permute.xlu1 %401  ;;  %v5572_v34 = vpop.permute.xlu0 %397 }
  0xf5   : > { %7129 = vst [vmem:[#allocation27_spill] sm:$0xff] %v5557_v14  ;;  %v5568_v59 = vrot.slane %v975_v10, %v4460_v43  ;;  %v2250_v58 = vcombine.low %v2206_v36, %v5527_v48  ;;  %v5576_v35 = vrot.slane %v2526_v61, %v4450_v39  ;;  %v7131_v53 = vcombine.high %v7117_v23, %v7118_v19  ;;  %v7132_v10 = vld [vmem:[#allocation39_spill] sm:$0xff] }
  0xf6   : > { %3945 = vrot.lane.b32.xlu1 %v3944_v62, %s4219_s25  ;;  %7128 = vst [vmem:[#allocation26_spill] sm:$0xff] %v5554_v44  ;;  %3940 = vrot.lane.b32.xlu0 %v3939_v54, %s4215_s21  ;;  %v2622_v62 = vcombine.low %v5557_v14, %v5560_v17  ;;  %v1025_v40 = vcombine.high %v5481_v13, %v5461_v26  ;;  %v7135_v54 = vld [vmem:[#allocation34_spill] sm:$0xff] }
  0xf7   : > { %7130 = vst [vmem:[#allocation28_spill] sm:$0xff] %v5576_v35  ;;  %v3949_v52 = vpack.i.bf16 %v7131_v53, %v2249_v50  ;;  %v1182_v29 = vcombine.low %v7133_v22, %v7132_v10  ;;  %v1214_v16 = vcombine.low %v5529_v1, %v5570_v15  ;;  %v1198_v61 = vcombine.low %v7134_v60, %v5572_v34  ;;  %v7136_v50 = vld [vmem:[#allocation78_spill] sm:$0xff] }
  0xf8   : > { %v1026_v47 = vcombine.low %v982_v51, %v5546_v0  ;;  %v2245_v23 = vrot.slane %v2231_v32, %v4460_v43  ;;  %v5595_v19 = vrot.slane %v1007_v46, %v4460_v43  ;;  %v2391_v26 = vcombine.high %v5087_v4, %v5178_v7  ;;  %v5612_v46 = vpop.permute.xlu1 %425  ;;  %v5614_v4 = vpop.permute.xlu0 %421 }
  0xf9   : > { %v2590_v13 = vcombine.low %v5576_v35, %v5554_v44  ;;  %v1166_v21 = vcombine.low %v7136_v50, %v7135_v54  ;;  %v5607_v53 = vrot.slane %v1214_v16, %v4450_v39  ;;  %v5610_v32 = vrot.slane %v1198_v61, %v4450_v39  ;;  %v7139_v61 = vld [vmem:[#allocation75_spill] sm:$0xff]  ;;  %v7140_v35 = vld [vmem:[#allocation76_spill] sm:$0xff] }
  0xfa   : > { %3955 = vrot.lane.b32.xlu1 %v3954_v55, %s4220_s26  ;;  %3950 = vrot.lane.b32.xlu0 %v3949_v52, %s4216_s22  ;;  %v1167_v55 = vcombine.high %v7136_v50, %v7135_v54  ;;  %v1183_v7 = vcombine.high %v7133_v22, %v7132_v10  ;;  %v5619_v52 = vrot.slane %v2622_v62, %v4460_v43 }
  0xfb   : > { %v7138_v6 = vcombine.high %v7124_v18, %v7125_v45  ;;  %v2251_v16 = vcombine.high %v2206_v36, %v5527_v48  ;;  %v5626_v50 = vrot.slane %v1182_v29, %v4450_v39  ;;  %v7141_v44 = vcombine.low %v7139_v61, %v7140_v35 }
  0xfc   : > { %7137 = vst [vmem:[#allocation30_spill] sm:$0xff] %v5619_v52  ;;  %v7142_v10 = vcombine.low %v5110_v9, %v5119_v2  ;;  %v1027_v22 = vcombine.high %v982_v51, %v5546_v0  ;;  %v5637_v45 = vrot.slane %v2391_v26, %v4450_v39  ;;  %v2252_v48 = vcombine.low %v5564_v37, %v2245_v23  ;;  %v5656_v51 = vpop.permute.xlu1 %433 }
  0xfd   : > { %v3959_v54 = vpack.i.bf16 %v7138_v6, %v1025_v40  ;;  %v3974_v14 = vpack.i.bf16 %v7141_v44, %v1026_v47  ;;  %v5640_v6 = vrot.slane %v2590_v13, %v4460_v43  ;;  %v1028_v18 = vcombine.low %v5568_v59, %v5595_v19 }
  0xfe   : > { %3965 = vrot.lane.b32.xlu1 %v3964_v8, %s4220_s26  ;;  %v3969_v62 = vpack.i.bf16 %v7142_v10, %v2250_v58  ;;  %v5647_v36 = vrot.slane %v1166_v21, %v4450_v39  ;;  %v5650_v8 = vrot.slane %v1167_v55, %v4450_v39  ;;  %v2407_v0 = vcombine.high %v5134_v38, %v5221_v20  ;;  %v5658_v58 = vpop.permute.xlu0 %429 }
  0xff   : > { %7143 = vst [vmem:[#allocation51_spill] sm:$0xff] %v5640_v6  ;;  %3960 = vrot.lane.b32.xlu0 %v3959_v54, %s4216_s22  ;;  %v1262_v44 = vcombine.low %v5610_v32, %v5607_v53  ;;  %v5661_v40 = vrot.slane %v1183_v7, %v4450_v39  ;;  %v7144_v29 = vcombine.high %v5110_v9, %v5119_v2 }
 0x100   : > { %v2655_v26 = vcombine.high %v5640_v6, %v5619_v52  ;;  %v2253_v13 = vcombine.high %v5564_v37, %v2245_v23  ;;  %v2455_v20 = vcombine.high %v5394_v41, %v5371_v3  ;;  %v1230_v38 = vcombine.low %v5647_v36, %v5626_v50 }
 0x101   : > { %v3984_v47 = vpack.i.bf16 %v7144_v29, %v2251_v16  ;;  %v2439_v21 = vcombine.high %v5323_v57, %v5364_v24  ;;  %v7145_v9 = vcombine.high %v7139_v61, %v7140_v35  ;;  %v1318_v55 = vcombine.low %v5612_v46, %v5656_v51  ;;  %v442_v35 = vpop.permute.xlu1 %441 }
 0x102   : > { %3975 = vrot.lane.b32.xlu1 %v3974_v14, %s4217_s23  ;;  %v1302_v37 = vcombine.low %v5614_v4, %v5658_v58  ;;  %v2519_v3 = vcombine.high %v5464_v27, %v5441_v30  ;;  %v7146_v57 = vcombine.low %v5250_v12, %v5261_v49  ;;  %v5690_v41 = vrot.slane %v2407_v0, %v4450_v39  ;;  %v438_v23 = vpop.permute.xlu0 %437 }
 0x103   : > { %v3994_v2 = vpack.i.bf16 %v7145_v9, %v1027_v22  ;;  %3970 = vrot.lane.b32.xlu0 %v3969_v62, %s4217_s23  ;;  %v5693_v14 = vrot.slane %v1262_v44, %v4460_v43  ;;  %v7148_v7 = vcombine.low %v5267_v42, %v5305_v25  ;;  %v1029_v16 = vcombine.high %v5568_v59, %v5595_v19  ;;  %v7152_v9 = vld [vmem:[#allocation42_spill] sm:$0xff] }
 0x104   : > { %v4004_v24 = vpack.i.bf16 %v7146_v57, %v2252_v48  ;;  %v1231_v61 = vcombine.high %v5647_v36, %v5626_v50  ;;  %v3979_v62 = vpack.i.bf16 %v2655_v26, %v2519_v3  ;;  %v7149_v22 = vcombine.high %v5250_v12, %v5261_v49  ;;  %v7151_v26 = vld [vmem:[#allocation53_spill] sm:$0xff] }
 0x105   : > { %7147 = vst [vmem:[#allocation45_spill] sm:$0xff] %v5693_v14  ;;  %v5698_v54 = vpack.i.bf16 %v7148_v7, %v1028_v18  ;;  %v5712_v0 = vrot.slane %v2455_v20, %v4460_v43  ;;  %v5715_v18 = vrot.slane %v1230_v38, %v4460_v43  ;;  %v2423_v44 = vcombine.high %v5274_v56, %v5321_v31  ;;  %v7153_v56 = vld [vmem:[#allocation54_spill] sm:$0xff]  ;;  %v450_v20 = vpop.permute.xlu1 %449 }
 0x106   : > { %v5709_v48 = vpack.i.bf16 %v7149_v22, %v2253_v13  ;;  %v5720_v29 = vrot.slane %v2439_v21, %v4450_v39  ;;  %3985 = vrot.lane.b32.xlu1 %v3984_v47, %s4218_s24  ;;  %v2487_v3 = vcombine.high %v7152_v9, %v7151_v26  ;;  %v2527_v49 = vcombine.high %v5362_v63, %v5410_v11  ;;  %v446_v38 = vpop.permute.xlu0 %445  ;;  %v7157_v26 = vld [vmem:[#allocation25_spill] sm:$0xff] }
 0x107   : > { %7150 = vst [vmem:[#allocation58_spill] sm:$0xff] %v5715_v18  ;;  %v5728_v12 = vrot.slane %v1318_v55, %v4450_v39  ;;  %v5731_v13 = vrot.slane %v1302_v37, %v4450_v39  ;;  %3980 = vrot.lane.b32.xlu0 %v3979_v62, %s4214_s20  ;;  %v2543_v31 = vcombine.high %v7153_v56, %v5456_v5  ;;  %v7154_v62 = vld [vmem:[#allocation27_spill] sm:$0xff] }
 0x108   : > { %v2575_v47 = vcombine.high %v5496_v33, %v5531_v28  ;;  %v1350_v11 = vcombine.low %v442_v35, %v450_v20  ;;  %v1351_v55 = vcombine.high %v442_v35, %v450_v20  ;;  %v1334_v37 = vcombine.low %v438_v23, %v446_v38 }
 0x109   : > { %v1335_v57 = vcombine.high %v438_v23, %v446_v38  ;;  %v1215_v7 = vcombine.high %v5529_v1, %v5570_v15  ;;  %v1199_v5 = vcombine.high %v7134_v60, %v5572_v34  ;;  %v1319_v28 = vcombine.high %v5612_v46, %v5656_v51  ;;  %v7155_v15 = vld [vmem:[#allocation26_spill] sm:$0xff]  ;;  %v7156_v34 = vld [vmem:[#allocation28_spill] sm:$0xff]  ;;  %v7158_v46 = vld [vmem:[#allocation21_spill] sm:$0xff] }
 0x10a   : > { %v1303_v33 = vcombine.high %v5614_v4, %v5658_v58  ;;  %3995 = vrot.lane.b32.xlu1 %v3994_v2, %s4218_s24  ;;  %v2623_v22 = vcombine.high %v7154_v62, %v5560_v17  ;;  %v1366_v35 = vcombine.low %v5731_v13, %v5728_v12  ;;  %v1358_v23 = vrot.slane %v1350_v11, %v4450_v39  ;;  %v5767_v17 = vpop.permute.xlu1 %532  ;;  %v5769_v2 = vpop.permute.xlu0 %528 }
 0x10b   : > { %v1342_v1 = vrot.slane %v1334_v37, %v4450_v39  ;;  %v2591_v60 = vcombine.high %v7156_v34, %v7155_v15  ;;  %v2559_v51 = vcombine.high %v7158_v46, %v7157_v26  ;;  %v5762_v4 = vrot.slane %v1351_v55, %v4450_v39 }
 0x10c   : > { %v5765_v58 = vrot.slane %v1335_v57, %v4450_v39  ;;  %v5772_v9 = vrot.slane %v2487_v3, %v4460_v43  ;;  %v5775_v56 = vrot.slane %v2543_v31, %v4450_v39  ;;  %v5778_v20 = vrot.slane %v2575_v47, %v4450_v39 }
 0x10d   : > { %v1398_v38 = vcombine.low %v1342_v1, %v1358_v23  ;;  %v5781_v11 = vrot.slane %v1215_v7, %v4450_v39  ;;  %v5784_v55 = vrot.slane %v1199_v5, %v4450_v39  ;;  %v5787_v37 = vrot.slane %v1319_v28, %v4450_v39 }
 0x10e   : > { %v5790_v57 = vrot.slane %v1303_v33, %v4450_v39  ;;  %4005 = vrot.lane.b32.xlu1 %v4004_v24, %s4219_s25  ;;  %v5794_v3 = vrot.slane %v2623_v22, %v4460_v43  ;;  %v5797_v31 = vrot.slane %v1366_v35, %v4460_v43  ;;  %v1399_v47 = vcombine.high %v1342_v1, %v1358_v23  ;;  %v5812_v62 = vpop.permute.xlu1 %540  ;;  %v5818_v23 = vpop.permute.xlu0 %536 }
 0x10f   : > { %v5800_v7 = vrot.slane %v1398_v38, %v4460_v43  ;;  %v5803_v5 = vrot.slane %v2591_v60, %v4460_v43  ;;  %v5806_v28 = vrot.slane %v2559_v51, %v4450_v39  ;;  %v1263_v33 = vcombine.high %v5610_v32, %v5607_v53 }
 0x110   : > { %7159 = vst [vmem:[#allocation55_spill] sm:$0xff] %v5797_v31  ;;  %v1414_v24 = vcombine.low %v5765_v58, %v5762_v4  ;;  %v1367_v22 = vcombine.high %v5731_v13, %v5728_v12  ;;  %v1295_v1 = vcombine.high %v5715_v18, %v5693_v14  ;;  %v5825_v53 = vrot.slane %v2423_v44, %v4450_v39 }
 0x111   : > { %7160 = vst [vmem:[#allocation68_spill] sm:$0xff] %v5800_v7  ;;  %v1431_v15 = vcombine.high %v5797_v31, %v5800_v7  ;;  %v5828_v32 = vrot.slane %v2527_v49, %v4450_v39  ;;  %v1278_v12 = vcombine.low %v5784_v55, %v5781_v11  ;;  %v1382_v13 = vcombine.low %v5790_v57, %v5787_v37 }
 0x112   : > { %4015 = vrot.lane.b32.xlu1 %v5698_v54, %s4219_s25  ;;  %v2638_v34 = vcombine.low %v5806_v28, %v5778_v20  ;;  %v5839_v60 = vrot.slane %v1399_v47, %v4460_v43  ;;  %v2656_v49 = vcombine.low %v5803_v5, %v5794_v3  ;;  %v2502_v26 = vcombine.low %v5825_v53, %v5720_v29  ;;  %v5852_v38 = vpop.permute.xlu1 %548  ;;  %v5862_v63 = vpop.permute.xlu0 %544 }
 0x113   : > { %v3989_v44 = vpack.i.bf16 %v1431_v15, %v1295_v1  ;;  %v5846_v46 = vrot.slane %v1414_v24, %v4460_v43  ;;  %v2814_v51 = vcombine.low %v5767_v17, %v5812_v62  ;;  %v2798_v54 = vcombine.low %v5769_v2, %v5818_v23 }
 0x114   : > { %v2606_v47 = vcombine.low %v5828_v32, %v5775_v56  ;;  %v5857_v1 = vrot.slane %v1263_v33, %v4460_v43  ;;  %v5860_v15 = vrot.slane %v1367_v22, %v4460_v43  ;;  %v2520_v24 = vcombine.low %v5712_v0, %v5772_v9 }
 0x115   : > { %3990 = vrot.lane.b32.xlu0 %v3989_v44, %s4214_s20  ;;  %v2470_v35 = vcombine.low %v5637_v45, %v5690_v41  ;;  %v5870_v21 = vrot.slane %v1278_v12, %v4460_v43  ;;  %v5873_v10 = vrot.slane %v1382_v13, %v4460_v43  ;;  %v7161_v33 = vcombine.high %v5267_v42, %v5305_v25 }
 0x116   : > { %4025 = vrot.lane.b32.xlu1 %v5709_v48, %s4220_s26  ;;  %v1245_v44 = vrot.slane %v1231_v61, %v4460_v43  ;;  %v5888_v12 = vrot.slane %v2638_v34, %v4460_v43  ;;  %v3999_v13 = vpack.i.bf16 %v2656_v49, %v2520_v24  ;;  %v1432_v14 = vcombine.low %v5860_v15, %v5839_v60  ;;  %v5904_v50 = vpop.permute.xlu1 %556  ;;  %v5916_v34 = vpop.permute.xlu0 %552 }
 0x117   : > { %v4034_v22 = vpack.i.bf16 %v7161_v33, %v1029_v16  ;;  %v7162_v59 = vcombine.low %v5650_v8, %v5661_v40  ;;  %v5899_v42 = vrot.slane %v2814_v51, %v4450_v39  ;;  %v5902_v25 = vrot.slane %v2798_v54, %v4450_v39 }
 0x118   : > { %v1434_v36 = vcombine.low %v5873_v10, %v5846_v46  ;;  %v5909_v16 = vrot.slane %v2502_v26, %v4460_v43  ;;  %v5912_v61 = vrot.slane %v2606_v47, %v4460_v43  ;;  %v2846_v48 = vcombine.low %v5852_v38, %v5904_v50 }
 0x119   : > { %v5896_v19 = vrot.slane %v7162_v59, %v4460_v43  ;;  %4000 = vrot.lane.b32.xlu0 %v3999_v13, %s4215_s21  ;;  %v1296_v49 = vcombine.low %v1245_v44, %v5857_v1  ;;  %v5921_v51 = vrot.slane %v2470_v35, %v4460_v43  ;;  %v2639_v54 = vcombine.high %v5806_v28, %v5778_v20  ;;  %v7163_v20 = vld [vmem:[#allocation15_spill] sm:$0xff]  ;;  %v7164_v28 = vld [vmem:[#allocation17_spill] sm:$0xff] }
 0x11a   : > { %v2830_v26 = vcombine.low %v5862_v63, %v5916_v34  ;;  %4035 = vrot.lane.b32.xlu1 %v4034_v22, %s4220_s26  ;;  %v5931_v24 = vrot.slane %v2846_v48, %v4450_v39  ;;  %v2657_v13 = vcombine.high %v5803_v5, %v5794_v3  ;;  %v2659_v35 = vcombine.high %v5912_v61, %v5888_v12  ;;  %v5948_v48 = vpop.permute.xlu1 %530 }
 0x11b   : > { %v1298_v47 = vcombine.low %v5896_v19, %v5870_v21  ;;  %v4009_v33 = vpack.i.bf16 %v1432_v14, %v1296_v49  ;;  %v7165_v59 = vcombine.low %v7163_v20, %v7164_v28  ;;  %v2862_v22 = vcombine.low %v5902_v25, %v5899_v42  ;;  %v5954_v49 = vpop.permute.xlu0 %526 }
 0x11c   : > { %v5946_v7 = vrot.slane %v2830_v26, %v4450_v39  ;;  %v2503_v3 = vcombine.high %v5825_v53, %v5720_v29  ;;  %v2607_v5 = vcombine.high %v5828_v32, %v5775_v56  ;;  %v2523_v26 = vcombine.high %v5921_v51, %v5909_v16  ;;  %v7166_v29 = vld [vmem:[#allocation61_spill] sm:$0xff]  ;;  %v7167_v56 = vld [vmem:[#allocation60_spill] sm:$0xff] }
 0x11d   : > { %v5941_v18 = vrot.slane %v7165_v59, %v4450_v39  ;;  %v4044_v14 = vpack.i.bf16 %v1434_v36, %v1298_v47  ;;  %4010 = vrot.lane.b32.xlu0 %v4009_v33, %s4215_s21  ;;  %v2521_v59 = vcombine.high %v5712_v0, %v5772_v9  ;;  %v2471_v31 = vcombine.high %v5637_v45, %v5690_v41  ;;  %v7169_v47 = vld [vmem:[#allocation63_spill] sm:$0xff]  ;;  %v7170_v0 = vld [vmem:[#allocation62_spill] sm:$0xff] }
 0x11e   : > { %v2894_v36 = vcombine.low %v5946_v7, %v5931_v24  ;;  %v7168_v53 = vcombine.low %v7166_v29, %v7167_v56  ;;  %v7171_v9 = vcombine.low %v7169_v47, %v7170_v0  ;;  %v5979_v30 = vrot.slane %v2639_v54, %v4460_v43  ;;  %v5991_v6 = vpop.permute.xlu1 %538 }
 0x11f   : > { %4045 = vrot.lane.b32.xlu1 %v4044_v14, %s4217_s23  ;;  %v4019_v45 = vpack.i.bf16 %v2657_v13, %v2521_v59  ;;  %v4054_v41 = vpack.i.bf16 %v2659_v35, %v2523_v26  ;;  %v1433_v14 = vcombine.high %v5860_v15, %v5839_v60  ;;  %v1415_v27 = vcombine.high %v5765_v58, %v5762_v4  ;;  %v6003_v4 = vpop.permute.xlu0 %534  ;;  %v7178_v26 = vld [vmem:[#allocation77_spill] sm:$0xff] }
 0x120   : > { %v5970_v32 = vrot.slane %v7168_v53, %v4460_v43  ;;  %v5976_v33 = vrot.slane %v7171_v9, %v4460_v43  ;;  %v5986_v53 = vrot.slane %v2862_v22, %v4460_v43  ;;  %v5989_v52 = vrot.slane %v2894_v36, %v4460_v43 }
 0x121   : > { %v1435_v54 = vcombine.high %v5873_v10, %v5846_v46  ;;  %v1247_v13 = vcombine.high %v5650_v8, %v5661_v40  ;;  %v5998_v35 = vrot.slane %v2503_v3, %v4460_v43  ;;  %v6001_v60 = vrot.slane %v2607_v5, %v4460_v43  ;;  %4020 = vrot.lane.b32.xlu0 %v4019_v45, %s4216_s22  ;;  %v7176_v5 = vld [vmem:[#allocation73_spill] sm:$0xff]  ;;  %v7181_v8 = vld [vmem:[#allocation8_spill] sm:$0xff] }
 0x122   : > { %7172 = vst [vmem:[#allocation57_spill] sm:$0xff] %v5986_v53  ;;  %7173 = vst [vmem:[#allocation36_spill] sm:$0xff] %v5989_v52  ;;  %v1297_v58 = vcombine.high %v1245_v44, %v5857_v1  ;;  %v1279_v15 = vcombine.high %v5784_v55, %v5781_v11  ;;  %v1383_v10 = vcombine.high %v5790_v57, %v5787_v37  ;;  %v6028_v44 = vpop.permute.xlu1 %546 }
 0x123   : > { %4055 = vrot.lane.b32.xlu1 %v4054_v41, %s4218_s24  ;;  %v1299_v40 = vcombine.high %v5896_v19, %v5870_v21  ;;  %v2485_v46 = vrot.slane %v2471_v31, %v4460_v43  ;;  %v2658_v1 = vcombine.low %v5912_v61, %v5888_v12  ;;  %v2660_v11 = vcombine.low %v6001_v60, %v5979_v30  ;;  %v7174_v31 = vld [vmem:[#allocation4_spill] sm:$0xff]  ;;  %v7175_v19 = vld [vmem:[#allocation2_spill] sm:$0xff]  ;;  %v6034_v59 = vpop.permute.xlu0 %542 }
 0x124   : > { %v4029_v22 = vpack.i.bf16 %v1433_v14, %v1297_v58  ;;  %v6022_v55 = vrot.slane %v1415_v27, %v4460_v43  ;;  %v1590_v37 = vcombine.low %v5948_v48, %v5991_v6  ;;  %v1574_v57 = vcombine.low %v5954_v49, %v6003_v4  ;;  %v7177_v12 = vld [vmem:[#allocation74_spill] sm:$0xff] }
 0x125   : > { %v4064_v21 = vpack.i.bf16 %v1435_v54, %v1299_v40  ;;  %v2679_v3 = vcombine.high %v7175_v19, %v7174_v31  ;;  %v1502_v61 = vcombine.low %v7177_v12, %v7176_v5  ;;  %v2522_v27 = vcombine.low %v5921_v51, %v5909_v16  ;;  %v7180_v31 = vld [vmem:[#allocation3_spill] sm:$0xff] }
 0x126   : > { %4030 = vrot.lane.b32.xlu0 %v4029_v22, %s4216_s22  ;;  %v1534_v36 = vcombine.low %v5941_v18, %v7178_v26  ;;  %v6042_v9 = vrot.slane %v1279_v15, %v4460_v43  ;;  %v6045_v45 = vrot.slane %v1383_v10, %v4460_v43  ;;  %v2524_v41 = vcombine.low %v2485_v46, %v5998_v35  ;;  %v6062_v10 = vpop.permute.xlu1 %554 }
 0x127   : > { %4065 = vrot.lane.b32.xlu1 %v4064_v21, %s4218_s24  ;;  %v6050_v14 = vrot.slane %v1247_v13, %v4460_v43  ;;  %v4039_v54 = vpack.i.bf16 %v2658_v1, %v2522_v27  ;;  %v2791_v16 = vcombine.high %v5970_v32, %v5976_v33  ;;  %v2927_v51 = vcombine.high %v5986_v53, %v5989_v52 }
 0x128   : > { %v6057_v58 = vrot.slane %v1590_v37, %v4450_v39  ;;  %v6060_v15 = vrot.slane %v1574_v57, %v4450_v39  ;;  %v4074_v40 = vpack.i.bf16 %v2660_v11, %v2524_v41  ;;  %v1436_v13 = vcombine.low %v6045_v45, %v6022_v55  ;;  %v6075_v57 = vpop.permute.xlu0 %550  ;;  %v7179_v11 = vld [vmem:[#allocation5_spill] sm:$0xff] }
 0x129   : > { %v6067_v22 = vrot.slane %v2679_v3, %v4450_v39  ;;  %v2727_v1 = vcombine.high %v7166_v29, %v7167_v56  ;;  %v2759_v21 = vcombine.high %v7169_v47, %v7170_v0  ;;  %v1622_v37 = vcombine.low %v6028_v44, %v6062_v10 }
 0x12a   : > { %4040 = vrot.lane.b32.xlu0 %v4039_v54, %s4217_s23  ;;  %v2663_v19 = vcombine.high %v7180_v31, %v7179_v11  ;;  %v1606_v3 = vcombine.low %v6034_v59, %v6075_v57  ;;  %v1300_v29 = vcombine.low %v6050_v14, %v6042_v9  ;;  %v6086_v56 = vrot.slane %v1502_v61, %v4460_v43  ;;  %v6099_v31 = vpop.permute.xlu1 %576 }
 0x12b   : > { %4075 = vrot.lane.b32.xlu1 %v4074_v40, %s4219_s25  ;;  %v1630_v47 = vrot.slane %v1622_v37, %v4450_v39  ;;  %v4049_v0 = vpack.i.bf16 %v2927_v51, %v2791_v16  ;;  %v2661_v27 = vcombine.high %v6001_v60, %v5979_v30  ;;  %v6092_v41 = vrot.slane %v1534_v36, %v4460_v43  ;;  %v7182_v37 = vld [vmem:[#allocation6_spill] sm:$0xff] }
 0x12c   : > { %v2895_v54 = vcombine.high %v5946_v7, %v5931_v24  ;;  %v1638_v40 = vcombine.low %v6060_v15, %v6057_v58  ;;  %v1614_v11 = vrot.slane %v1606_v3, %v4450_v39  ;;  %v4084_v61 = vpack.i.bf16 %v1436_v13, %v1300_v29  ;;  %v6103_v51 = vpop.permute.xlu0 %574  ;;  %v7186_v3 = vld [vmem:[#allocation7_spill] sm:$0xff] }
 0x12d   : > { %v2711_v16 = vcombine.high %v7182_v37, %v7181_v8  ;;  %v2525_v30 = vcombine.high %v2485_v46, %v5998_v35  ;;  %v6108_v60 = vrot.slane %v2727_v1, %v4460_v43  ;;  %v6111_v7 = vrot.slane %v2759_v21, %v4460_v43 }
 0x12e   : > { %4050 = vrot.lane.b32.xlu0 %v4049_v0, %s4214_s20  ;;  %v6114_v24 = vrot.slane %v2663_v19, %v4450_v39  ;;  %v1503_v36 = vcombine.high %v7177_v12, %v7176_v5  ;;  %v2863_v8 = vcombine.high %v5902_v25, %v5899_v42  ;;  %v1670_v13 = vcombine.low %v1614_v11, %v1630_v47  ;;  %v6136_v12 = vpop.permute.xlu1 %580 }
 0x12f   : > { %4085 = vrot.lane.b32.xlu1 %v4084_v61, %s4219_s25  ;;  %v1535_v35 = vcombine.high %v5941_v18, %v7178_v26  ;;  %v4094_v46 = vpack.i.bf16 %v2661_v27, %v2525_v30  ;;  %v1567_v1 = vcombine.high %v6086_v56, %v6092_v41  ;;  %v1437_v21 = vcombine.high %v6045_v45, %v6022_v55  ;;  %v7185_v26 = vld [vmem:[#allocation9_spill] sm:$0xff] }
 0x130   : > { %v6128_v19 = vrot.slane %v2895_v54, %v4460_v43  ;;  %v6131_v5 = vrot.slane %v1638_v40, %v4460_v43  ;;  %v1671_v42 = vcombine.high %v1614_v11, %v1630_v47  ;;  %v6134_v25 = vrot.slane %v1670_v13, %v4460_v43  ;;  %v6143_v0 = vpop.permute.xlu0 %578 }
 0x131   : > { %v6139_v18 = vrot.slane %v2711_v16, %v4450_v39  ;;  %v2695_v29 = vcombine.high %v7186_v3, %v7185_v26  ;;  %v1301_v55 = vcombine.high %v6050_v14, %v6042_v9  ;;  %v2792_v45 = vcombine.low %v6108_v60, %v6111_v7 }
 0x132   : > { %7183 = vst [vmem:[#allocation38_spill] sm:$0xff] %v6131_v5  ;;  %7184 = vst [vmem:[#allocation52_spill] sm:$0xff] %v6134_v25  ;;  %v6150_v47 = vrot.slane %v2863_v8, %v4460_v43  ;;  %v1639_v27 = vcombine.high %v6060_v15, %v6057_v58  ;;  %v1703_v40 = vcombine.high %v6131_v5, %v6134_v25  ;;  %v6172_v15 = vpop.permute.xlu1 %584  ;;  %v7190_v8 = vld [vmem:[#allocation11_spill] sm:$0xff] }
 0x133   : > { %4095 = vrot.lane.b32.xlu1 %v4094_v46, %s4220_s26  ;;  %v2847_v9 = vcombine.high %v5852_v38, %v5904_v50  ;;  %v2831_v14 = vcombine.high %v5862_v63, %v5916_v34  ;;  %v6164_v11 = vrot.slane %v1503_v36, %v4460_v43  ;;  %v6167_v61 = vrot.slane %v1535_v35, %v4460_v43  ;;  %v7187_v63 = vld [vmem:[#allocation12_spill] sm:$0xff]  ;;  %v7188_v50 = vld [vmem:[#allocation10_spill] sm:$0xff]  ;;  %v7189_v36 = vld [vmem:[#allocation13_spill] sm:$0xff] }
 0x134   : > { %v6170_v58 = vrot.slane %v1671_v42, %v4460_v43  ;;  %v4059_v37 = vpack.i.bf16 %v1703_v40, %v1567_v1  ;;  %v4104_v16 = vpack.i.bf16 %v1437_v21, %v1301_v55  ;;  %v2928_v30 = vcombine.low %v6150_v47, %v6128_v19  ;;  %v7191_v35 = vld [vmem:[#allocation16_spill] sm:$0xff]  ;;  %v7192_v46 = vld [vmem:[#allocation14_spill] sm:$0xff]  ;;  %v6185_v26 = vpop.permute.xlu0 %582 }
 0x135   : > { %v6177_v38 = vrot.slane %v2695_v29, %v4450_v39  ;;  %v1455_v34 = vcombine.high %v7188_v50, %v7187_v63  ;;  %v1439_v13 = vcombine.high %v7190_v8, %v7189_v36  ;;  %v1487_v42 = vcombine.high %v7192_v46, %v7191_v35 }
 0x136   : > { %v2815_v1 = vcombine.high %v5767_v17, %v5812_v62  ;;  %v2799_v21 = vcombine.high %v5769_v2, %v5818_v23  ;;  %v1653_v3 = vrot.slane %v1639_v27, %v4460_v43  ;;  %4060 = vrot.lane.b32.xlu0 %v4059_v37, %s4214_s20  ;;  %v1471_v29 = vcombine.high %v7163_v20, %v7164_v28  ;;  %v6208_v23 = vpop.permute.xlu1 %588 }
 0x137   : > { %4105 = vrot.lane.b32.xlu1 %v4104_v16, %s4220_s26  ;;  %v6197_v55 = vrot.slane %v2847_v9, %v4450_v39  ;;  %v6200_v40 = vrot.slane %v2831_v14, %v4450_v39  ;;  %v1568_v17 = vcombine.low %v6164_v11, %v6167_v61  ;;  %v1623_v2 = vcombine.high %v6028_v44, %v6062_v10 }
 0x138   : > { %v1607_v62 = vcombine.high %v6034_v59, %v6075_v57  ;;  %v4069_v27 = vpack.i.bf16 %v2928_v30, %v2792_v45  ;;  %v1704_v20 = vcombine.low %v1653_v3, %v6170_v58  ;;  %v2742_v28 = vcombine.low %v6114_v24, %v6067_v22  ;;  %v6221_v44 = vpop.permute.xlu0 %586 }
 0x139   : > { %v2774_v9 = vcombine.low %v6177_v38, %v6139_v18  ;;  %v6216_v14 = vrot.slane %v1455_v34, %v4450_v39  ;;  %v6219_v37 = vrot.slane %v1439_v13, %v4450_v39  ;;  %v6224_v59 = vrot.slane %v2815_v1, %v4450_v39 }
 0x13a   : > { %v6227_v10 = vrot.slane %v2799_v21, %v4450_v39  ;;  %v1591_v57 = vcombine.high %v5948_v48, %v5991_v6  ;;  %v1575_v45 = vcombine.high %v5954_v49, %v6003_v4  ;;  %4070 = vrot.lane.b32.xlu0 %v4069_v27, %s4215_s21  ;;  %v6235_v16 = vrot.slane %v1487_v42, %v4450_v39  ;;  %v6250_v48 = vpop.permute.xlu1 %592 }
 0x13b   : > { %v6238_v30 = vrot.slane %v1471_v29, %v4450_v39  ;;  %v2910_v63 = vcombine.low %v6200_v40, %v6197_v55  ;;  %v2793_v50 = vcombine.high %v6108_v60, %v6111_v7  ;;  %v6245_v34 = vrot.slane %v1623_v2, %v4450_v39 }
 0x13c   : > { %v6248_v6 = vrot.slane %v1607_v62, %v4450_v39  ;;  %v4079_v49 = vpack.i.bf16 %v1704_v20, %v1568_v17  ;;  %v2929_v4 = vcombine.high %v6150_v47, %v6128_v19  ;;  %v6254_v36 = vpop.permute.xlu0 %590  ;;  %v1518_v8 = vcombine.low %v6219_v37, %v6216_v14 }
 0x13d   : > { %v2878_v60 = vcombine.low %v6227_v10, %v6224_v59  ;;  %v6261_v7 = vrot.slane %v1591_v57, %v4450_v39  ;;  %v6264_v13 = vrot.slane %v1575_v45, %v4450_v39  ;;  %v1550_v35 = vcombine.low %v6238_v30, %v6235_v16 }
 0x13e   : > { %4080 = vrot.lane.b32.xlu0 %v4079_v49, %s4215_s21  ;;  %v1569_v19 = vcombine.high %v6164_v11, %v6167_v61  ;;  %v6272_v47 = vrot.slane %v2742_v28, %v4460_v43  ;;  %v6275_v46 = vrot.slane %v2774_v9, %v4460_v43  ;;  %v6278_v42 = vrot.slane %v2910_v63, %v4460_v43  ;;  %v6282_v21 = vpop.permute.xlu1 %596 }
 0x13f   : > { %v1686_v1 = vcombine.low %v6248_v6, %v6245_v34  ;;  %v4089_v29 = vpack.i.bf16 %v2929_v4, %v2793_v50  ;;  %v1705_v17 = vcombine.high %v1653_v3, %v6170_v58  ;;  %v2743_v11 = vcombine.high %v6114_v24, %v6067_v22 }
 0x140   : > { %v6287_v61 = vpop.permute.xlu0 %594  ;;  %v2775_v2 = vcombine.high %v6177_v38, %v6139_v18  ;;  %v6292_v62 = vrot.slane %v2878_v60, %v4460_v43  ;;  %v1654_v27 = vcombine.low %v6264_v13, %v6261_v7  ;;  %v2950_v20 = vcombine.low %v6136_v12, %v6208_v23 }
 0x141   : > { %v2794_v58 = vcombine.low %v6272_v47, %v6275_v46  ;;  %v6302_v22 = vrot.slane %v1518_v8, %v4460_v43  ;;  %v6305_v24 = vrot.slane %v1550_v35, %v4460_v43  ;;  %v6308_v18 = vrot.slane %v1686_v1, %v4460_v43 }
 0x142   : > { %4090 = vrot.lane.b32.xlu0 %v4089_v29, %s4216_s22  ;;  %v1726_v38 = vcombine.low %v6143_v0, %v6221_v44  ;;  %v6312_v3 = vpop.permute.xlu1 %600  ;;  %v4099_v28 = vpack.i.bf16 %v1705_v17, %v1569_v19  ;;  %v2930_v9 = vcombine.low %v6292_v62, %v6278_v42  ;;  %v1519_v57 = vcombine.high %v6219_v37, %v6216_v14 }
 0x143   : > { %v2934_v45 = vcombine.low %v6099_v31, %v6172_v15  ;;  %v6323_v50 = vrot.slane %v2743_v11, %v4460_v43  ;;  %v2911_v49 = vcombine.high %v6200_v40, %v6197_v55  ;;  %v6328_v4 = vrot.slane %v1654_v27, %v4460_v43 }
 0x144   : > { %v6320_v63 = vpop.permute.xlu0 %598  ;;  %v1710_v8 = vcombine.low %v6103_v51, %v6185_v26  ;;  %v6334_v14 = vrot.slane %v2775_v2, %v4460_v43  ;;  %v2879_v37 = vcombine.high %v6227_v10, %v6224_v59  ;;  %v2958_v60 = vrot.slane %v2950_v20, %v4450_v39 }
 0x145   : > { %v2966_v35 = vcombine.low %v6250_v48, %v6312_v3  ;;  %v1570_v55 = vcombine.low %v6302_v22, %v6305_v24  ;;  %v1734_v40 = vrot.slane %v1726_v38, %v4450_v39  ;;  %v1742_v19 = vcombine.low %v6254_v36, %v6320_v63 }
 0x146   : > { %4100 = vrot.lane.b32.xlu0 %v4099_v28, %s4216_s22  ;;  %v605_v1 = vpop.permute.xlu1 %604  ;;  %v4109_v29 = vpack.i.bf16 %v2930_v9, %v2794_v58  ;;  %v1706_v17 = vcombine.low %v6328_v4, %v6308_v18  ;;  %v1551_v59 = vcombine.high %v6238_v30, %v6235_v16  ;;  %v2942_v10 = vrot.slane %v2934_v45, %v4450_v39 }
 0x147   : > { %v2982_v11 = vcombine.low %v6282_v21, %v605_v1  ;;  %v6355_v20 = vrot.slane %v2911_v49, %v4460_v43  ;;  %v1718_v38 = vrot.slane %v1710_v8, %v4450_v39  ;;  %v6363_v30 = vrot.slane %v2879_v37, %v4460_v43 }
 0x148   : > { %v603_v2 = vpop.permute.xlu0 %602  ;;  %v2998_v28 = vcombine.low %v2942_v10, %v2958_v60  ;;  %v2974_v9 = vrot.slane %v2966_v35, %v4450_v39  ;;  %v1750_v49 = vrot.slane %v1742_v19, %v4450_v39  ;;  %v4119_v25 = vpack.i.bf16 %v1706_v17, %v1570_v55 }
 0x149   : > { %v1758_v58 = vcombine.low %v6287_v61, %v603_v2  ;;  %v2990_v45 = vrot.slane %v2982_v11, %v4450_v39  ;;  %v1774_v54 = vcombine.low %v1718_v38, %v1734_v40  ;;  %v6376_v16 = vrot.slane %v1519_v57, %v4460_v43 }
 0x14a   : > { %4110 = vrot.lane.b32.xlu0 %v4109_v29, %s4217_s23  ;;  %v6369_v27 = vpop.permute.xlu1 %3875  ;;  %v6379_v35 = vrot.slane %v1551_v59, %v4460_v43  ;;  %v2931_v19 = vcombine.high %v6292_v62, %v6278_v42  ;;  %v2932_v55 = vcombine.low %v6363_v30, %v6355_v20  ;;  %v2999_v52 = vcombine.high %v2942_v10, %v2958_v60 }
 0x14b   : > { %v1766_v8 = vrot.slane %v1758_v58, %v4450_v39  ;;  %v3030_v29 = vcombine.low %v2974_v9, %v2990_v45  ;;  %v6389_v58 = vrot.slane %v2998_v28, %v4460_v43  ;;  %v3031_v57 = vcombine.high %v2974_v9, %v2990_v45 }
 0x14c   : > { %v6371_v5 = vpop.permute.xlu0 %3870  ;;  %v6397_v42 = vrot.slane %v1774_v54, %v4460_v43  ;;  %v1775_v17 = vcombine.high %v1718_v38, %v1734_v40  ;;  %v2983_v28 = vcombine.high %v6282_v21, %v605_v1  ;;  %v1759_v45 = vcombine.high %v6287_v61, %v603_v2 }
 0x14d   : > { %v1806_v11 = vcombine.low %v1750_v49, %v1766_v8  ;;  %v6392_v37 = vrot.slane %v3030_v29, %v4460_v43  ;;  %v1807_v59 = vcombine.high %v1750_v49, %v1766_v8  ;;  %v2951_v54 = vcombine.high %v6136_v12, %v6208_v23 }
 0x14e   : > { %4120 = vrot.lane.b32.xlu0 %v4119_v25, %s4217_s23  ;;  %v1655_v25 = vcombine.high %v6264_v13, %v6261_v7  ;;  %v6402_v53 = vpop.permute.xlu1 %3885  ;;  %v1687_v7 = vcombine.high %v6248_v6, %v6245_v34  ;;  %v1727_v13 = vcombine.high %v6143_v0, %v6221_v44  ;;  %v2967_v21 = vcombine.high %v6250_v48, %v6312_v3 }
 0x14f   : > { %v6400_v62 = vrot.slane %v1806_v11, %v4460_v43  ;;  %v3062_v9 = vcombine.low %v6389_v58, %v6392_v37  ;;  %v1743_v61 = vcombine.high %v6254_v36, %v6320_v63  ;;  %v6423_v40 = vrot.slane %v3031_v57, %v4460_v43 }
 0x150   : > { %v6408_v49 = vpop.permute.xlu0 %3880  ;;  %v6426_v34 = vrot.slane %v1807_v59, %v4460_v43  ;;  %v2935_v12 = vcombine.high %v6099_v31, %v6172_v15  ;;  %v1711_v0 = vcombine.high %v6103_v51, %v6185_v26  ;;  %v6433_v23 = vrot.slane %v2999_v52, %v4460_v43 }
 0x151   : > { %v1838_v60 = vcombine.low %v6397_v42, %v6400_v62  ;;  %v2933_v6 = vcombine.high %v6363_v30, %v6355_v20  ;;  %v6440_v48 = vrot.slane %v1775_v17, %v4460_v43  ;;  %v6443_v36 = vrot.slane %v2983_v28, %v4450_v39 }
 0x152   : > { %v6435_v44 = vpop.permute.xlu1 %3895  ;;  %v6446_v3 = vrot.slane %v1759_v45, %v4450_v39  ;;  %v1839_v52 = vcombine.high %v6397_v42, %v6400_v62  ;;  %v1701_v51 = vrot.slane %v1687_v7, %v4460_v43  ;;  %v2965_v15 = vrot.slane %v2951_v54, %v4450_v39 }
 0x153   : > { %v1741_v26 = vrot.slane %v1727_v13, %v4450_v39  ;;  %v3063_v63 = vcombine.high %v6389_v58, %v6392_v37  ;;  %v2981_v1 = vrot.slane %v2967_v21, %v4450_v39  ;;  %v1757_v10 = vrot.slane %v1743_v61, %v4450_v39 }
 0x154   : > { %v6448_v31 = vpop.permute.xlu0 %3890  ;;  %v1840_v2 = vcombine.low %v6440_v48, %v6426_v34  ;;  %v3064_v20 = vcombine.low %v6433_v23, %v6423_v40  ;;  %v1669_v38 = vrot.slane %v1655_v25, %v4460_v43  ;;  %v2949_v30 = vrot.slane %v2935_v12, %v4450_v39 }
 0x155   : > { %v1725_v8 = vrot.slane %v1711_v0, %v4450_v39  ;;  %v4114_v29 = vpack.i.bf16 %v3063_v63, %v1839_v52  ;;  %v3046_v17 = vcombine.low %v2981_v1, %v6443_v36  ;;  %v1822_v57 = vcombine.low %v1757_v10, %v6446_v3 }
 0x156   : > { %v6466_v11 = vpop.permute.xlu1 %3905  ;;  %v4129_v59 = vpack.i.bf16 %v3064_v20, %v1840_v2  ;;  %v1572_v45 = vcombine.low %v6376_v16, %v6379_v35  ;;  %v3014_v7 = vcombine.low %v2949_v30, %v2965_v15  ;;  %v1707_v39 = vcombine.high %v6328_v4, %v6308_v18 }
 0x157   : > { %v1790_v54 = vcombine.low %v1725_v8, %v1741_v26  ;;  %4115 = vrot.lane.b32.xlu1 %v4114_v29, %s4214_s20  ;;  %v1708_v25 = vcombine.low %v1669_v38, %v1701_v51  ;;  %v1573_v13 = vcombine.high %v6376_v16, %v6379_v35  ;;  %v7193_v21 = vcombine.high %v6272_v47, %v6275_v46 }
 0x158   : > { %v6470_v28 = vpop.permute.xlu0 %3900  ;;  %4130 = vrot.lane.b32.xlu0 %v4129_v59, %s4215_s21  ;;  %v7194_v12 = vcombine.low %v6323_v50, %v6334_v14  ;;  %v7195_v18 = vcombine.high %v6323_v50, %v6334_v14  ;;  %v1709_v63 = vcombine.high %v1669_v38, %v1701_v51  ;;  %v3015_v2 = vcombine.high %v2949_v30, %v2965_v15  ;;  %v7198_v59 = vld [vmem:[#allocation48_spill] sm:$0xff] }
 0x159   : > { %v4124_v61 = vpack.i.bf16 %v2931_v19, %v7193_v21  ;;  %v1791_v20 = vcombine.high %v1725_v8, %v1741_v26  ;;  %v6494_v16 = vrot.slane %v3046_v17, %v4460_v43  ;;  %v6497_v47 = vrot.slane %v1822_v57, %v4460_v43  ;;  %v7197_v57 = vld [vmem:[#allocation47_spill] sm:$0xff] }
 0x15a   : > { %v4139_v0 = vpack.i.bf16 %v2932_v55, %v7194_v12  ;;  %v6486_v52 = vpop.permute.xlu1 %3915  ;;  %v6491_v4 = vpack.i.bf16 %v2933_v6, %v7195_v18  ;;  %v6502_v35 = vrot.slane %v3014_v7, %v4460_v43  ;;  %v6505_v19 = vrot.slane %v1790_v54, %v4460_v43  ;;  %v7201_v54 = vld [vmem:[#allocation20_spill] sm:$0xff] }
 0x15b   : > { %4125 = vrot.lane.b32.xlu1 %v4124_v61, %s4218_s24  ;;  %v7196_v50 = vcombine.high %v6302_v22, %v6305_v24  ;;  %v4149_v55 = vpack.i.bf16 %v1708_v25, %v1572_v45  ;;  %v3047_v6 = vcombine.high %v2981_v1, %v6443_v36  ;;  %v1823_v51 = vcombine.high %v1757_v10, %v6446_v3  ;;  %v7203_v25 = vld [vmem:[#allocation43_spill] sm:$0xff] }
 0x15c   : > { %v6499_v46 = vpop.permute.xlu0 %3910  ;;  %v3878_v15 = vunpack.i.h.bf16 %v6369_v27  ;;  %v3877_v26 = vunpack.i.l.bf16 %v6369_v27  ;;  %4140 = vrot.lane.b32.xlu0 %v4139_v0, %s4219_s25  ;;  %v3873_v38 = vunpack.i.h.bf16 %v6371_v5  ;;  %v1841_v22 = vcombine.high %v6440_v48, %v6426_v34 }
 0x15d   : > { %v4134_v14 = vpack.i.bf16 %v1707_v39, %v7196_v50  ;;  %v3065_v24 = vcombine.high %v6433_v23, %v6423_v40  ;;  %v6523_v36 = vpack.i.bf16 %v1709_v63, %v1573_v13  ;;  %v6526_v3 = vrot.slane %v3015_v2, %v4460_v43  ;;  %v7204_v13 = vld [vmem:[#allocation44_spill] sm:$0xff] }
 0x15e   : > { %v6517_v30 = vpop.permute.xlu1 %3925  ;;  %v6529_v27 = vrot.slane %v1791_v20, %v4460_v43  ;;  %v1842_v10 = vcombine.low %v6505_v19, %v6497_v47  ;;  %v3066_v34 = vcombine.low %v6502_v35, %v6494_v16  ;;  %v3872_v48 = vunpack.i.l.bf16 %v6371_v5  ;;  %v7200_v5 = vld [vmem:[#allocation18_spill] sm:$0xff] }
 0x15f   : > { %v3888_v40 = vunpack.i.h.bf16 %v6402_v53  ;;  %v3887_v23 = vunpack.i.l.bf16 %v6402_v53  ;;  %v3883_v8 = vunpack.i.h.bf16 %v6408_v49  ;;  %4135 = vrot.lane.b32.xlu1 %v4134_v14, %s4218_s24  ;;  %v6543_v29 = vrot.slane %v3047_v6, %v4460_v43  ;;  %v7207_v6 = vld [vmem:[#allocation24_spill] sm:$0xff] }
 0x160   : > { %v6531_v1 = vpop.permute.xlu0 %3920  ;;  %v6546_v17 = vrot.slane %v1823_v51, %v4460_v43  ;;  %v7199_v45 = vcombine.low %v7197_v57, %v7198_v59  ;;  %v7202_v39 = vcombine.low %v7200_v5, %v7201_v54  ;;  %4150 = vrot.lane.b32.xlu0 %v4149_v55, %s4219_s25  ;;  %v7205_v21 = vcombine.low %v7203_v25, %v7204_v13  ;;  %v7206_v55 = vld [vmem:[#allocation22_spill] sm:$0xff] }
 0x161   : > { %v3882_v43 = vunpack.i.l.bf16 %v6408_v49  ;;  %v3893_v12 = vunpack.i.h.bf16 %v6448_v31  ;;  %v4144_v0 = vpack.i.bf16 %v3065_v24, %v1841_v22  ;;  %v3892_v63 = vunpack.i.l.bf16 %v6448_v31 }
 0x162   : > { %v3576_v7 = vsel %vm3574_vm2, %v7199_v45, %v3878_v15  ;;  %v3575_v53 = vsel %vm3574_vm2, %v7202_v39, %v3877_v26  ;;  %v3645_v61 = vsel %vm3574_vm2, %v7205_v21, %v3873_v38  ;;  %v4159_v2 = vpack.i.bf16 %v3066_v34, %v1842_v10 }
 0x163   : > { %v1843_v50 = vcombine.high %v6505_v19, %v6497_v47  ;;  %v3067_v14 = vcombine.high %v6502_v35, %v6494_v16  ;;  %v7208_v51 = vcombine.low %v7206_v55, %v7207_v6  ;;  %v3585_v15 = vsel %vm3584_vm3, %v3575_v53, %v3887_v23  ;;  %4145 = vrot.lane.b32.xlu1 %v4144_v0, %s4216_s22 }
 0x164   : > { %v3936_v18 = vpop.permute.xlu1 %3935  ;;  %v6564_v20 = vpop.permute.xlu0 %3930  ;;  %v3586_v26 = vsel %vm3584_vm3, %v3576_v7, %v3888_v40  ;;  %v3654_v31 = vsel %vm3584_vm3, %v3645_v61, %v3883_v8  ;;  %v3903_v38 = vunpack.i.h.bf16 %v6470_v28  ;;  %v3902_v47 = vunpack.i.l.bf16 %v6470_v28  ;;  %4160 = vrot.lane.b32.xlu0 %v4159_v2, %s4217_s23 }
 0x165   : > { %v3644_v49 = vsel %vm3574_vm2, %v7208_v51, %v3872_v48  ;;  %v1845_v16 = vcombine.high %v6529_v27, %v6546_v17  ;;  %v3069_v35 = vcombine.high %v6526_v3, %v6543_v29  ;;  %v3898_v22 = vunpack.i.h.bf16 %v6435_v44 }
 0x166   : > { %v3653_v19 = vsel %vm3584_vm3, %v3644_v49, %v3882_v43  ;;  %v3918_v24 = vunpack.i.h.bf16 %v6486_v52  ;;  %v3917_v10 = vunpack.i.l.bf16 %v6486_v52  ;;  %v3897_v48 = vunpack.i.l.bf16 %v6435_v44 }
 0x167   : > { %v3662_v28 = vsel %vm3594_vm4, %v3653_v19, %v3892_v63  ;;  %v3663_v40 = vsel %vm3594_vm4, %v3654_v31, %v3893_v12  ;;  %v4169_v23 = vpack.i.bf16 %v3067_v14, %v1843_v50  ;;  %v3908_v8 = vunpack.i.h.bf16 %v6466_v11  ;;  %4155 = vrot.lane.b32.xlu1 %v6491_v4, %s4220_s26 }
 0x168   : > { %v3946_v34 = vpop.permute.xlu1 %3945  ;;  %v3907_v57 = vunpack.i.l.bf16 %v6466_v11  ;;  %v3938_v59 = vunpack.i.h.bf16 %v3936_v18  ;;  %v3937_v45 = vunpack.i.l.bf16 %v3936_v18  ;;  %v3671_v7 = vsel %vm3604_vm5, %v3662_v28, %v3902_v47  ;;  %v6599_v44 = vpop.permute.xlu0 %3940  ;;  %v7210_v28 = vld [vmem:[#allocation64_spill] sm:$0xff] }
 0x169   : > { %v3672_v52 = vsel %vm3604_vm5, %v3663_v40, %v3903_v38  ;;  %4170 = vrot.lane.b32.xlu0 %v4169_v23, %s4218_s24  ;;  %v4179_v5 = vpack.i.bf16 %v3069_v35, %v1845_v16  ;;  %v1844_v54 = vcombine.low %v6529_v27, %v6546_v17  ;;  %v3068_v11 = vcombine.low %v6526_v3, %v6543_v29  ;;  %v3718_v16 = vld [vmem:[%s6806_s2] sm:$0xff] }
 0x16a   : > { %v3680_v53 = vsel %vm3614_vm6, %v3671_v7, %v3917_v10  ;;  %v3681_v4 = vsel %vm3614_vm6, %v3672_v52, %v3918_v24  ;;  %v3928_v25 = vunpack.i.h.bf16 %v6517_v30  ;;  %v3927_v13 = vunpack.i.l.bf16 %v6517_v30  ;;  %v7212_v7 = vld [vmem:[#allocation66_spill] sm:$0xff] }
 0x16b   : > { %v4221_v43 = vmov 0   ;;  %v3948_v12 = vunpack.i.h.bf16 %v3946_v34  ;;  %v3947_v0 = vunpack.i.l.bf16 %v3946_v34  ;;  %4165 = vrot.lane.b32.xlu1 %v6523_v36, %s4220_s26  ;;  %v3689_v3 = vsel %vm3624_vm7, %v3680_v53, %v3937_v45  ;;  %v7211_v45 = vld [vmem:[#allocation67_spill] sm:$0xff] }
 0x16c   : > { %v3956_v39 = vpop.permute.xlu1 %3955  ;;  %3767 = vmatprep.mubr.bf16.mxu0 %v4221_v43  ;;  %4184 = vset.pattern.permute.xlu1 %v4221_v43  ;;  %v3690_v27 = vsel %vm3624_vm7, %v3681_v4, %v3938_v59  ;;  %v3595_v29 = vsel %vm3594_vm4, %v3585_v15, %v3897_v48  ;;  %v3596_v17 = vsel %vm3594_vm4, %v3586_v26, %v3898_v22  ;;  %v3951_v51 = vpop.permute.xlu0 %3950  ;;  %v7209_v48 = vld [vmem:[#allocation65_spill] sm:$0xff]  ;;  %v3913_v23 = vunpack.i.h.bf16 %v6499_v46 }
 0x16d   : > { %v3958_v21 = vunpack.i.h.bf16 %v3956_v39  ;;  %v3957_v61 = vunpack.i.l.bf16 %v3956_v39  ;;  %4185 = vset.pattern.permute.xlu0 %v4221_v43  ;;  %v3605_v63 = vsel %vm3604_vm5, %v3595_v29, %v3907_v57  ;;  %v3606_v2 = vsel %vm3604_vm5, %v3596_v17, %v3908_v8 }
 0x16e   : > { %4180 = vrot.lane.b32.xlu0 %v4179_v5, %s4220_s26  ;;  %v4174_v36 = vpack.i.bf16 %v3068_v11, %v1844_v54  ;;  %v3615_v55 = vsel %vm3614_vm6, %v3605_v63, %v3927_v13  ;;  %v3616_v6 = vsel %vm3614_vm6, %v3606_v2, %v3928_v25  ;;  %v2382_v40 = vcombine.low %v7210_v28, %v7209_v48  ;;  %v7213_v13 = vld [vmem:[#allocation41_spill] sm:$0xff] }
 0x16f   : > { %v3698_v30 = vsel %vm3634_vm8, %v3689_v3, %v3957_v61  ;;  %v3699_v18 = vsel %vm3634_vm8, %v3690_v27, %v3958_v21  ;;  %v3625_v26 = vsel %vm3624_vm7, %v3615_v55, %v3947_v0  ;;  %v3626_v31 = vsel %vm3624_vm7, %v3616_v6, %v3948_v12  ;;  %v7214_v21 = vld [vmem:[#allocation37_spill] sm:$0xff]  ;;  %v7216_v3 = vld [vmem:[#allocation50_spill] sm:$0xff] }
 0x170   : > { %v3966_v50 = vpop.permute.xlu1 %3965  ;;  %v3708_v14 = vpack.c.bf16 %v3699_v18, %v3698_v30  ;;  %4175 = vrot.lane.b32.xlu1 %v4174_v36, %s4219_s25  ;;  %v3912_v8 = vunpack.i.l.bf16 %v6499_v46  ;;  %v3923_v57 = vunpack.i.h.bf16 %v6531_v1  ;;  %v3922_v59 = vunpack.i.l.bf16 %v6531_v1  ;;  %v7217_v27 = vld [vmem:[#allocation49_spill] sm:$0xff] }
 0x171   : > { %v3968_v49 = vunpack.i.h.bf16 %v3966_v50  ;;  %v3967_v15 = vunpack.i.l.bf16 %v3966_v50  ;;  %v3961_v22 = vpop.permute.xlu0 %3960  ;;  %v1158_v52 = vcombine.low %v7212_v7, %v7211_v45  ;;  %v3933_v54 = vunpack.i.h.bf16 %v6564_v20 }
 0x172   : > { %3735 = vmatprep.subr.bf16.mxu0 %v3708_v14  ;;  %v3932_v39 = vunpack.i.l.bf16 %v6564_v20  ;;  %v3943_v11 = vunpack.i.h.bf16 %v6599_v44  ;;  %v3942_v53 = vunpack.i.l.bf16 %v6599_v44  ;;  %v3953_v4 = vunpack.i.h.bf16 %v3951_v51 }
 0x173   : > { %v3635_v38 = vsel %vm3634_vm8, %v3625_v26, %v3967_v15  ;;  %v3636_v47 = vsel %vm3634_vm8, %v3626_v31, %v3968_v49  ;;  %v3952_v25 = vunpack.i.l.bf16 %v3951_v51  ;;  %v3647_v46 = vsel %vm3574_vm2, %v2382_v40, %v3913_v23 }
 0x174   : > { %v6630_v35 = vpop.permute.xlu1 %3975  ;;  %v3707_v19 = vpack.c.bf16 %v3636_v47, %v3635_v38  ;;  %3721 = vperm.xlu1 %4184, %v3718_v16   ;;  %v7215_v61 = vcombine.low %v7213_v13, %v7214_v21  ;;  %v7218_v20 = vcombine.low %v7216_v3, %v7217_v27  ;;  %v3578_v44 = vsel %vm3574_vm2, %v1158_v52, %v3923_v57 }
 0x175   : > { %v3971_v34 = vpop.permute.xlu0 %3970  ;;  %v3656_v63 = vsel %vm3584_vm3, %v3647_v46, %v3933_v54  ;;  %v3588_v50 = vsel %vm3584_vm3, %v3578_v44, %v3943_v11  ;;  %v3963_v49 = vunpack.i.h.bf16 %v3961_v22  ;;  %v3962_v15 = vunpack.i.l.bf16 %v3961_v22 }
 0x176   : > { %3736 = vmatpush1.bf16.msra.mxu0 %v3707_v19  ;;  %v3646_v1 = vsel %vm3574_vm2, %v7215_v61, %v3912_v8  ;;  %v3973_v43 = vunpack.i.h.bf16 %v3971_v34  ;;  %v3972_v12 = vunpack.i.l.bf16 %v3971_v34  ;;  %v3577_v29 = vsel %vm3574_vm2, %v7218_v20, %v3922_v59 }
 0x177   : > { %v3655_v2 = vsel %vm3584_vm3, %v3646_v1, %v3932_v39  ;;  %v3587_v36 = vsel %vm3584_vm3, %v3577_v29, %v3942_v53  ;;  %v3665_v55 = vsel %vm3594_vm4, %v3656_v63, %v3953_v4  ;;  %v3978_v47 = vunpack.i.h.bf16 %v6630_v35 }
 0x178   : > { %v3986_v24 = vpop.permute.xlu1 %3985  ;;  %v3664_v14 = vsel %vm3594_vm4, %v3655_v2, %v3952_v25  ;;  %v3674_v31 = vsel %vm3604_vm5, %v3665_v55, %v3973_v43  ;;  %v3977_v16 = vunpack.i.l.bf16 %v6630_v35  ;;  %v3597_v45 = vsel %vm3594_vm4, %v3587_v36, %v3962_v15  ;;  %v7219_v15 = vld [vmem:[#allocation51_spill] sm:$0xff] }
 0x179   : > { %v6651_v0 = vpop.permute.xlu0 %3980  ;;  %v3988_v17 = vunpack.i.h.bf16 %v3986_v24  ;;  %v3987_v30 = vunpack.i.l.bf16 %v3986_v24  ;;  %v3673_v26 = vsel %vm3604_vm5, %v3664_v14, %v3972_v12  ;;  %v3598_v35 = vsel %vm3594_vm4, %v3588_v50, %v3963_v49 }
 0x17a   : > { %v3607_v54 = vsel %vm3604_vm5, %v3597_v45, %v3977_v16  ;;  %v7222_v16 = vld [vmem:[#allocation23_spill] sm:$0xff] }
 0x17b   : > { %v3682_v19 = vsel %vm3614_vm6, %v3673_v26, %v3987_v30  ;;  %v3683_v24 = vsel %vm3614_vm6, %v3674_v31, %v3988_v17  ;;  %v3983_v17 = vunpack.i.h.bf16 %v6651_v0  ;;  %v3982_v30 = vunpack.i.l.bf16 %v6651_v0  ;;  %v7220_v26 = vld [vmem:[#allocation30_spill] sm:$0xff] }
 0x17c   : > { %v6632_v10 = vpop.permute.xlu1 %3995  ;;  %v7221_v31 = vcombine.low %v7219_v15, %v7220_v26 }
 0x17d   : > { %v3998_v48 = vunpack.i.h.bf16 %v6632_v10  ;;  %v3997_v28 = vunpack.i.l.bf16 %v6632_v10  ;;  %v3608_v10 = vsel %vm3604_vm5, %v3598_v35, %v3978_v47 }
 0x17e   : > { %v3649_v47 = vsel %vm3574_vm2, %v7221_v31, %v3983_v17 }
 0x17f   : > { %v3617_v53 = vsel %vm3614_vm6, %v3607_v54, %v3997_v28  ;;  %v3618_v4 = vsel %vm3614_vm6, %v3608_v10, %v3998_v48 }
 0x180   : > { %v4006_v5 = vpop.permute.xlu1 %4005 }
 0x181   : > { %v4008_v6 = vunpack.i.h.bf16 %v4006_v5  ;;  %v4007_v51 = vunpack.i.l.bf16 %v4006_v5 }
 0x183   : > { %v3691_v23 = vsel %vm3624_vm7, %v3682_v19, %v4007_v51  ;;  %v3692_v8 = vsel %vm3624_vm7, %v3683_v24, %v4008_v6  ;;  %v7223_v19 = vld [vmem:[#allocation19_spill] sm:$0xff] }
 0x184   : > { %v4016_v18 = vpop.permute.xlu1 %4015  ;;  %v7224_v0 = vcombine.low %v7222_v16, %v7223_v19 }
 0x185   : > { %v4018_v57 = vunpack.i.h.bf16 %v4016_v18  ;;  %v4017_v59 = vunpack.i.l.bf16 %v4016_v18 }
 0x186   : > { %v3648_v24 = vsel %vm3574_vm2, %v7224_v0, %v3982_v30 }
 0x187   : > { %v6666_v38 = vpop.permute.xlu0 %3990  ;;  %v3627_v13 = vsel %vm3624_vm7, %v3617_v53, %v4017_v59  ;;  %v3628_v21 = vsel %vm3624_vm7, %v3618_v4, %v4018_v57  ;;  %v7225_v57 = vld [vmem:[#allocation55_spill] sm:$0xff]  ;;  %v7226_v59 = vld [vmem:[#allocation68_spill] sm:$0xff] }
 0x188   : > { %v4026_v34 = vpop.permute.xlu1 %4025  ;;  %v3993_v14 = vunpack.i.h.bf16 %v6666_v38  ;;  %v3992_v55 = vunpack.i.l.bf16 %v6666_v38  ;;  %v7227_v45 = vcombine.low %v7225_v57, %v7226_v59 }
 0x189   : > { %v4028_v22 = vunpack.i.h.bf16 %v4026_v34  ;;  %v4027_v40 = vunpack.i.l.bf16 %v4026_v34 }
 0x18a   : > { %v3580_v35 = vsel %vm3574_vm2, %v7227_v45, %v3993_v14 }
 0x18b   : > { %v4001_v7 = vpop.permute.xlu0 %4000  ;;  %v3700_v52 = vsel %vm3634_vm8, %v3691_v23, %v4027_v40  ;;  %v3701_v5 = vsel %vm3634_vm8, %v3692_v8, %v4028_v22 }
 0x18c   : > { %v4036_v39 = vpop.permute.xlu1 %4035  ;;  %v3710_v11 = vpack.c.bf16 %v3701_v5, %v3700_v52  ;;  %v4003_v18 = vunpack.i.h.bf16 %v4001_v7  ;;  %v4002_v63 = vunpack.i.l.bf16 %v4001_v7  ;;  %v7228_v7 = vld [vmem:[#allocation58_spill] sm:$0xff]  ;;  %v7229_v52 = vld [vmem:[#allocation45_spill] sm:$0xff] }
 0x18d   : > { %v4038_v25 = vunpack.i.h.bf16 %v4036_v39  ;;  %v4037_v46 = vunpack.i.l.bf16 %v4036_v39  ;;  %v7230_v5 = vcombine.low %v7228_v7, %v7229_v52 }
 0x18e   : > { %3737 = vmatprep.subr.bf16.mxu0 %v3710_v11  ;;  %v3657_v28 = vsel %vm3584_vm3, %v3648_v24, %v4002_v63  ;;  %v3658_v22 = vsel %vm3584_vm3, %v3649_v47, %v4003_v18 }
 0x18f   : > { %v4011_v61 = vpop.permute.xlu0 %4010  ;;  %v3637_v1 = vsel %vm3634_vm8, %v3627_v13, %v4037_v46  ;;  %v3638_v43 = vsel %vm3634_vm8, %v3628_v21, %v4038_v25  ;;  %v3579_v54 = vsel %vm3574_vm2, %v7230_v5, %v3992_v55  ;;  %v1566_v5 = vcombine.low %v6086_v56, %v6092_v41 }
 0x190   : > { %v3709_v3 = vpack.c.bf16 %v3638_v43, %v3637_v1  ;;  %v4013_v34 = vunpack.i.h.bf16 %v4011_v61  ;;  %v4012_v48 = vunpack.i.l.bf16 %v4011_v61 }
 0x191   : > { %v4046_v12 = vpop.permute.xlu1 %4045 }
 0x192   : > { %3738 = vmatpush1.bf16.msra.mxu0 %v3709_v3  ;;  %v3589_v53 = vsel %vm3584_vm3, %v3579_v54, %v4012_v48  ;;  %v3590_v4 = vsel %vm3584_vm3, %v3580_v35, %v4013_v34  ;;  %v4048_v43 = vunpack.i.h.bf16 %v4046_v12  ;;  %v4047_v3 = vunpack.i.l.bf16 %v4046_v12 }
 0x193   : > { %v4021_v27 = vpop.permute.xlu0 %4020  ;;  %v2790_v35 = vcombine.low %v5970_v32, %v5976_v33 }
 0x194   : > { %v4023_v2 = vunpack.i.h.bf16 %v4021_v27  ;;  %v4022_v36 = vunpack.i.l.bf16 %v4021_v27 }
 0x195   : > { %v4056_v20 = vpop.permute.xlu1 %4055 }
 0x196   : > { %v3666_v23 = vsel %vm3594_vm4, %v3657_v28, %v4022_v36  ;;  %v3667_v8 = vsel %vm3594_vm4, %v3658_v22, %v4023_v2  ;;  %v4058_v25 = vunpack.i.h.bf16 %v4056_v20  ;;  %v4057_v46 = vunpack.i.l.bf16 %v4056_v20 }
 0x198   : > { %v4031_v29 = vpop.permute.xlu0 %4030 }
 0x199   : > { %v4066_v44 = vpop.permute.xlu1 %4065  ;;  %v4033_v38 = vunpack.i.h.bf16 %v4031_v29  ;;  %v4032_v40 = vunpack.i.l.bf16 %v4031_v29 }
 0x19a   : > { %v4068_v17 = vunpack.i.h.bf16 %v4066_v44  ;;  %v4067_v30 = vunpack.i.l.bf16 %v4066_v44 }
 0x19b   : > { %v3599_v13 = vsel %vm3594_vm4, %v3589_v53, %v4032_v40  ;;  %v3600_v21 = vsel %vm3594_vm4, %v3590_v4, %v4033_v38 }
 0x19c   : > { %v4041_v50 = vpop.permute.xlu0 %4040  ;;  %v3609_v2 = vsel %vm3604_vm5, %v3599_v13, %v4047_v3  ;;  %v3610_v20 = vsel %vm3604_vm5, %v3600_v21, %v4048_v43  ;;  %v7231_v13 = vld [vmem:[#allocation57_spill] sm:$0xff]  ;;  %v7232_v21 = vld [vmem:[#allocation36_spill] sm:$0xff]  ;;  %v7234_v3 = vld [vmem:[#allocation38_spill] sm:$0xff] }
 0x19d   : > { %v4043_v6 = vunpack.i.h.bf16 %v4041_v50  ;;  %v4042_v51 = vunpack.i.l.bf16 %v4041_v50  ;;  %v4076_v49 = vpop.permute.xlu1 %4075  ;;  %v3619_v31 = vsel %vm3614_vm6, %v3609_v2, %v4067_v30  ;;  %v3620_v47 = vsel %vm3614_vm6, %v3610_v20, %v4068_v17 }
 0x19e   : > { %v4078_v61 = vunpack.i.h.bf16 %v4076_v49  ;;  %v4077_v1 = vunpack.i.l.bf16 %v4076_v49 }
 0x19f   : > { %v3675_v10 = vsel %vm3604_vm5, %v3666_v23, %v4042_v51  ;;  %v3676_v39 = vsel %vm3604_vm5, %v3667_v8, %v4043_v6 }
 0x1a0   : > { %v3684_v27 = vsel %vm3614_vm6, %v3675_v10, %v4057_v46  ;;  %v3685_v29 = vsel %vm3614_vm6, %v3676_v39, %v4058_v25  ;;  %v4051_v18 = vpop.permute.xlu0 %4050 }
 0x1a1   : > { %v4086_v11 = vpop.permute.xlu1 %4085  ;;  %v3693_v14 = vsel %vm3624_vm7, %v3684_v27, %v4077_v1  ;;  %v3694_v55 = vsel %vm3624_vm7, %v3685_v29, %v4078_v61  ;;  %v4053_v7 = vunpack.i.h.bf16 %v4051_v18  ;;  %v4052_v52 = vunpack.i.l.bf16 %v4051_v18  ;;  %v7235_v27 = vld [vmem:[#allocation52_spill] sm:$0xff] }
 0x1a2   : > { %v4088_v6 = vunpack.i.h.bf16 %v4086_v11  ;;  %v4087_v12 = vunpack.i.l.bf16 %v4086_v11  ;;  %v7233_v61 = vcombine.low %v7231_v13, %v7232_v21  ;;  %v7236_v56 = vcombine.low %v7234_v3, %v7235_v27 }
 0x1a3   : > { %v3650_v32 = vsel %vm3574_vm2, %v2790_v35, %v4052_v52 }
 0x1a4   : > { %v3629_v0 = vsel %vm3624_vm7, %v3619_v31, %v4087_v12  ;;  %v3630_v24 = vsel %vm3624_vm7, %v3620_v47, %v4088_v6  ;;  %v3651_v1 = vsel %vm3574_vm2, %v7233_v61, %v4053_v7 }
 0x1a5   : > { %v4096_v63 = vpop.permute.xlu1 %4095 }
 0x1a6   : > { %v4098_v36 = vunpack.i.h.bf16 %v4096_v63  ;;  %v4097_v50 = vunpack.i.l.bf16 %v4096_v63 }
 0x1a8   : > { %v3702_v51 = vsel %vm3634_vm8, %v3693_v14, %v4097_v50  ;;  %v3703_v49 = vsel %vm3634_vm8, %v3694_v55, %v4098_v36  ;;  %v4061_v15 = vpop.permute.xlu0 %4060 }
 0x1a9   : > { %v4106_v44 = vpop.permute.xlu1 %4105  ;;  %v3712_v26 = vpack.c.bf16 %v3703_v49, %v3702_v51  ;;  %v4063_v54 = vunpack.i.h.bf16 %v4061_v15  ;;  %v4062_v10 = vunpack.i.l.bf16 %v4061_v15 }
 0x1aa   : > { %v4108_v16 = vunpack.i.h.bf16 %v4106_v44  ;;  %v4107_v19 = vunpack.i.l.bf16 %v4106_v44 }
 0x1ab   : > { %3739 = vmatprep.subr.bf16.mxu0 %v3712_v26  ;;  %v3582_v41 = vsel %vm3574_vm2, %v7236_v56, %v4063_v54  ;;  %v3581_v29 = vsel %vm3574_vm2, %v1566_v5, %v4062_v10 }
 0x1ac   : > { %v3639_v34 = vsel %vm3634_vm8, %v3629_v0, %v4107_v19  ;;  %v3640_v48 = vsel %vm3634_vm8, %v3630_v24, %v4108_v16  ;;  %v4071_v28 = vpop.permute.xlu0 %4070 }
 0x1ad   : > { %v3711_v22 = vpack.c.bf16 %v3640_v48, %v3639_v34  ;;  %v4073_v11 = vunpack.i.h.bf16 %v4071_v28  ;;  %v4072_v53 = vunpack.i.l.bf16 %v4071_v28 }
 0x1af   : > { %3740 = vmatpush1.bf16.msra.mxu0 %v3711_v22  ;;  %v3659_v63 = vsel %vm3584_vm3, %v3650_v32, %v4072_v53  ;;  %v3660_v2 = vsel %vm3584_vm3, %v3651_v1, %v4073_v11 }
 0x1b0   : > { %v4081_v38 = vpop.permute.xlu0 %4080 }
 0x1b1   : > { %v4083_v25 = vunpack.i.h.bf16 %v4081_v38  ;;  %v4082_v46 = vunpack.i.l.bf16 %v4081_v38 }
 0x1b3   : > { %v3591_v14 = vsel %vm3584_vm3, %v3581_v29, %v4082_v46  ;;  %v3592_v55 = vsel %vm3584_vm3, %v3582_v41, %v4083_v25 }
 0x1b4   : > { %v4091_v40 = vpop.permute.xlu0 %4090 }
 0x1b5   : > { %v4093_v33 = vunpack.i.h.bf16 %v4091_v40  ;;  %v4092_v43 = vunpack.i.l.bf16 %v4091_v40 }
 0x1b7   : > { %v3668_v51 = vsel %vm3594_vm4, %v3659_v63, %v4092_v43  ;;  %v3669_v49 = vsel %vm3594_vm4, %v3660_v2, %v4093_v33 }
 0x1b8   : > { %v4101_v23 = vpop.permute.xlu0 %4100 }
 0x1b9   : > { %v4103_v17 = vunpack.i.h.bf16 %v4101_v23  ;;  %v4102_v30 = vunpack.i.l.bf16 %v4101_v23 }
 0x1bb   : > { %v3601_v26 = vsel %vm3594_vm4, %v3591_v14, %v4102_v30  ;;  %v3602_v31 = vsel %vm3594_vm4, %v3592_v55, %v4103_v17 }
 0x1bc   : > { %v4111_v8 = vpop.permute.xlu0 %4110 }
 0x1bd   : > { %v4113_v20 = vunpack.i.h.bf16 %v4111_v8  ;;  %v4112_v36 = vunpack.i.l.bf16 %v4111_v8 }
 0x1bf   : > { %v3677_v0 = vsel %vm3604_vm5, %v3668_v51, %v4112_v36  ;;  %v3678_v24 = vsel %vm3604_vm5, %v3669_v49, %v4113_v20 }
 0x1c0   : > { %v4121_v57 = vpop.permute.xlu0 %4120 }
 0x1c1   : > { %v4123_v6 = vunpack.i.h.bf16 %v4121_v57  ;;  %v4122_v12 = vunpack.i.l.bf16 %v4121_v57 }
 0x1c3   : > { %v3611_v22 = vsel %vm3604_vm5, %v3601_v26, %v4122_v12  ;;  %v3612_v38 = vsel %vm3604_vm5, %v3602_v31, %v4123_v6 }
 0x1c9   : > { %v4116_v59 = vpop.permute.xlu1 %4115 }
 0x1ca   : > { %v6732_v45 = vpop.permute.xlu0 %4130  ;;  %v4118_v47 = vunpack.i.h.bf16 %v4116_v59  ;;  %v4117_v16 = vunpack.i.l.bf16 %v4116_v59 }
 0x1cb   : > { %v4133_v8 = vunpack.i.h.bf16 %v6732_v45  ;;  %v4132_v57 = vunpack.i.l.bf16 %v6732_v45 }
 0x1cc   : > { %v3652_v7 = vsel %vm3574_vm2, %v3062_v9, %v4118_v47  ;;  %v3583_v52 = vsel %vm3574_vm2, %v1838_v60, %v4117_v16 }
 0x1cd   : > { %v4126_v39 = vpop.permute.xlu1 %4125  ;;  %v3661_v42 = vsel %vm3584_vm3, %v3652_v7, %v4133_v8  ;;  %v3593_v46 = vsel %vm3584_vm3, %v3583_v52, %v4132_v57 }
 0x1ce   : > { %v4141_v4 = vpop.permute.xlu0 %4140  ;;  %v4128_v15 = vunpack.i.h.bf16 %v4126_v39  ;;  %v4127_v44 = vunpack.i.l.bf16 %v4126_v39 }
 0x1cf   : > { %v4143_v40 = vunpack.i.h.bf16 %v4141_v4  ;;  %v4142_v23 = vunpack.i.l.bf16 %v4141_v4 }
 0x1d0   : > { %v3686_v59 = vsel %vm3614_vm6, %v3677_v0, %v4127_v44  ;;  %v3687_v35 = vsel %vm3614_vm6, %v3678_v24, %v4128_v15 }
 0x1d1   : > { %v4136_v18 = vpop.permute.xlu1 %4135  ;;  %v3695_v25 = vsel %vm3624_vm7, %v3686_v59, %v4142_v23  ;;  %v3696_v37 = vsel %vm3624_vm7, %v3687_v35, %v4143_v40 }
 0x1d2   : > { %v4151_v50 = vpop.permute.xlu0 %4150  ;;  %v4138_v34 = vunpack.i.h.bf16 %v4136_v18  ;;  %v4137_v48 = vunpack.i.l.bf16 %v4136_v18 }
 0x1d3   : > { %v4153_v5 = vunpack.i.h.bf16 %v4151_v50  ;;  %v4152_v54 = vunpack.i.l.bf16 %v4151_v50 }
 0x1d4   : > { %v3621_v39 = vsel %vm3614_vm6, %v3611_v22, %v4137_v48  ;;  %v3622_v45 = vsel %vm3614_vm6, %v3612_v38, %v4138_v34 }
 0x1d5   : > { %v4146_v19 = vpop.permute.xlu1 %4145  ;;  %v3631_v13 = vsel %vm3624_vm7, %v3621_v39, %v4152_v54  ;;  %v3632_v21 = vsel %vm3624_vm7, %v3622_v45, %v4153_v5 }
 0x1d6   : > { %v4161_v28 = vpop.permute.xlu0 %4160  ;;  %v4148_v58 = vunpack.i.h.bf16 %v4146_v19  ;;  %v4147_v9 = vunpack.i.l.bf16 %v4146_v19  ;;  %v3717_v19 = vld [vmem:[%s6805_s1] sm:$0xf] }
 0x1d7   : > { %v4163_v32 = vunpack.i.h.bf16 %v4161_v28  ;;  %v4162_v33 = vunpack.i.l.bf16 %v4161_v28 }
 0x1d8   : > { %v3603_v27 = vsel %vm3594_vm4, %v3593_v46, %v4147_v9  ;;  %v3670_v56 = vsel %vm3594_vm4, %v3661_v42, %v4148_v58 }
 0x1d9   : > { %v4156_v10 = vpop.permute.xlu1 %4155  ;;  %v3613_v20 = vsel %vm3604_vm5, %v3603_v27, %v4162_v33  ;;  %v3679_v36 = vsel %vm3604_vm5, %v3670_v56, %v4163_v32 }
 0x1da   : > { %v4158_v11 = vunpack.i.h.bf16 %v4156_v10  ;;  %v4157_v53 = vunpack.i.l.bf16 %v4156_v10 }
 0x1db   : > { %v4171_v4 = vpop.permute.xlu0 %4170 }
 0x1dc   : > { %v3704_v62 = vsel %vm3634_vm8, %v3695_v25, %v4157_v53  ;;  %v3705_v60 = vsel %vm3634_vm8, %v3696_v37, %v4158_v11  ;;  %v4173_v41 = vunpack.i.h.bf16 %v4171_v4  ;;  %v4172_v29 = vunpack.i.l.bf16 %v4171_v4 }
 0x1dd   : > { %v4166_v61 = vpop.permute.xlu1 %4165  ;;  %v3714_v1 = vpack.c.bf16 %v3705_v60, %v3704_v62 }
 0x1de   : > { %v4168_v43 = vunpack.i.h.bf16 %v4166_v61  ;;  %v4167_v3 = vunpack.i.l.bf16 %v4166_v61  ;;  %v3623_v55 = vsel %vm3614_vm6, %v3613_v20, %v4172_v29  ;;  %v3688_v6 = vsel %vm3614_vm6, %v3679_v36, %v4173_v41 }
 0x1df   : > { %3741 = vmatprep.subr.bf16.mxu0 %v3714_v1 }
 0x1e0   : > { %v4181_v17 = vpop.permute.xlu0 %4180  ;;  %v3641_v30 = vsel %vm3634_vm8, %v3631_v13, %v4167_v3  ;;  %v3642_v18 = vsel %vm3634_vm8, %v3632_v21, %v4168_v43 }
 0x1e1   : > { %v3713_v2 = vpack.c.bf16 %v3642_v18, %v3641_v30  ;;  %v4183_v12 = vunpack.i.h.bf16 %v4181_v17  ;;  %v4182_v51 = vunpack.i.l.bf16 %v4181_v17 }
 0x1e2   : > { %v4176_v63 = vpop.permute.xlu1 %4175 }
 0x1e3   : > { %v4178_v50 = vunpack.i.h.bf16 %v4176_v63  ;;  %v4177_v14 = vunpack.i.l.bf16 %v4176_v63  ;;  %3742 = vmatpush1.bf16.msra.mxu0 %v3713_v2 }
 0x1e5   : > { %v3697_v49 = vsel %vm3624_vm7, %v3688_v6, %v4178_v50  ;;  %v3633_v15 = vsel %vm3624_vm7, %v3623_v55, %v4177_v14 }
 0x1e6   : > { %v3706_v44 = vsel %vm3634_vm8, %v3697_v49, %v4183_v12  ;;  %v3643_v26 = vsel %vm3634_vm8, %v3633_v15, %v4182_v51 }
 0x1e7   : > { %v3716_v31 = vpack.c.bf16 %v3706_v44, %v3706_v44  ;;  %v3715_v47 = vpack.c.bf16 %v3643_v26, %v3643_v26 }
 0x1e9   : > { %3843 = vmatprep.subr.msk.bf16.mxu0 %vm3728_vm9, %v3716_v31  ;;  %v3730_v16 = vsel %vm3728_vm9, %v3715_v47, 0 }
 0x1ea   : > { %3744 = vmatpush1.bf16.msra.mxu0 %v3730_v16 }
 0x1ed   : > { %3844 = vmatmul.mubr.msk.bf16.vlgmr.msra.gmra.mrb[0].mxu0 %vm3724_vm10, %v3717_v19 }
 0x1f3   : > { %v3722_v0 = vpop.permute.xlu1 %3721 }
 0x2c0   : > { %v3769_v24 = vpop.f32.mrb[0].mxu0 }
 0x2c1   : > { %v3770_v34 = vadd.f32 %v3769_v24, %v3722_v0  ;;  %v3771_v48 = vpop.f32.mrb[1].mxu0 }
 0x2c2   : > { %v3772_v28 = vadd.f32 %v3771_v48, %v3722_v0  ;;  %v3773_v22 = vpop.f32.mrb[2].mxu0 }
 0x2c3   : > { %v3776_v38 = vmax.f32 %v3770_v34, 0.0  ;;  %v3774_v40 = vpop.f32.mrb[3].mxu0 }
 0x2c4   : > { %v3777_v23 = vmax.f32 %v3772_v28, 0.0 }
 0x2c5   : > { %3778 = vst [vmem:[%s170_s7] sm:$0xff] %v3776_v38 }
 0x2c6   : > { %3779 = vst [vmem:[%s170_s7 + $0x8] sm:$0xff] %v3777_v23 }
 0x2c7 PF: > { %s13_s12 = sadd.s32 1, %s4208_s12  }
 0x2c8   : > { %p10_p4 = scmp.ge.s32.totalorder %s13_s12, 6  }
 0x2ca   :  { %12 = sbr.rel (!%p10_p4) target bundleno = 1 (0x1), region = 62 }

// kernel: a_call__.11
= control target key start
LH: loop header
LB: loop body
LE: loop exit
PB: predicated region body
PF: predicated region fallthrough
CT: control target
= control target key end

     0   :  { %vm19_vm0 = vcmask 523264   ;;  %v331_v3 = vmov 0.0   ;;  %vm332_vm1 = vmmov 0   ;;  %s401_s0 = inlined_call_operand.vmem [shape: f32[2,16,64], index: 0, kind: input, shape index: {}]   ;;  %s402_s1 = inlined_call_operand.vmem [shape: f32[2,16,64], index: 1, kind: input, shape index: {}]   ;;  %s403_s2 = inlined_call_operand.hbm [shape: f32[1,1], index: 2, kind: output, shape index: {}]  }
   0x1   :  { %v13_v0 = vld [vmem:[%s401_s0] sm:$0xff]  ;;  %v14_v1 = vld [vmem:[%s401_s0 + $0x8] sm:$0xff]  ;;  %276 = vmatprep.subr.bf16.mxu0 %v331_v3  ;;  %282 = vmatprep.subr.bf16.mxu1 %v331_v3  ;;  %v262_v7 = vld [vmem:[%s401_s0 + $0x10] sm:$0xff] }
   0x2   :  { %v16_v2 = vld [vmem:[%s402_s1] sm:$0xff]  ;;  %v15_v4 = vpack.c.bf16 %v14_v1, %v13_v0  ;;  %v17_v5 = vld [vmem:[%s402_s1 + $0x8] sm:$0xff]  ;;  %278 = vmatprep.mubr.msk.bf16.mxu0 %vm332_vm1, %v331_v3  ;;  %284 = vmatprep.mubr.msk.bf16.mxu1 %vm332_vm1, %v331_v3  ;;  %v263_v8 = vld [vmem:[%s401_s0 + $0x18] sm:$0xff] }
   0x3   :  { %v18_v6 = vpack.c.bf16 %v17_v5, %v16_v2 }
   0x4   :  { %7 = vsyncpa [#allocation3], 0  ;;  %v21_v9 = vsel %vm19_vm0, %v15_v4, 0  ;;  %v264_v10 = vld [vmem:[%s402_s1 + $0x10] sm:$0xff]  ;;  %v265_v11 = vld [vmem:[%s402_s1 + $0x18] sm:$0xff]  ;;  %v131_v13 = vpack.c.bf16 %v263_v8, %v262_v7  ;;  %vm114_vm2 = vcmask 130048  }
   0x5   :  { %277 = vmatpush3.bf16.xpose.msra.mxu0 %v21_v9  ;;  %v65_v12 = vsel %vm19_vm0, %v18_v6, 0  ;;  %v135_v14 = vpack.c.bf16 %v265_v11, %v264_v10  ;;  %s333_s1 = smov [#allocation2]   ;;  %vm244_vm3 = vcmask 0  }
   0x6   :  { %283 = vmatpush3.bf16.xpose.msra.mxu1 %v65_v12  ;;  %288 = vmatprep.subr.bf16.mxu0 %v331_v3  ;;  %v137_v15 = vsel %vm19_vm0, %v131_v13, 0  ;;  %s252_s25 = sshll.u32 %s333_s1, 4  ;;  %s253_s25 = int_to_ptr.vmem [resolvable:$true] %s252_s25 }
   0x7   :  { %294 = vmatprep.subr.bf16.mxu1 %v331_v3  ;;  %v181_v16 = vsel %vm19_vm0, %v135_v14, 0  ;;  %s307_s28 = scalar_lea.vmem %s253_s25, 16  ;;  %s311_s29 = scalar_lea.vmem %s253_s25, 32 }
   0x8   :  { %p308_p0 = scmp.ne.s32.totalorder %s253_s25, %s307_s28  ;;  %p312_p1 = scmp.lt.s32.totalorder %s253_s25, %s253_s25 }
   0x9   :  { %p313_p2 = scmp.lt.s32.totalorder %s311_s29, %s307_s28 }
   0xb   :  { %p314_p3 = por %p313_p2, %p312_p1 }
   0xc   :  { %279 = vmatmul.mubr.msk.bf16.vlgmr.msra.gmra.mrb[0].mxu0 %vm19_vm0, %v15_v4 }
   0xd   :  { %285 = vmatmul.mubr.msk.bf16.vlgmr.msra.gmra.mrb[0].mxu1 %vm19_vm0, %v18_v6  ;;  %289 = vmatpush3.bf16.xpose.msra.mxu0 %v137_v15  ;;  %p315_p4 = pnand %p314_p3, %p308_p0 }
   0xe   :  { %295 = vmatpush3.bf16.xpose.msra.mxu1 %v181_v16  ;;  %290 = vmatprep.mubr.msk.bf16.mxu0 %vm332_vm1, %v331_v3 }
   0xf   :  { %296 = vmatprep.mubr.msk.bf16.mxu1 %vm332_vm1, %v331_v3 }
  0x14   :  { %291 = vmatmul.mubr.msk.bf16.vlgmr.msra.gmra.mrb[4].mxu0 %vm19_vm0, %v131_v13 }
  0x15   :  { %297 = vmatmul.mubr.msk.bf16.vlgmr.msra.gmra.mrb[4].mxu1 %vm19_vm0, %v135_v14 }
  0xdf   :  { %v57_v17 = vpop.f32.mrb[0].mxu0 }
  0xe0   :  { %v101_v18 = vpop.f32.mrb[0].mxu1  ;;  %v280_v19 = vpop.f32.mrb[1].mxu0 }
  0xe1   :  { %v108_v20 = vsub.f32 %v57_v17, %v101_v18  ;;  %v286_v21 = vpop.f32.mrb[1].mxu1  ;;  %v60_v22 = vpop.f32.mrb[2].mxu0 }
  0xe2   :  { %v104_v23 = vpop.f32.mrb[2].mxu1  ;;  %v281_v24 = vpop.f32.mrb[3].mxu0 }
  0xe3   :  { %v110_v25 = vmul.f32 0.0009765625, %v108_v20  ;;  %v109_v26 = vsub.f32 %v60_v22, %v104_v23  ;;  %v287_v27 = vpop.f32.mrb[3].mxu1 }
  0xe5   :  { %v112_v28 = vmul.f32 %v110_v25, %v110_v25  ;;  %v111_v29 = vmul.f32 0.0009765625, %v109_v26 }
  0xe7   :  { %v113_v30 = vmul.f32 %v111_v29, %v111_v29  ;;  %v173_v31 = vpop.f32.mrb[4].mxu0  ;;  %v115_v37 = vsel %vm114_vm2, %v112_v28, 0.0 }
  0xe8   :  { %v217_v32 = vpop.f32.mrb[4].mxu1  ;;  %v292_v33 = vpop.f32.mrb[5].mxu0 }
  0xe9   :  { %v224_v34 = vsub.f32 %v173_v31, %v217_v32  ;;  %v298_v35 = vpop.f32.mrb[5].mxu1  ;;  %v176_v36 = vpop.f32.mrb[6].mxu0  ;;  %v116_v38 = vsel %vm114_vm2, %v113_v30, 0.0 }
  0xea   :  { %v220_v39 = vpop.f32.mrb[6].mxu1  ;;  %v293_v40 = vpop.f32.mrb[7].mxu0  ;;  %v117_v41 = vadd.f32 %v116_v38, %v115_v37 }
  0xeb   :  { %v226_v42 = vmul.f32 0.0009765625, %v224_v34  ;;  %v225_v43 = vsub.f32 %v176_v36, %v220_v39  ;;  %v299_v44 = vpop.f32.mrb[7].mxu1 }
  0xec   :  { %118 = vadd.xlane.f32.xlu0 %v117_v41 }
  0xed   :  { %v228_v45 = vmul.f32 %v226_v42, %v226_v42  ;;  %v227_v46 = vmul.f32 0.0009765625, %v225_v43 }
  0xef   :  { %v229_v47 = vmul.f32 %v227_v46, %v227_v46  ;;  %v230_v48 = vsel %vm114_vm2, %v228_v45, 0.0 }
  0xf1   :  { %v231_v49 = vsel %vm114_vm2, %v229_v47, 0.0 }
  0xf2   :  { %v232_v50 = vadd.f32 %v231_v49, %v230_v48 }
  0xf4   :  { %233 = vadd.xlane.f32.xlu0 %v232_v50 }
 0x179   :  { %v119_v51 = vpop.xlane.xlu0 %118 }
 0x17a   :  { %v120_v52 = vrot.slane %v119_v51, 4 }
 0x17c   :  { %v121_v53 = vadd.f32 %v120_v52, %v119_v51 }
 0x17e   :  { %v122_v54 = vrot.slane %v121_v53, 2 }
 0x180   :  { %v123_v55 = vadd.f32 %v122_v54, %v121_v53 }
 0x181   :  { %v234_v56 = vpop.xlane.xlu0 %233 }
 0x182   :  { %v235_v57 = vrot.slane %v234_v56, 4  ;;  %v124_v58 = vrot.slane %v123_v55, 1 }
 0x184   :  { %v236_v59 = vadd.f32 %v235_v57, %v234_v56  ;;  %v125_v60 = vadd.f32 %v124_v58, %v123_v55 }
 0x186   :  { %v237_v61 = vrot.slane %v236_v59, 2  ;;  %300 = vpush %v125_v60 }
 0x188   :  { %v238_v62 = vadd.f32 %v237_v61, %v236_v59 }
 0x18a   :  { %v239_v63 = vrot.slane %v238_v62, 1 }
 0x18c   :  { %v240_v0 = vadd.f32 %v239_v63, %v238_v62 }
 0x18e   :  { %302 = vpush %v240_v0 }
 0x1b7   :  { %s301_s0 = spop %300 }
 0x1bf   :  { %s303_s26 = spop %302 }
 0x1c0   :  { %s242_s27 = sadd.f32 %s303_s26, %s301_s0 }
 0x1c2   :  { %v243_v1 = vstv %s242_s27 }
 0x1c3   :  { %245 = vst.msk [vmem:[#allocation2] sm:$0x1] %vm244_vm3, %v243_v1 }
 0x1c4   :  { %318 = shalt.err (!%p315_p4)
}
 0x1c5   :  { %s319_s4 = scalar_lea.hbm %s403_s2, 16 }
 0x1c6   :  { %p320_p5 = scmp.ne.s32.totalorder %s403_s2, %s319_s4  ;;  %p323_p6 = scmp.lt.u32.totalorder %s319_s4, %s403_s2 }
 0x1c8   :  { %p325_p7 = pnand %p323_p6, %p320_p5 }
 0x1ca   :  { %328 = shalt.err (!%p325_p7)
}
 0x1cb   :  { %255 = dma.vmem_to_hbm [thread:$0]  %s253_s25, 16, %s403_s2, [#allocation3]  }
 0x1cc   :  { %329 = dma.done.wait [#allocation3], 16  }
 0x1cd   :  { %330 = vsyncadd [#allocation3], 4294967280 }
 0x1ce   :  { %259 = vsyncpa [#allocation3], 1 }

// kernel: a_call__.8
= control target key start
LH: loop header
LB: loop body
LE: loop exit
PB: predicated region body
PF: predicated region fallthrough
CT: control target
= control target key end

     0   :  { %s2335_s12 = smov 0   ;;  %s3300_s0 = inlined_call_operand.vmem [shape: f32[4,8,10,10], index: 0, kind: input, shape index: {}]   ;;  %s3301_s1 = inlined_call_operand.vmem [shape: bf16[16,72], index: 1, kind: input, shape index: {}]   ;;  %s3302_s2 = inlined_call_operand.vmem [shape: f32[16,1], index: 2, kind: input, shape index: {}]   ;;  %s3303_s3 = inlined_call_operand.vmem [shape: f32[4,16,64], index: 3, kind: output, shape index: {}]  }
   0x1 LB: > { %s2093_s13 = sadd.s32 4294967295, %s2299_s12   ;;  %p2097_p0 = scmp.ge.s32.totalorder %s2299_s12, 1  ;;  %s2299_s12 = sphi %s2335_s12, %s13_s12  }
   0x2   : > { %p137_p1 = scmp.lt.s32.totalorder %s2299_s12, 5 }
   0x4   : > { %p138_p2 = pnand %p2097_p0, %p137_p1 }
   0x5   : > { %p161_p3 = scmp.lt.s32.totalorder (!%p138_p2), %s2093_s13, 3  ;;  %s2301_s18 = smov (!%p138_p2), 127   ;;  %vm252_vm0 = vcmask (!%p138_p2), 1046528   ;;  %v2302_v25 = vmov (!%p138_p2), 1983009808   ;;  %v419_v27 = vlaneseq (!%p138_p2)  ;;  %vm333_vm1 = vcmask (!%p138_p2), 1045504  }
   0x6   : > { %141 = sbr.rel (%p138_p2) target bundleno = 596 (0x254), region = 32  ;;  %v417_v26 = vunpack.c.l.s4 (!%p138_p2), %v2302_v25  ;;  %v2303_v57 = vmov (!%p138_p2), 1934713408   ;;  %s2304_s19 = smov (!%p138_p2), 126   ;;  %vm2313_vm2 = vmmov (!%p138_p2), 0   ;;  %vm1890_vm3 = vcmask (!%p138_p2), 64512  }
   0x7   : > { %v420_v46 = vshrl.u32 (!%p138_p2), %v419_v27, 7  ;;  %v481_v58 = vunpack.c.l.s4 (!%p138_p2), %v2303_v57  ;;  %s2305_s20 = smov (!%p138_p2), 16   ;;  %s2306_s21 = smov (!%p138_p2), 8   ;;  %vm1900_vm4 = vcmask (!%p138_p2), 130048   ;;  %vm1910_vm5 = vcmask (!%p138_p2), 195584  }
   0x8   : > { %v418_v48 = vunpack.c.0.s8 (!%p138_p2), %v417_v26  ;;  %s2307_s22 = smov (!%p138_p2), 32   ;;  %s2308_s23 = smov (!%p138_p2), 24   ;;  %vm1920_vm6 = vcmask (!%p138_p2), 261120   ;;  %vm1930_vm7 = vcmask (!%p138_p2), 326656   ;;  %vm1940_vm8 = vcmask (!%p138_p2), 392192  }
   0x9   : > { %v482_v63 = vunpack.c.0.s8 (!%p138_p2), %v481_v58  ;;  %s2309_s24 = smov (!%p138_p2), 40   ;;  %s2311_s25 = smov (!%p138_p2), 48   ;;  %vm1950_vm9 = vcmask (!%p138_p2), 457728   ;;  %vm1988_vm10 = vcmask (!%p138_p2), 1043456   ;;  %vm1984_vm11 = vcmask (!%p138_p2), 588800  }
   0xa   : > { %v2479_v59 = vsub.s32 (!%p138_p2), %v418_v48, %v420_v46  ;;  %s2312_s26 = smov (!%p138_p2), 56   ;;  %vm2035_vm12 = vcmask (!%p138_p2), 523264  }
   0xd   : > { %s3325_s13 = smov (!%p161_p3, %s2093_s13), 3 }
   0xe   : > { %s2106_s14 = sshll.u32 %s3325_s13, 7  ;;  %s2107_s6 = sshll.u32 %s3325_s13, 4 }
   0xf   : > { %s2349_s17 = scalar_lea.vmem %s3300_s0, %s2106_s14  ;;  %s170_s9 = scalar_lea.vmem %s3303_s3, %s2107_s6 }
  0x10   : > { %v2352_v0 = vld [vmem:[%s2349_s17 + $0x20] sm:$0xff]  ;;  %v2358_v2 = vld [vmem:[%s2349_s17 + $0x30] sm:$0xff]  ;;  %v2386_v13 = vld [vmem:[%s2349_s17 + $0x18] sm:$0x3] }
  0x11   : > { %v2355_v1 = vld [vmem:[%s2349_s17] sm:$0xff]  ;;  %200 = vrot.lane.b32.xlu1 %v2352_v0, %s2301_s18  ;;  %v2365_v3 = vld [vmem:[%s2349_s17 + $0x10] sm:$0xff]  ;;  %v262_v10 = vrot.slane %v2358_v2, 1  ;;  %v259_v11 = vrot.slane %v2352_v0, 1  ;;  %v2389_v14 = vld [vmem:[%s2349_s17 + $0x8] sm:$0x3] }
  0x12   : > { %196 = vrot.lane.b32.xlu0 %v2355_v1, %s2301_s18  ;;  %v2368_v4 = vld [vmem:[%s2349_s17 + $0x50] sm:$0xff]  ;;  %v253_v5 = vrot.slane %v2355_v1, 1  ;;  %v2372_v6 = vld [vmem:[%s2349_s17 + $0x40] sm:$0xff]  ;;  %v256_v9 = vrot.slane %v2365_v3, 1  ;;  %v414_v12 = vcombine.low %v2355_v1, %v2352_v0  ;;  %v2392_v15 = vld [vmem:[%s2349_s17 + $0x38] sm:$0x3]  ;;  %v430_v16 = vcombine.low %v2365_v3, %v2358_v2 }
  0x13   : > { %v2375_v7 = vld [vmem:[%s2349_s17 + $0x70] sm:$0xff]  ;;  %v2378_v8 = vld [vmem:[%s2349_s17 + $0x60] sm:$0xff]  ;;  %v415_v19 = vcombine.high %v2355_v1, %v2352_v0  ;;  %v257_v20 = vrot.slane %v2386_v13, 1  ;;  %v254_v21 = vrot.slane %v2389_v14, 1  ;;  %v263_v22 = vrot.slane %v2392_v15, 1 }
  0x14   : > { %v446_v17 = vcombine.low %v2372_v6, %v2378_v8  ;;  %v462_v18 = vcombine.low %v2368_v4, %v2375_v7  ;;  %v2406_v23 = vld [vmem:[%s2349_s17 + $0x28] sm:$0x3]  ;;  %v268_v24 = vrot.slane %v2368_v4, 1  ;;  %v2415_v29 = vld [vmem:[%s2349_s17 + $0x58] sm:$0x3]  ;;  %v265_v31 = vrot.slane %v2372_v6, 1 }
  0x15   : > { %202 = vrot.lane.b32.xlu1 %v2358_v2, %s2301_s18  ;;  %v260_v28 = vrot.slane %v2406_v23, 1  ;;  %v2418_v30 = vld [vmem:[%s2349_s17 + $0x48] sm:$0x3]  ;;  %v2422_v32 = vsel %vm252_vm0, %v256_v9, %v257_v20  ;;  %v2425_v33 = vsel %vm252_vm0, %v262_v10, %v263_v22  ;;  %v269_v34 = vrot.slane %v2415_v29, 1  ;;  %v2429_v35 = vld [vmem:[%s2349_s17 + $0x78] sm:$0x3] }
  0x16   : > { %198 = vrot.lane.b32.xlu0 %v2365_v3, %s2301_s18  ;;  %v274_v36 = vrot.slane %v2375_v7, 1  ;;  %v2433_v37 = vsel %vm252_vm0, %v253_v5, %v254_v21  ;;  %v838_v38 = vcombine.low %v2422_v32, %v2425_v33  ;;  %v839_v39 = vcombine.high %v2422_v32, %v2425_v33  ;;  %v2443_v41 = vld [vmem:[%s2349_s17 + $0x68] sm:$0x3] }
  0x17   : > { %v2440_v40 = vsel %vm252_vm0, %v259_v11, %v260_v28  ;;  %v266_v44 = vrot.slane %v2418_v30, 1  ;;  %v275_v45 = vrot.slane %v2429_v35, 1  ;;  %v271_v47 = vrot.slane %v2378_v8, 1 }
  0x18   : > { %v822_v42 = vcombine.low %v2433_v37, %v2440_v40  ;;  %v823_v43 = vcombine.high %v2433_v37, %v2440_v40  ;;  %v2457_v49 = vsel %vm252_vm0, %v268_v24, %v269_v34  ;;  %v272_v51 = vrot.slane %v2443_v41, 1 }
  0x19   : > { %206 = vrot.lane.b32.xlu1 %v2368_v4, %s2301_s18  ;;  %v2460_v50 = vsel %vm252_vm0, %v274_v36, %v275_v45  ;;  %v2468_v54 = vsel %vm252_vm0, %v265_v31, %v266_v44  ;;  %v422_v61 = vrot.slane %v414_v12, %v2479_v59  ;;  %v438_v62 = vrot.slane %v430_v16, %v2479_v59 }
  0x1a   : > { %204 = vrot.lane.b32.xlu0 %v2372_v6, %s2301_s18  ;;  %v870_v52 = vcombine.low %v2457_v49, %v2460_v50  ;;  %v871_v53 = vcombine.high %v2457_v49, %v2460_v50  ;;  %v2471_v55 = vsel %vm252_vm0, %v271_v47, %v272_v51  ;;  %v454_v5 = vrot.slane %v446_v17, %v2479_v59 }
  0x1b   : > { %v854_v56 = vcombine.low %v2468_v54, %v2471_v55  ;;  %v855_v60 = vcombine.high %v2468_v54, %v2471_v55  ;;  %v470_v9 = vrot.slane %v462_v18, %v2479_v59  ;;  %v479_v10 = vcombine.high %v422_v61, %v438_v62 }
  0x1c   : > { %v2495_v11 = vsub.s32 %v482_v63, %v420_v46  ;;  %v478_v12 = vcombine.low %v422_v61, %v438_v62  ;;  %v846_v16 = vrot.slane %v838_v38, %v2479_v59  ;;  %v2499_v20 = vrot.slane %v839_v39, %v2479_v59 }
  0x1d   : > { %210 = vrot.lane.b32.xlu1 %v2375_v7, %s2301_s18  ;;  %v830_v21 = vrot.slane %v822_v42, %v2479_v59  ;;  %v511_v18 = vcombine.high %v454_v5, %v470_v9  ;;  %v510_v24 = vcombine.low %v454_v5, %v470_v9  ;;  %v837_v25 = vrot.slane %v823_v43, %v2479_v59 }
  0x1e   : > { %208 = vrot.lane.b32.xlu0 %v2378_v8, %s2301_s18  ;;  %v2503_v17 = vrot.slane %v479_v10, %v2495_v11  ;;  %v2506_v22 = vrot.slane %v478_v12, %v2495_v11  ;;  %v878_v26 = vrot.slane %v870_v52, %v2479_v59  ;;  %v885_v27 = vrot.slane %v871_v53, %v2479_v59 }
  0x1f   : > { %v862_v28 = vrot.slane %v854_v56, %v2479_v59  ;;  %v869_v31 = vrot.slane %v855_v60, %v2479_v59  ;;  %v2518_v34 = vrot.slane %v511_v18, %v2495_v11  ;;  %v2521_v36 = vrot.slane %v510_v24, %v2495_v11 }
  0x20   : > { %v429_v38 = vrot.slane %v415_v19, %v2479_v59  ;;  %v431_v39 = vcombine.high %v2365_v3, %v2358_v2  ;;  %v447_v42 = vcombine.high %v2372_v6, %v2378_v8  ;;  %v463_v43 = vcombine.high %v2368_v4, %v2375_v7 }
  0x21   : > { %222 = vrot.lane.b32.xlu1 %v2365_v3, %s2304_s19  ;;  %v544_v44 = vcombine.low %v2503_v17, %v2518_v34  ;;  %v543_v45 = vcombine.high %v2506_v22, %v2521_v36  ;;  %v545_v19 = vcombine.high %v2503_v17, %v2518_v34  ;;  %v886_v52 = vcombine.low %v830_v21, %v846_v16 }
  0x22   : > { %220 = vrot.lane.b32.xlu0 %v2355_v1, %s2304_s19  ;;  %v445_v47 = vrot.slane %v431_v39, %v2479_v59  ;;  %v461_v48 = vrot.slane %v447_v42, %v2479_v59  ;;  %v477_v51 = vrot.slane %v463_v43, %v2479_v59  ;;  %v918_v53 = vcombine.low %v862_v28, %v878_v26 }
  0x23   : > { %v887_v56 = vcombine.high %v830_v21, %v846_v16  ;;  %v919_v57 = vcombine.high %v862_v28, %v878_v26  ;;  %v2549_v63 = vrot.slane %v886_v52, %v2495_v11  ;;  %v903_v52 = vcombine.high %v837_v25, %v2499_v20 }
  0x24   : > { %v494_v58 = vcombine.low %v429_v38, %v445_v47  ;;  %v526_v60 = vcombine.low %v461_v48, %v477_v51  ;;  %v495_v61 = vcombine.high %v429_v38, %v445_v47  ;;  %v527_v62 = vcombine.high %v461_v48, %v477_v51 }
  0x25   : > { %226 = vrot.lane.b32.xlu1 %v2358_v2, %s2304_s19  ;;  %v2552_v5 = vrot.slane %v918_v53, %v2495_v11  ;;  %v2555_v9 = vrot.slane %v887_v56, %v2495_v11  ;;  %v2558_v10 = vrot.slane %v919_v57, %v2495_v11  ;;  %v902_v48 = vcombine.low %v837_v25, %v2499_v20 }
  0x26   : > { %224 = vrot.lane.b32.xlu0 %v2352_v0, %s2304_s19  ;;  %v2561_v12 = vrot.slane %v494_v58, %v2495_v11  ;;  %v2564_v16 = vrot.slane %v526_v60, %v2495_v11  ;;  %v2567_v21 = vrot.slane %v495_v61, %v2495_v11  ;;  %v2570_v18 = vrot.slane %v527_v62, %v2495_v11 }
  0x27   : > { %v934_v51 = vcombine.low %v869_v31, %v885_v27  ;;  %v935_v53 = vcombine.high %v869_v31, %v885_v27  ;;  %v2599_v56 = vrot.slane %v902_v48, %v2495_v11  ;;  %v2605_v58 = vrot.slane %v903_v52, %v2495_v11 }
  0x28   : > { %v546_v38 = vcombine.low %v2561_v12, %v2564_v16  ;;  %v547_v39 = vcombine.high %v2561_v12, %v2564_v16  ;;  %v337_v61 = vrot.slane %v2365_v3, 2  ;;  %v338_v62 = vrot.slane %v2386_v13, 2 }
  0x29   : > { %230 = vrot.lane.b32.xlu1 %v2368_v4, %s2304_s19  ;;  %v2602_v57 = vrot.slane %v934_v51, %v2495_v11  ;;  %v2608_v60 = vrot.slane %v935_v53, %v2495_v11  ;;  %v334_v48 = vrot.slane %v2355_v1, 2  ;;  %v335_v51 = vrot.slane %v2389_v14, 2 }
  0x2a   : > { %228 = vrot.lane.b32.xlu0 %v2372_v6, %s2304_s19  ;;  %v340_v1 = vrot.slane %v2352_v0, 2  ;;  %v341_v13 = vrot.slane %v2406_v23, 2  ;;  %v350_v14 = vrot.slane %v2415_v29, 2  ;;  %v356_v0 = vrot.slane %v2429_v35, 2 }
  0x2b   : > { %v2648_v3 = vsel %vm333_vm1, %v334_v48, %v335_v51  ;;  %v352_v23 = vrot.slane %v2378_v8, 2  ;;  %v3306_v12 = vcombine.low %v2567_v21, %v2570_v18 }
  0x2d   : > { %234 = vrot.lane.b32.xlu1 %v2375_v7, %s2304_s19 }
  0x2e   : > { %232 = vrot.lane.b32.xlu0 %v2378_v8, %s2304_s19 }
  0x31   : > { %287 = vrot.lane.b32.xlu1 %v2422_v32, %s2301_s18 }
  0x32   : > { %285 = vrot.lane.b32.xlu0 %v2433_v37, %s2301_s18 }
  0x35   : > { %291 = vrot.lane.b32.xlu1 %v2425_v33, %s2301_s18 }
  0x36   : > { %289 = vrot.lane.b32.xlu0 %v2440_v40, %s2301_s18 }
  0x39   : > { %295 = vrot.lane.b32.xlu1 %v2457_v49, %s2301_s18 }
  0x3a   : > { %293 = vrot.lane.b32.xlu0 %v2468_v54, %s2301_s18 }
  0x3d   : > { %299 = vrot.lane.b32.xlu1 %v2460_v50, %s2301_s18 }
  0x3e   : > { %297 = vrot.lane.b32.xlu0 %v2471_v55, %s2301_s18 }
  0x41   : > { %311 = vrot.lane.b32.xlu1 %v2422_v32, %s2304_s19  ;;  %v343_v32 = vrot.slane %v2358_v2, 2  ;;  %v349_v2 = vrot.slane %v2368_v4, 2 }
  0x42   : > { %309 = vrot.lane.b32.xlu0 %v2433_v37, %s2304_s19  ;;  %v2645_v37 = vsel %vm333_vm1, %v337_v61, %v338_v62 }
  0x45   : > { %315 = vrot.lane.b32.xlu1 %v2425_v33, %s2304_s19  ;;  %v344_v33 = vrot.slane %v2392_v15, 2  ;;  %v346_v15 = vrot.slane %v2372_v6, 2  ;;  %v2672_v6 = vsel %vm333_vm1, %v340_v1, %v341_v13 }
  0x46   : > { %313 = vrot.lane.b32.xlu0 %v2440_v40, %s2304_s19  ;;  %v347_v40 = vrot.slane %v2418_v30, 2 }
  0x47   : > { %v2669_v4 = vsel %vm333_vm1, %v343_v32, %v344_v33 }
  0x48   : > { %v2678_v29 = vsel %vm333_vm1, %v346_v15, %v347_v40  ;;  %v1246_v35 = vcombine.low %v2645_v37, %v2669_v4 }
  0x49   : > { %319 = vrot.lane.b32.xlu1 %v2457_v49, %s2304_s19  ;;  %v355_v49 = vrot.slane %v2375_v7, 2  ;;  %v2675_v7 = vsel %vm333_vm1, %v349_v2, %v350_v14 }
  0x4a   : > { %317 = vrot.lane.b32.xlu0 %v2468_v54, %s2304_s19  ;;  %v353_v54 = vrot.slane %v2443_v41, 2  ;;  %v1230_v41 = vcombine.low %v2648_v3, %v2672_v6  ;;  %v2699_v52 = vrot.slane %v1246_v35, %v2479_v59 }
  0x4b   : > { %v2681_v8 = vsel %vm333_vm1, %v355_v49, %v356_v0 }
  0x4c   : > { %v2684_v30 = vsel %vm333_vm1, %v352_v23, %v353_v54  ;;  %v2702_v53 = vrot.slane %v1230_v41, %v2479_v59 }
  0x4d   : > { %323 = vrot.lane.b32.xlu1 %v2460_v50, %s2304_s19  ;;  %v1278_v50 = vcombine.low %v2675_v7, %v2681_v8 }
  0x4e   : > { %321 = vrot.lane.b32.xlu0 %v2471_v55, %s2304_s19  ;;  %v1262_v55 = vcombine.low %v2678_v29, %v2684_v30  ;;  %v1294_v48 = vcombine.low %v2702_v53, %v2699_v52 }
  0x4f   : > { %v2705_v61 = vrot.slane %v1278_v50, %v2479_v59 }
  0x50   : > { %v2708_v62 = vrot.slane %v1262_v55, %v2479_v59  ;;  %v2723_v32 = vrot.slane %v1294_v48, %v2495_v11 }
  0x51   : > { %368 = vrot.lane.b32.xlu1 %v2645_v37, %s2301_s18 }
  0x52   : > { %366 = vrot.lane.b32.xlu0 %v2648_v3, %s2301_s18  ;;  %v1326_v51 = vcombine.low %v2708_v62, %v2705_v61 }
  0x54   : > { %v2726_v33 = vrot.slane %v1326_v51, %v2495_v11 }
  0x55   : > { %372 = vrot.lane.b32.xlu1 %v2669_v4, %s2301_s18 }
  0x56   : > { %370 = vrot.lane.b32.xlu0 %v2672_v6, %s2301_s18 }
  0x59   : > { %376 = vrot.lane.b32.xlu1 %v2675_v7, %s2301_s18 }
  0x5a   : > { %374 = vrot.lane.b32.xlu0 %v2678_v29, %s2301_s18 }
  0x5d   : > { %380 = vrot.lane.b32.xlu1 %v2681_v8, %s2301_s18 }
  0x5e   : > { %378 = vrot.lane.b32.xlu0 %v2684_v30, %s2301_s18 }
  0x61   : > { %392 = vrot.lane.b32.xlu1 %v2645_v37, %s2304_s19 }
  0x62   : > { %390 = vrot.lane.b32.xlu0 %v2648_v3, %s2304_s19 }
  0x65   : > { %396 = vrot.lane.b32.xlu1 %v2669_v4, %s2304_s19 }
  0x66   : > { %394 = vrot.lane.b32.xlu0 %v2672_v6, %s2304_s19 }
  0x69   : > { %400 = vrot.lane.b32.xlu1 %v2675_v7, %s2304_s19 }
  0x6a   : > { %398 = vrot.lane.b32.xlu0 %v2678_v29, %s2304_s19 }
  0x6d   : > { %404 = vrot.lane.b32.xlu1 %v2681_v8, %s2304_s19 }
  0x6e   : > { %402 = vrot.lane.b32.xlu0 %v2684_v30, %s2304_s19 }
  0x83   : > { %v201_v13 = vpop.permute.xlu1 %200 }
  0x84   : > { %v197_v2 = vpop.permute.xlu0 %196 }
  0x85   : > { %v550_v49 = vcombine.low %v197_v2, %v201_v13  ;;  %v551_v41 = vcombine.high %v197_v2, %v201_v13 }
  0x87   : > { %v203_v14 = vpop.permute.xlu1 %202  ;;  %v558_v50 = vrot.slane %v550_v49, %v2479_v59  ;;  %v565_v13 = vrot.slane %v551_v41, %v2479_v59 }
  0x88   : > { %v199_v15 = vpop.permute.xlu0 %198 }
  0x89   : > { %v566_v40 = vcombine.low %v199_v15, %v203_v14  ;;  %v567_v54 = vcombine.high %v199_v15, %v203_v14 }
  0x8b   : > { %v207_v0 = vpop.permute.xlu1 %206  ;;  %v574_v35 = vrot.slane %v566_v40, %v2479_v59  ;;  %v581_v31 = vrot.slane %v567_v54, %v2479_v59 }
  0x8c   : > { %v205_v23 = vpop.permute.xlu0 %204 }
  0x8d   : > { %v614_v27 = vcombine.low %v558_v50, %v574_v35  ;;  %v615_v2 = vcombine.high %v558_v50, %v574_v35  ;;  %v630_v54 = vcombine.low %v565_v13, %v581_v31  ;;  %v631_v43 = vcombine.high %v565_v13, %v581_v31 }
  0x8f   : > { %v211_v55 = vpop.permute.xlu1 %210  ;;  %v645_v13 = vrot.slane %v631_v43, %v2495_v11 }
  0x90   : > { %v209_v48 = vpop.permute.xlu0 %208  ;;  %v598_v51 = vcombine.low %v207_v0, %v211_v55  ;;  %v599_v1 = vcombine.high %v207_v0, %v211_v55 }
  0x91   : > { %v582_v26 = vcombine.low %v205_v23, %v209_v48  ;;  %v583_v46 = vcombine.high %v205_v23, %v209_v48  ;;  %v2759_v48 = vrot.slane %v614_v27, %v2495_v11 }
  0x92   : > { %v606_v25 = vrot.slane %v598_v51, %v2479_v59  ;;  %v613_v20 = vrot.slane %v599_v1, %v2479_v59  ;;  %v638_v51 = vrot.slane %v630_v54, %v2495_v11 }
  0x93   : > { %v590_v14 = vrot.slane %v582_v26, %v2479_v59  ;;  %v597_v15 = vrot.slane %v583_v46, %v2479_v59  ;;  %v2754_v40 = vpop.permute.xlu1 %222  ;;  %v629_v46 = vrot.slane %v615_v2, %v2495_v11 }
  0x94   : > { %v2756_v49 = vpop.permute.xlu0 %220 }
  0x95   : > { %v646_v0 = vcombine.low %v590_v14, %v606_v25  ;;  %v647_v23 = vcombine.high %v590_v14, %v606_v25  ;;  %v662_v55 = vcombine.low %v597_v15, %v613_v20 }
  0x97   : > { %v2762_v1 = vrot.slane %v646_v0, %v2495_v11  ;;  %v661_v26 = vrot.slane %v647_v23, %v2495_v11  ;;  %v670_v35 = vrot.slane %v662_v55, %v2495_v11  ;;  %v2767_v41 = vpop.permute.xlu1 %226  ;;  %v663_v0 = vcombine.high %v597_v15, %v613_v20 }
  0x98   : > { %v2769_v50 = vpop.permute.xlu0 %224  ;;  %v702_v23 = vcombine.low %v2754_v40, %v2767_v41 }
  0x99   : > { %v680_v27 = vcombine.low %v629_v46, %v661_v26  ;;  %v679_v14 = vcombine.high %v2759_v48, %v2762_v1  ;;  %v686_v2 = vcombine.low %v2756_v49, %v2769_v50  ;;  %v682_v25 = vcombine.low %v638_v51, %v670_v35 }
  0x9a   : > { %v681_v24 = vcombine.high %v629_v46, %v661_v26  ;;  %v677_v20 = vrot.slane %v663_v0, %v2495_v11  ;;  %v710_v15 = vrot.slane %v702_v23, %v2479_v59 }
  0x9b   : > { %v231_v55 = vpop.permute.xlu1 %230  ;;  %v2155_v28 = vpack.i.bf16 %v680_v27, %v544_v44  ;;  %v2150_v54 = vpack.i.bf16 %v679_v14, %v543_v45  ;;  %v694_v42 = vrot.slane %v686_v2, %v2479_v59  ;;  %v2165_v45 = vpack.i.bf16 %v682_v25, %v546_v38 }
  0x9c   : > { %v229_v47 = vpop.permute.xlu0 %228  ;;  %v2160_v31 = vpack.i.bf16 %v681_v24, %v545_v19  ;;  %v684_v25 = vcombine.low %v645_v13, %v677_v20  ;;  %v687_v2 = vcombine.high %v2756_v49, %v2769_v50 }
  0x9d   : > { %2156 = vrot.lane.b32.xlu1 %v2155_v28, %s2305_s20  ;;  %2151 = vrot.lane.b32.xlu0 %v2150_v54, %s2306_s21  ;;  %v683_v28 = vcombine.high %v638_v51, %v670_v35  ;;  %v750_v14 = vcombine.low %v694_v42, %v710_v15  ;;  %v703_v51 = vcombine.high %v2754_v40, %v2767_v41 }
  0x9e   : > { %v751_v54 = vcombine.high %v694_v42, %v710_v15  ;;  %v2185_v16 = vpack.i.bf16 %v684_v25, %v3306_v12  ;;  %v3308_v25 = vcombine.high %v2549_v63, %v2552_v5 }
  0x9f   : > { %v235_v44 = vpop.permute.xlu1 %234  ;;  %v2175_v24 = vpack.i.bf16 %v683_v28, %v547_v39  ;;  %v685_v39 = vcombine.high %v645_v13, %v677_v20  ;;  %v701_v20 = vrot.slane %v687_v2, %v2479_v59  ;;  %v3309_v2 = vcombine.low %v2555_v9, %v2558_v10 }
  0xa0   : > { %v233_v27 = vpop.permute.xlu0 %232  ;;  %v734_v26 = vcombine.low %v231_v55, %v235_v44  ;;  %v735_v23 = vcombine.high %v231_v55, %v235_v44  ;;  %v3304_v44 = vmov 0.0  }
  0xa1   : > { %v718_v46 = vcombine.low %v229_v47, %v233_v27  ;;  %2166 = vrot.lane.b32.xlu1 %v2165_v45, %s2307_s22  ;;  %2161 = vrot.lane.b32.xlu0 %v2160_v31, %s2308_s23  ;;  %v719_v17 = vcombine.high %v229_v47, %v233_v27  ;;  %v2815_v47 = vrot.slane %v750_v14, %v2495_v11 }
  0xa2   : > { %v742_v0 = vrot.slane %v734_v26, %v2479_v59  ;;  %v749_v40 = vrot.slane %v735_v23, %v2479_v59  ;;  %2114 = vmatprep.subr.bf16.mxu0 %v3304_v44  ;;  %v717_v27 = vrot.slane %v703_v51, %v2479_v59  ;;  %v765_v45 = vrot.slane %v751_v54, %v2495_v11 }
  0xa3   : > { %v726_v38 = vrot.slane %v718_v46, %v2479_v59  ;;  %v2802_v34 = vpop.permute.xlu1 %287  ;;  %v733_v41 = vrot.slane %v719_v17, %v2479_v59 }
  0xa4   : > { %v2804_v19 = vpop.permute.xlu0 %285 }
  0xa5   : > { %v782_v43 = vcombine.low %v726_v38, %v742_v0  ;;  %v783_v35 = vcombine.high %v726_v38, %v742_v0  ;;  %2176 = vrot.lane.b32.xlu1 %v2175_v24, %s2309_s24  ;;  %v798_v26 = vcombine.low %v733_v41, %v749_v40  ;;  %v3307_v0 = vcombine.high %v2567_v21, %v2570_v18 }
  0xa6   : > { %v766_v24 = vcombine.low %v701_v20, %v717_v27 }
  0xa7   : > { %v2818_v55 = vrot.slane %v782_v43, %v2495_v11  ;;  %v797_v42 = vrot.slane %v783_v35, %v2495_v11  ;;  %v2826_v49 = vpop.permute.xlu1 %291  ;;  %v2195_v38 = vpack.i.bf16 %v685_v39, %v3307_v0  ;;  %v806_v21 = vrot.slane %v798_v26, %v2495_v11 }
  0xa8   : > { %v2828_v50 = vpop.permute.xlu0 %289  ;;  %v974_v28 = vcombine.low %v2802_v34, %v2826_v49 }
  0xa9   : > { %2186 = vrot.lane.b32.xlu1 %v2185_v16, %s2311_s25  ;;  %v815_v31 = vcombine.high %v2815_v47, %v2818_v55  ;;  %v958_v13 = vcombine.low %v2804_v19, %v2828_v50  ;;  %v816_v17 = vcombine.low %v765_v45, %v797_v42  ;;  %v817_v12 = vcombine.high %v765_v45, %v797_v42 }
  0xaa   : > { %v2856_v43 = vrot.slane %v974_v28, %v2479_v59  ;;  %v799_v42 = vcombine.high %v733_v41, %v749_v40 }
  0xab   : > { %v2843_v46 = vpop.permute.xlu1 %295  ;;  %v2170_v23 = vpack.i.bf16 %v3308_v25, %v815_v31  ;;  %v2859_v35 = vrot.slane %v958_v13, %v2479_v59  ;;  %v2180_v54 = vpack.i.bf16 %v3309_v2, %v816_v17  ;;  %v774_v31 = vrot.slane %v766_v24, %v2495_v11 }
  0xac   : > { %v2845_v14 = vpop.permute.xlu0 %293  ;;  %v767_v24 = vcombine.high %v701_v20, %v717_v27  ;;  %v813_v41 = vrot.slane %v799_v42, %v2495_v11  ;;  %v1247_v42 = vcombine.high %v2645_v37, %v2669_v4  ;;  %v3313_v27 = vcombine.low %v2605_v58, %v2608_v60 }
  0xad   : > { %2196 = vrot.lane.b32.xlu1 %v2195_v38, %s2312_s26  ;;  %2171 = vrot.lane.b32.xlu0 %v2170_v23, %s2306_s21  ;;  %v1022_v28 = vcombine.low %v2859_v35, %v2856_v43  ;;  %v3310_v38 = vcombine.high %v2555_v9, %v2558_v10  ;;  %v818_v23 = vcombine.low %v774_v31, %v806_v21 }
  0xae   : > { %v3311_v9 = vcombine.low %v2599_v56, %v2602_v57  ;;  %v781_v20 = vrot.slane %v767_v24, %v2495_v11 }
  0xaf   : > { %v2862_v18 = vpop.permute.xlu1 %299  ;;  %v2190_v25 = vpack.i.bf16 %v3310_v38, %v817_v12  ;;  %v2894_v2 = vrot.slane %v1022_v28, %v2495_v11  ;;  %v819_v12 = vcombine.high %v774_v31, %v806_v21  ;;  %v3312_v21 = vcombine.high %v2599_v56, %v2602_v57 }
  0xb0   : > { %v2864_v51 = vpop.permute.xlu0 %297  ;;  %v1006_v16 = vcombine.low %v2843_v46, %v2862_v18  ;;  %v2200_v10 = vpack.i.bf16 %v3311_v9, %v818_v23  ;;  %v820_v23 = vcombine.low %v781_v20, %v813_v41  ;;  %v821_v57 = vcombine.high %v781_v20, %v813_v41 }
  0xb1   : > { %v990_v39 = vcombine.low %v2845_v14, %v2864_v51  ;;  %2181 = vrot.lane.b32.xlu0 %v2180_v54, %s2305_s20  ;;  %v2205_v31 = vpack.i.bf16 %v3312_v21, %v819_v12  ;;  %v1295_v41 = vcombine.high %v2702_v53, %v2699_v52  ;;  %v3314_v52 = vcombine.high %v2605_v58, %v2608_v60 }
  0xb2   : > { %v2878_v13 = vrot.slane %v1006_v16, %v2479_v59  ;;  %v2210_v56 = vpack.i.bf16 %v3313_v27, %v820_v23  ;;  %v1327_v58 = vcombine.high %v2708_v62, %v2705_v61 }
  0xb3   : > { %v2881_v26 = vrot.slane %v990_v39, %v2479_v59  ;;  %v2883_v45 = vpop.permute.xlu1 %311  ;;  %v2215_v53 = vpack.i.bf16 %v3314_v52, %v821_v57 }
  0xb4   : > { %v2885_v0 = vpop.permute.xlu0 %309  ;;  %v3036_v52 = vrot.slane %v1327_v58, %v2495_v11 }
  0xb5   : > { %v1054_v17 = vcombine.low %v2881_v26, %v2878_v13  ;;  %2191 = vrot.lane.b32.xlu0 %v2190_v25, %s2308_s23 }
  0xb7   : > { %v2897_v40 = vrot.slane %v1054_v17, %v2495_v11  ;;  %v2900_v54 = vpop.permute.xlu1 %315  ;;  %v1231_v17 = vcombine.high %v2648_v3, %v2672_v6  ;;  %v1279_v3 = vcombine.high %v2675_v7, %v2681_v8  ;;  %v959_v8 = vcombine.high %v2804_v19, %v2828_v50 }
  0xb8   : > { %v2902_v16 = vpop.permute.xlu0 %313  ;;  %v1110_v39 = vcombine.low %v2883_v45, %v2900_v54 }
  0xb9   : > { %v1094_v28 = vcombine.low %v2885_v0, %v2902_v16  ;;  %2201 = vrot.lane.b32.xlu0 %v2200_v10, %s2307_s22  ;;  %v2926_v10 = vrot.slane %v1247_v42, %v2479_v59  ;;  %v2932_v12 = vrot.slane %v1231_v17, %v2479_v59  ;;  %v975_v42 = vcombine.high %v2802_v34, %v2826_v49 }
  0xba   : > { %v1118_v24 = vrot.slane %v1110_v39, %v2479_v59  ;;  %v1095_v19 = vcombine.high %v2885_v0, %v2902_v16 }
  0xbb   : > { %v320_v38 = vpop.permute.xlu1 %319  ;;  %v1102_v9 = vrot.slane %v1094_v28, %v2479_v59  ;;  %v1263_v28 = vcombine.high %v2678_v29, %v2684_v30  ;;  %v1007_v29 = vcombine.high %v2843_v46, %v2862_v18  ;;  %v991_v30 = vcombine.high %v2845_v14, %v2864_v51 }
  0xbc   : > { %v318_v25 = vpop.permute.xlu0 %317  ;;  %v2963_v46 = vrot.slane %v975_v42, %v2479_v59  ;;  %v1055_v14 = vcombine.high %v2881_v26, %v2878_v13  ;;  %v2983_v13 = vrot.slane %v959_v8, %v2479_v59  ;;  %v1023_v26 = vcombine.high %v2859_v35, %v2856_v43 }
  0xbd   : > { %2206 = vrot.lane.b32.xlu0 %v2205_v31, %s2309_s24  ;;  %v1158_v21 = vcombine.low %v1102_v9, %v1118_v24  ;;  %v1159_v18 = vcombine.high %v1102_v9, %v1118_v24  ;;  %v2988_v61 = vrot.slane %v1007_v29, %v2479_v59  ;;  %v2996_v23 = vrot.slane %v991_v30, %v2479_v59 }
  0xbe   : > { %v3002_v24 = vrot.slane %v1095_v19, %v2479_v59  ;;  %v1069_v35 = vrot.slane %v1055_v14, %v2495_v11  ;;  %v3022_v42 = vrot.slane %v1263_v28, %v2479_v59  ;;  %v1038_v29 = vcombine.low %v2983_v13, %v2963_v46 }
  0xbf   : > { %v324_v37 = vpop.permute.xlu1 %323  ;;  %v2971_v60 = vrot.slane %v1158_v21, %v2495_v11  ;;  %v1173_v9 = vrot.slane %v1159_v18, %v2495_v11  ;;  %v1037_v21 = vrot.slane %v1023_v26, %v2495_v11  ;;  %v3033_v28 = vrot.slane %v1295_v41, %v2495_v11 }
  0xc0   : > { %v322_v4 = vpop.permute.xlu0 %321  ;;  %v1142_v6 = vcombine.low %v320_v38, %v324_v37  ;;  %v1143_v27 = vcombine.high %v320_v38, %v324_v37  ;;  %v1111_v38 = vcombine.high %v2883_v45, %v2900_v54  ;;  %v1087_v37 = vcombine.high %v2894_v2, %v2897_v40 }
  0xc1   : > { %v1126_v39 = vcombine.low %v318_v25, %v322_v4  ;;  %2211 = vrot.lane.b32.xlu0 %v2210_v56, %s2311_s25  ;;  %v1127_v31 = vcombine.high %v318_v25, %v322_v4  ;;  %v3013_v56 = vrot.slane %v1279_v3, %v2479_v59  ;;  %v1070_v3 = vcombine.low %v2996_v23, %v2988_v61 }
  0xc2   : > { %v1150_v20 = vrot.slane %v1142_v6, %v2479_v59  ;;  %v2974_v51 = vrot.slane %v1143_v27, %v2479_v59  ;;  %v2999_v17 = vrot.slane %v1111_v38, %v2479_v59  ;;  %v1088_v30 = vcombine.low %v1037_v21, %v1069_v35 }
  0xc3   : > { %v1134_v7 = vrot.slane %v1126_v39, %v2479_v59  ;;  %v2951_v34 = vpop.permute.xlu1 %368  ;;  %v2977_v45 = vrot.slane %v1127_v31, %v2479_v59  ;;  %v1359_v41 = vcombine.high %v2723_v32, %v2726_v33  ;;  %v1342_v58 = vcombine.low %v3022_v42, %v3013_v56 }
  0xc4   : > { %v2953_v49 = vpop.permute.xlu0 %366  ;;  %v1174_v8 = vcombine.low %v3002_v24, %v2999_v17  ;;  %v1071_v43 = vcombine.high %v2996_v23, %v2988_v61 }
  0xc5   : > { %v1190_v50 = vcombine.low %v1134_v7, %v1150_v20  ;;  %v1191_v25 = vcombine.high %v1134_v7, %v1150_v20  ;;  %2216 = vrot.lane.b32.xlu0 %v2215_v53, %s2312_s26  ;;  %v1206_v57 = vcombine.low %v2977_v45, %v2974_v51 }
  0xc7   : > { %v2980_v0 = vrot.slane %v1190_v50, %v2495_v11  ;;  %v1205_v62 = vrot.slane %v1191_v25, %v2495_v11  ;;  %v2991_v54 = vpop.permute.xlu1 %372  ;;  %v3039_v53 = vrot.slane %v1206_v57, %v2495_v11  ;;  %v1310_v50 = vcombine.low %v2932_v12, %v2926_v10 }
  0xc8   : > { %v2993_v16 = vpop.permute.xlu0 %370  ;;  %v1382_v6 = vcombine.low %v2951_v34, %v2991_v54 }
  0xc9   : > { %v1223_v4 = vcombine.high %v2971_v60, %v2980_v0  ;;  %v1366_v39 = vcombine.low %v2953_v49, %v2993_v16  ;;  %v1224_v7 = vcombine.low %v1173_v9, %v1205_v62  ;;  %v1225_v26 = vcombine.high %v1173_v9, %v1205_v62 }
  0xca   : > { %v1390_v38 = vrot.slane %v1382_v6, %v2479_v59  ;;  %v1089_v62 = vcombine.high %v1037_v21, %v1069_v35  ;;  %v1175_v35 = vcombine.high %v3002_v24, %v2999_v17  ;;  %v1383_v9 = vcombine.high %v2951_v34, %v2991_v54 }
  0xcb   : > { %v377_v27 = vpop.permute.xlu1 %376  ;;  %v2220_v31 = vpack.i.bf16 %v1223_v4, %v1087_v37  ;;  %v1374_v19 = vrot.slane %v1366_v39, %v2479_v59  ;;  %v2225_v18 = vpack.i.bf16 %v1224_v7, %v1088_v30  ;;  %v1078_v37 = vrot.slane %v1070_v3, %v2495_v11 }
  0xcc   : > { %v375_v20 = vpop.permute.xlu0 %374  ;;  %v1182_v4 = vrot.slane %v1174_v8, %v2495_v11  ;;  %v1046_v39 = vrot.slane %v1038_v29, %v2495_v11  ;;  %v1367_v61 = vcombine.high %v2953_v49, %v2993_v16 }
  0xcd   : > { %2221 = vrot.lane.b32.xlu1 %v2220_v31, %s2306_s21  ;;  %v1207_v31 = vcombine.high %v2977_v45, %v2974_v51  ;;  %v1430_v7 = vcombine.low %v1374_v19, %v1390_v38  ;;  %v2230_v45 = vpack.i.bf16 %v1225_v26, %v1089_v62  ;;  %v1431_v23 = vcombine.high %v1374_v19, %v1390_v38 }
  0xce   : > { %v1226_v8 = vcombine.low %v1182_v4, %v3039_v53  ;;  %v1227_v16 = vcombine.high %v1182_v4, %v3039_v53  ;;  %v1085_v38 = vrot.slane %v1071_v43, %v2495_v11  ;;  %v1189_v19 = vrot.slane %v1175_v35, %v2495_v11 }
  0xcf   : > { %v381_v25 = vpop.permute.xlu1 %380  ;;  %v3099_v26 = vrot.slane %v1383_v9, %v2479_v59 }
  0xd0   : > { %v379_v14 = vpop.permute.xlu0 %378  ;;  %v1414_v57 = vcombine.low %v377_v27, %v381_v25  ;;  %v1415_v29 = vcombine.high %v377_v27, %v381_v25  ;;  %v1221_v27 = vrot.slane %v1207_v31, %v2495_v11  ;;  %v1445_v31 = vrot.slane %v1431_v23, %v2495_v11 }
  0xd1   : > { %v1398_v6 = vcombine.low %v375_v20, %v379_v14  ;;  %2226 = vrot.lane.b32.xlu1 %v2225_v18, %s2305_s20  ;;  %v1399_v15 = vcombine.high %v375_v20, %v379_v14  ;;  %v3077_v20 = vrot.slane %v1430_v7, %v2495_v11  ;;  %v1091_v14 = vcombine.high %v1046_v39, %v1078_v37 }
  0xd2   : > { %v1422_v30 = vrot.slane %v1414_v57, %v2479_v59  ;;  %v1090_v57 = vcombine.low %v1046_v39, %v1078_v37  ;;  %v1228_v39 = vcombine.low %v1189_v19, %v1221_v27 }
  0xd3   : > { %v1406_v3 = vrot.slane %v1398_v6, %v2479_v59  ;;  %v3062_v44 = vpop.permute.xlu1 %392  ;;  %v1039_v6 = vcombine.high %v2983_v13, %v2963_v46  ;;  %v3083_v46 = vrot.slane %v1415_v29, %v2479_v59  ;;  %v3086_v34 = vrot.slane %v1399_v15, %v2479_v59 }
  0xd4   : > { %v3064_v51 = vpop.permute.xlu0 %390  ;;  %v2235_v24 = vpack.i.bf16 %v1226_v8, %v1090_v57  ;;  %v3102_v15 = vrot.slane %v1367_v61, %v2479_v59  ;;  %v1318_v29 = vrot.slane %v1310_v50, %v2495_v11  ;;  %v1229_v57 = vcombine.high %v1189_v19, %v1221_v27 }
  0xd5   : > { %v1462_v21 = vcombine.low %v1406_v3, %v1422_v30  ;;  %v1463_v18 = vcombine.high %v1406_v3, %v1422_v30  ;;  %2231 = vrot.lane.b32.xlu1 %v2230_v45, %s2308_s23  ;;  %v1053_v43 = vrot.slane %v1039_v6, %v2495_v11  ;;  %v1478_v62 = vcombine.low %v3086_v34, %v3083_v46 }
  0xd6   : > { %v2245_v30 = vpack.i.bf16 %v1227_v16, %v1091_v14  ;;  %v1311_v45 = vcombine.high %v2932_v12, %v2926_v10  ;;  %v1446_v35 = vcombine.low %v3102_v15, %v3099_v26  ;;  %v1361_v10 = vcombine.high %v3033_v28, %v3036_v52 }
  0xd7   : > { %v3080_v17 = vrot.slane %v1462_v21, %v2495_v11  ;;  %v1477_v49 = vrot.slane %v1463_v18, %v2495_v11  ;;  %v3089_v13 = vpop.permute.xlu1 %396  ;;  %v1092_v21 = vcombine.low %v1053_v43, %v1085_v38  ;;  %v1486_v12 = vrot.slane %v1478_v62, %v2495_v11 }
  0xd8   : > { %v3091_v54 = vpop.permute.xlu0 %394  ;;  %v1518_v4 = vcombine.low %v3062_v44, %v3089_v13  ;;  %v1454_v27 = vrot.slane %v1446_v35, %v2495_v11  ;;  %v1093_v19 = vcombine.high %v1053_v43, %v1085_v38  ;;  %v1447_v38 = vcombine.high %v3102_v15, %v3099_v26 }
  0xd9   : > { %v1494_v25 = vcombine.low %v3077_v20, %v3080_v17  ;;  %2236 = vrot.lane.b32.xlu1 %v2235_v24, %s2307_s22  ;;  %v1495_v53 = vcombine.high %v3077_v20, %v3080_v17  ;;  %v1502_v37 = vcombine.low %v3064_v51, %v3091_v54  ;;  %v1496_v8 = vcombine.low %v1445_v31, %v1477_v49 }
  0xda   : > { %v1526_v18 = vrot.slane %v1518_v4, %v2479_v59  ;;  %v2255_v23 = vpack.i.bf16 %v1228_v39, %v1092_v21  ;;  %v3315_v24 = vcombine.low %v3033_v28, %v3036_v52  ;;  %v1497_v14 = vcombine.high %v1445_v31, %v1477_v49 }
  0xdb   : > { %v401_v9 = vpop.permute.xlu1 %400  ;;  %v2240_v3 = vpack.i.bf16 %v1495_v53, %v1359_v41  ;;  %v1350_v41 = vrot.slane %v1342_v58, %v2495_v11  ;;  %v1510_v50 = vrot.slane %v1502_v37, %v2479_v59  ;;  %v1343_v4 = vcombine.high %v3022_v42, %v3013_v56 }
  0xdc   : > { %v399_v7 = vpop.permute.xlu0 %398  ;;  %v2250_v16 = vpack.i.bf16 %v1496_v8, %v3315_v24  ;;  %v1325_v37 = vrot.slane %v1311_v45, %v2495_v11  ;;  %v1479_v49 = vcombine.high %v3086_v34, %v3083_v46  ;;  %v2265_v31 = vpack.i.bf16 %v1229_v57, %v1093_v19 }
  0xdd   : > { %2246 = vrot.lane.b32.xlu1 %v2245_v30, %s2309_s24  ;;  %2241 = vrot.lane.b32.xlu0 %v2240_v3, %s2306_s21  ;;  %v1566_v39 = vcombine.low %v1510_v50, %v1526_v18  ;;  %v1362_v52 = vcombine.low %v1318_v29, %v1350_v41  ;;  %v2260_v56 = vpack.i.bf16 %v1497_v14, %v1361_v10 }
  0xde   : > { %v1498_v42 = vcombine.low %v1454_v27, %v1486_v12  ;;  %v1519_v43 = vcombine.high %v3062_v44, %v3089_v13  ;;  %v1357_v45 = vrot.slane %v1343_v4, %v2495_v11  ;;  %v1503_v46 = vcombine.high %v3064_v51, %v3091_v54 }
  0xdf   : > { %v405_v6 = vpop.permute.xlu1 %404  ;;  %v1567_v34 = vcombine.high %v1510_v50, %v1526_v18  ;;  %v1493_v26 = vrot.slane %v1479_v49, %v2495_v11  ;;  %v1363_v44 = vcombine.high %v1318_v29, %v1350_v41  ;;  %v1499_v13 = vcombine.high %v1454_v27, %v1486_v12 }
  0xe0   : > { %v403_v61 = vpop.permute.xlu0 %402  ;;  %v1550_v53 = vcombine.low %v401_v9, %v405_v6  ;;  %v1551_v30 = vcombine.high %v401_v9, %v405_v6  ;;  %v3157_v9 = vrot.slane %v1566_v39, %v2495_v11  ;;  %v2270_v15 = vpack.i.bf16 %v1498_v42, %v1362_v52 }
  0xe1   : > { %v1534_v58 = vcombine.low %v399_v7, %v403_v61  ;;  %2256 = vrot.lane.b32.xlu1 %v2255_v23, %s2311_s25  ;;  %2251 = vrot.lane.b32.xlu0 %v2250_v16, %s2305_s20  ;;  %v1535_v3 = vcombine.high %v399_v7, %v403_v61  ;;  %v1461_v54 = vrot.slane %v1447_v38, %v2495_v11  ;;  %v2314_v42 = vmov 0  }
  0xe2   : > { %v1558_v62 = vrot.slane %v1550_v53, %v2479_v59  ;;  %v1565_v21 = vrot.slane %v1551_v30, %v2479_v59  ;;  %v1533_v50 = vrot.slane %v1519_v43, %v2479_v59  ;;  %v1517_v29 = vrot.slane %v1503_v46, %v2479_v59  ;;  %2291 = vset.pattern.permute.xlu0 %v2314_v42  ;;  %v1967_v30 = vld [vmem:[%s3302_s2] sm:$0xff] }
  0xe3   : > { %v1542_v28 = vrot.slane %v1534_v58, %v2479_v59  ;;  %v1549_v57 = vrot.slane %v1535_v3, %v2479_v59  ;;  %v1581_v41 = vrot.slane %v1567_v34, %v2495_v11  ;;  %v2275_v12 = vpack.i.bf16 %v1499_v13, %v1363_v44  ;;  %2290 = vset.pattern.permute.xlu1 %v2314_v42 }
  0xe4   : > { %v1364_v6 = vcombine.low %v1325_v37, %v1357_v45  ;;  %v1500_v61 = vcombine.low %v1461_v54, %v1493_v26  ;;  %v1582_v16 = vcombine.low %v1517_v29, %v1533_v50  ;;  %v1365_v58 = vcombine.high %v1325_v37, %v1357_v45 }
  0xe5   : > { %v1598_v8 = vcombine.low %v1542_v28, %v1558_v62  ;;  %v1599_v35 = vcombine.high %v1542_v28, %v1558_v62  ;;  %2266 = vrot.lane.b32.xlu1 %v2265_v31, %s2312_s26  ;;  %2261 = vrot.lane.b32.xlu0 %v2260_v56, %s2308_s23  ;;  %v1614_v23 = vcombine.low %v1549_v57, %v1565_v21  ;;  %v3316_v37 = vmov 0.0  }
  0xe6   : > { %v1615_v14 = vcombine.high %v1549_v57, %v1565_v21  ;;  %v2280_v53 = vpack.i.bf16 %v1500_v61, %v1364_v6  ;;  %v1501_v4 = vcombine.high %v1461_v54, %v1493_v26  ;;  %v1583_v19 = vcombine.high %v1517_v29, %v1533_v50  ;;  %2124 = vmatprep.mubr.msk.bf16.mxu0 %vm2313_vm2, %v3316_v37 }
  0xe7   : > { %v3160_v7 = vrot.slane %v1598_v8, %v2495_v11  ;;  %v1613_v51 = vrot.slane %v1599_v35, %v2495_v11  ;;  %v1622_v59 = vrot.slane %v1614_v23, %v2495_v11  ;;  %v1590_v39 = vrot.slane %v1582_v16, %v2495_v11 }
  0xe8   : > { %v2285_v62 = vpack.i.bf16 %v1501_v4, %v1365_v58  ;;  %v1629_v28 = vrot.slane %v1615_v14, %v2495_v11  ;;  %v1597_v49 = vrot.slane %v1583_v19, %v2495_v11  ;;  %v1968_v11 = vld [vmem:[%s3302_s2 + $0x8] sm:$0xff]  ;;  %v3317_v44 = vcombine.low %v2759_v48, %v2762_v1 }
  0xe9   : > { %v1631_v10 = vcombine.high %v3157_v9, %v3160_v7  ;;  %2271 = vrot.lane.b32.xlu1 %v2270_v15, %s2307_s22  ;;  %v1630_v18 = vcombine.low %v3157_v9, %v3160_v7  ;;  %v1632_v24 = vcombine.low %v1581_v41, %v1613_v51  ;;  %v1633_v27 = vcombine.high %v1581_v41, %v1613_v51 }
  0xea   : > { %v1634_v52 = vcombine.low %v1590_v39, %v1622_v59  ;;  %v1636_v31 = vcombine.low %v1597_v49, %v1629_v28  ;;  %v1635_v56 = vcombine.high %v1590_v39, %v1622_v59  ;;  %v1637_v3 = vcombine.high %v1597_v49, %v1629_v28 }
  0xeb   : > { %1663 = vrot.lane.b32.xlu0 %v1631_v10, %s2306_s21  ;;  %v3318_v21 = vcombine.low %v2506_v22, %v2521_v36 }
  0xed   : > { %2276 = vrot.lane.b32.xlu1 %v2275_v12, %s2309_s24 }
  0xef   : > { %1699 = vrot.lane.b32.xlu0 %v1632_v24, %s2305_s20 }
  0xf1   : > { %2281 = vrot.lane.b32.xlu1 %v2280_v53, %s2311_s25 }
  0xf3   : > { %1735 = vrot.lane.b32.xlu0 %v1633_v27, %s2308_s23 }
  0xf5   : > { %2286 = vrot.lane.b32.xlu1 %v2285_v62, %s2312_s26 }
  0xf7   : > { %1771 = vrot.lane.b32.xlu0 %v1634_v52, %s2307_s22 }
  0xf9   : > { %1843 = vrot.lane.b32.xlu1 %v1636_v31, %s2311_s25 }
  0xfb   : > { %1807 = vrot.lane.b32.xlu0 %v1635_v56, %s2309_s24 }
  0xfd   : > { %1971 = vperm.xlu1 %2290, %v1967_v30  }
  0xff   : > { %1879 = vrot.lane.b32.xlu0 %v1637_v3, %s2312_s26 }
 0x103   : > { %1976 = vperm.xlu0 %2291, %v1968_v11  }
 0x10f   : > { %v2157_v8 = vpop.permute.xlu1 %2156  ;;  %v2152_v35 = vpop.permute.xlu0 %2151 }
 0x110   : > { %v2154_v43 = vunpack.i.h.bf16 %v2152_v35  ;;  %v2153_v45 = vunpack.i.l.bf16 %v2152_v35  ;;  %v2159_v34 = vunpack.i.h.bf16 %v2157_v8  ;;  %v2158_v26 = vunpack.i.l.bf16 %v2157_v8 }
 0x112   : > { %v1892_v13 = vsel %vm1890_vm3, %v3317_v44, %v2154_v43  ;;  %v1891_v57 = vsel %vm1890_vm3, %v3318_v21, %v2153_v45 }
 0x113   : > { %v2167_v38 = vpop.permute.xlu1 %2166  ;;  %v2162_v46 = vpop.permute.xlu0 %2161  ;;  %v1901_v29 = vsel %vm1900_vm4, %v1891_v57, %v2158_v26  ;;  %v1902_v41 = vsel %vm1900_vm4, %v1892_v13, %v2159_v34  ;;  %v3320_v26 = vcombine.low %v2549_v63, %v2552_v5 }
 0x114   : > { %v2164_v10 = vunpack.i.h.bf16 %v2162_v46  ;;  %v2163_v51 = vunpack.i.l.bf16 %v2162_v46  ;;  %v2169_v54 = vunpack.i.h.bf16 %v2167_v38  ;;  %v2168_v50 = vunpack.i.l.bf16 %v2167_v38 }
 0x115   : > { %v3319_v46 = vcombine.low %v2815_v47, %v2818_v55 }
 0x116   : > { %v1911_v48 = vsel %vm1910_vm5, %v1901_v29, %v2163_v51  ;;  %v1912_v1 = vsel %vm1910_vm5, %v1902_v41, %v2164_v10 }
 0x117   : > { %v2177_v15 = vpop.permute.xlu1 %2176  ;;  %v1921_v23 = vsel %vm1920_vm6, %v1911_v48, %v2168_v50  ;;  %v1922_v24 = vsel %vm1920_vm6, %v1912_v1, %v2169_v54 }
 0x118   : > { %v2179_v6 = vunpack.i.h.bf16 %v2177_v15  ;;  %v2178_v61 = vunpack.i.l.bf16 %v2177_v15 }
 0x11a   : > { %v1931_v53 = vsel %vm1930_vm7, %v1921_v23, %v2178_v61  ;;  %v1932_v58 = vsel %vm1930_vm7, %v1922_v24, %v2179_v6 }
 0x11b   : > { %v2187_v12 = vpop.permute.xlu1 %2186 }
 0x11c   : > { %v2189_v22 = vunpack.i.h.bf16 %v2187_v12  ;;  %v2188_v36 = vunpack.i.l.bf16 %v2187_v12 }
 0x11e   : > { %v1941_v59 = vsel %vm1940_vm8, %v1931_v53, %v2188_v36  ;;  %v1942_v19 = vsel %vm1940_vm8, %v1932_v58, %v2189_v22 }
 0x11f   : > { %v2197_v16 = vpop.permute.xlu1 %2196  ;;  %v2172_v14 = vpop.permute.xlu0 %2171 }
 0x120   : > { %v2199_v4 = vunpack.i.h.bf16 %v2197_v16  ;;  %v2198_v27 = vunpack.i.l.bf16 %v2197_v16  ;;  %v2174_v42 = vunpack.i.h.bf16 %v2172_v14  ;;  %v2173_v30 = vunpack.i.l.bf16 %v2172_v14 }
 0x122   : > { %v1951_v39 = vsel %vm1950_vm9, %v1941_v59, %v2198_v27  ;;  %v1952_v62 = vsel %vm1950_vm9, %v1942_v19, %v2199_v4  ;;  %v1893_v34 = vsel %vm1890_vm3, %v3319_v46, %v2173_v30  ;;  %v1894_v15 = vsel %vm1890_vm3, %v3320_v26, %v2174_v42 }
 0x123   : > { %v2182_v28 = vpop.permute.xlu0 %2181  ;;  %v1960_v52 = vpack.c.bf16 %v1952_v62, %v1951_v39  ;;  %v3322_v42 = vcombine.low %v2971_v60, %v2980_v0 }
 0x124   : > { %v2184_v3 = vunpack.i.h.bf16 %v2182_v28  ;;  %v2183_v11 = vunpack.i.l.bf16 %v2182_v28 }
 0x125   : > { %2115 = vmatpush3.bf16.msra.mxu0 %v1960_v52 }
 0x126   : > { %2116 = vmatprep.subr.bf16.mxu0 %v3316_v37  ;;  %v1903_v21 = vsel %vm1900_vm4, %v1893_v34, %v2183_v11  ;;  %v1904_v57 = vsel %vm1900_vm4, %v1894_v15, %v2184_v3 }
 0x127   : > { %v2192_v49 = vpop.permute.xlu0 %2191 }
 0x128   : > { %v2194_v8 = vunpack.i.h.bf16 %v2192_v49  ;;  %v2193_v35 = vunpack.i.l.bf16 %v2192_v49 }
 0x12a   : > { %v1913_v54 = vsel %vm1910_vm5, %v1903_v21, %v2193_v35  ;;  %v1914_v50 = vsel %vm1910_vm5, %v1904_v57, %v2194_v8 }
 0x12b   : > { %v2202_v31 = vpop.permute.xlu0 %2201 }
 0x12c   : > { %v2204_v38 = vunpack.i.h.bf16 %v2202_v31  ;;  %v2203_v43 = vunpack.i.l.bf16 %v2202_v31  ;;  %v3321_v31 = vcombine.low %v2894_v2, %v2897_v40 }
 0x12e   : > { %v1923_v47 = vsel %vm1920_vm6, %v1913_v54, %v2203_v43  ;;  %v1924_v55 = vsel %vm1920_vm6, %v1914_v50, %v2204_v38 }
 0x12f   : > { %v2207_v56 = vpop.permute.xlu0 %2206 }
 0x130   : > { %v2209_v44 = vunpack.i.h.bf16 %v2207_v56  ;;  %v2208_v13 = vunpack.i.l.bf16 %v2207_v56 }
 0x132   : > { %v1933_v63 = vsel %vm1930_vm7, %v1923_v47, %v2208_v13  ;;  %v1934_v5 = vsel %vm1930_vm7, %v1924_v55, %v2209_v44 }
 0x133   : > { %v2212_v45 = vpop.permute.xlu0 %2211 }
 0x134   : > { %v2214_v10 = vunpack.i.h.bf16 %v2212_v45  ;;  %v2213_v51 = vunpack.i.l.bf16 %v2212_v45 }
 0x136   : > { %v1943_v48 = vsel %vm1940_vm8, %v1933_v63, %v2213_v51  ;;  %v1944_v1 = vsel %vm1940_vm8, %v1934_v5, %v2214_v10 }
 0x137   : > { %v2217_v29 = vpop.permute.xlu0 %2216 }
 0x138   : > { %v2219_v41 = vunpack.i.h.bf16 %v2217_v29  ;;  %v2218_v12 = vunpack.i.l.bf16 %v2217_v29 }
 0x13a   : > { %v1953_v6 = vsel %vm1950_vm9, %v1943_v48, %v2218_v12  ;;  %v1954_v61 = vsel %vm1950_vm9, %v1944_v1, %v2219_v41 }
 0x13b   : > { %v1961_v22 = vpack.c.bf16 %v1954_v61, %v1953_v6 }
 0x13d   : > { %2117 = vmatpush3.bf16.msra.mxu0 %v1961_v22 }
 0x13e   : > { %2118 = vmatprep.subr.bf16.mxu0 %v3316_v37 }
 0x13f   : > { %v2222_v36 = vpop.permute.xlu1 %2221 }
 0x140   : > { %v2224_v58 = vunpack.i.h.bf16 %v2222_v36  ;;  %v2223_v4 = vunpack.i.l.bf16 %v2222_v36  ;;  %v3323_v36 = vcombine.low %v2723_v32, %v2726_v33 }
 0x142   : > { %v1895_v56 = vsel %vm1890_vm3, %v3321_v31, %v2223_v4  ;;  %v1896_v30 = vsel %vm1890_vm3, %v3322_v42, %v2224_v58 }
 0x143   : > { %v2227_v23 = vpop.permute.xlu1 %2226 }
 0x144   : > { %v2229_v27 = vunpack.i.h.bf16 %v2227_v23  ;;  %v2228_v59 = vunpack.i.l.bf16 %v2227_v23 }
 0x146   : > { %v1905_v8 = vsel %vm1900_vm4, %v1895_v56, %v2228_v59  ;;  %v1906_v35 = vsel %vm1900_vm4, %v1896_v30, %v2229_v27 }
 0x147   : > { %v2232_v24 = vpop.permute.xlu1 %2231 }
 0x148   : > { %v2234_v19 = vunpack.i.h.bf16 %v2232_v24  ;;  %v2233_v39 = vunpack.i.l.bf16 %v2232_v24 }
 0x14a   : > { %v1915_v45 = vsel %vm1910_vm5, %v1905_v8, %v2233_v39  ;;  %v1916_v46 = vsel %vm1910_vm5, %v1906_v35, %v2234_v19 }
 0x14b   : > { %v2237_v16 = vpop.permute.xlu1 %2236 }
 0x14c   : > { %v2239_v62 = vunpack.i.h.bf16 %v2237_v16  ;;  %v2238_v28 = vunpack.i.l.bf16 %v2237_v16 }
 0x14e   : > { %v1925_v2 = vsel %vm1920_vm6, %v1915_v45, %v2238_v28  ;;  %v1926_v40 = vsel %vm1920_vm6, %v1916_v46, %v2239_v62 }
 0x14f   : > { %v2247_v14 = vpop.permute.xlu1 %2246  ;;  %v2242_v53 = vpop.permute.xlu0 %2241 }
 0x150   : > { %v2249_v3 = vunpack.i.h.bf16 %v2247_v14  ;;  %v2248_v11 = vunpack.i.l.bf16 %v2247_v14  ;;  %v2244_v55 = vunpack.i.h.bf16 %v2242_v53  ;;  %v2243_v29 = vunpack.i.l.bf16 %v2242_v53 }
 0x152   : > { %v1935_v60 = vsel %vm1930_vm7, %v1925_v2, %v2248_v11  ;;  %v1936_v0 = vsel %vm1930_vm7, %v1926_v40, %v2249_v3  ;;  %v1898_v22 = vsel %vm1890_vm3, %v1494_v25, %v2244_v55  ;;  %v1897_v23 = vsel %vm1890_vm3, %v3323_v36, %v2243_v29  ;;  %v2292_v2 = vld [vmem:[%s3301_s1] sm:$0xff]  }
 0x153   : > { %v2257_v52 = vpop.permute.xlu1 %2256  ;;  %v2252_v49 = vpop.permute.xlu0 %2251 }
 0x154   : > { %v2259_v38 = vunpack.i.h.bf16 %v2257_v52  ;;  %v2258_v43 = vunpack.i.l.bf16 %v2257_v52  ;;  %v2254_v5 = vunpack.i.h.bf16 %v2252_v49  ;;  %v2253_v41 = vunpack.i.l.bf16 %v2252_v49 }
 0x156   : > { %v1945_v13 = vsel %vm1940_vm8, %v1935_v60, %v2258_v43  ;;  %v1946_v21 = vsel %vm1940_vm8, %v1936_v0, %v2259_v38  ;;  %v1907_v53 = vsel %vm1900_vm4, %v1897_v23, %v2253_v41  ;;  %v1908_v58 = vsel %vm1900_vm4, %v1898_v22, %v2254_v5 }
 0x157   : > { %v2267_v34 = vpop.permute.xlu1 %2266  ;;  %v2262_v44 = vpop.permute.xlu0 %2261 }
 0x158   : > { %v2269_v26 = vunpack.i.h.bf16 %v2267_v34  ;;  %v2268_v15 = vunpack.i.l.bf16 %v2267_v34  ;;  %v2264_v12 = vunpack.i.h.bf16 %v2262_v44  ;;  %v2263_v48 = vunpack.i.l.bf16 %v2262_v44 }
 0x15a   : > { %v1955_v57 = vsel %vm1950_vm9, %v1945_v13, %v2268_v15  ;;  %v1956_v10 = vsel %vm1950_vm9, %v1946_v21, %v2269_v26  ;;  %v1917_v59 = vsel %vm1910_vm5, %v1907_v53, %v2263_v48  ;;  %v1918_v20 = vsel %vm1910_vm5, %v1908_v58, %v2264_v12 }
 0x15b   : > { %v2272_v51 = vpop.permute.xlu1 %2271  ;;  %v1962_v54 = vpack.c.bf16 %v1956_v10, %v1955_v57 }
 0x15c   : > { %v2274_v1 = vunpack.i.h.bf16 %v2272_v51  ;;  %v2273_v6 = vunpack.i.l.bf16 %v2272_v51 }
 0x15d   : > { %v1664_v50 = vpop.permute.xlu0 %1663  ;;  %2119 = vmatpush3.bf16.msra.mxu0 %v1962_v54 }
 0x15e   : > { %2120 = vmatprep.subr.bf16.mxu0 %v3316_v37  ;;  %v1927_v17 = vsel %vm1920_vm6, %v1917_v59, %v2273_v6  ;;  %v1928_v25 = vsel %vm1920_vm6, %v1918_v20, %v2274_v1  ;;  %v1899_v52 = vsel %vm1890_vm3, %v1630_v18, %v1664_v50 }
 0x15f   : > { %v2277_v47 = vpop.permute.xlu1 %2276 }
 0x160   : > { %v2279_v24 = vunpack.i.h.bf16 %v2277_v47  ;;  %v2278_v16 = vunpack.i.l.bf16 %v2277_v47 }
 0x161   : > { %v1700_v63 = vpop.permute.xlu0 %1699 }
 0x162   : > { %v1937_v33 = vsel %vm1930_vm7, %v1927_v17, %v2278_v16  ;;  %v1938_v19 = vsel %vm1930_vm7, %v1928_v25, %v2279_v24  ;;  %v1909_v56 = vsel %vm1900_vm4, %v1899_v52, %v1700_v63 }
 0x163   : > { %v2282_v61 = vpop.permute.xlu1 %2281 }
 0x164   : > { %v2284_v4 = vunpack.i.h.bf16 %v2282_v61  ;;  %v2283_v27 = vunpack.i.l.bf16 %v2282_v61 }
 0x165   : > { %v1736_v14 = vpop.permute.xlu0 %1735 }
 0x166   : > { %v1947_v49 = vsel %vm1940_vm8, %v1937_v33, %v2283_v27  ;;  %v1948_v31 = vsel %vm1940_vm8, %v1938_v19, %v2284_v4  ;;  %v1919_v3 = vsel %vm1910_vm5, %v1909_v56, %v1736_v14 }
 0x167   : > { %v2287_v32 = vpop.permute.xlu1 %2286 }
 0x168   : > { %v2289_v39 = vunpack.i.h.bf16 %v2287_v32  ;;  %v2288_v62 = vunpack.i.l.bf16 %v2287_v32 }
 0x169   : > { %v1772_v28 = vpop.permute.xlu0 %1771 }
 0x16a   : > { %v1957_v42 = vsel %vm1950_vm9, %v1947_v49, %v2288_v62  ;;  %v1958_v30 = vsel %vm1950_vm9, %v1948_v31, %v2289_v39  ;;  %v1929_v8 = vsel %vm1920_vm6, %v1919_v3, %v1772_v28 }
 0x16b   : > { %v1963_v11 = vpack.c.bf16 %v1958_v30, %v1957_v42  ;;  %v1844_v7 = vpop.permute.xlu1 %1843 }
 0x16d   : > { %v1808_v35 = vpop.permute.xlu0 %1807  ;;  %2121 = vmatpush3.bf16.msra.mxu0 %v1963_v11 }
 0x16e   : > { %v1939_v9 = vsel %vm1930_vm7, %v1929_v8, %v1808_v35  ;;  %2122 = vmatprep.subr.bf16.mxu0 %v3316_v37 }
 0x16f   : > { %v1949_v18 = vsel %vm1940_vm8, %v1939_v9, %v1844_v7 }
 0x171   : > { %v1880_v38 = vpop.permute.xlu0 %1879 }
 0x172   : > { %v1959_v43 = vsel %vm1950_vm9, %v1949_v18, %v1880_v38 }
 0x173   : > { %v1964_v45 = vpack.c.bf16 %v1959_v43, %v1959_v43 }
 0x175   : > { %v1990_v46 = vsel %vm1988_vm10, %v1964_v45, 0 }
 0x176   : > { %2123 = vmatpush3.bf16.msra.mxu0 %v1990_v46 }
 0x179   : > { %2125 = vmatmul.mubr.msk.bf16.vlgmr.msra.gmra.mrb[0].mxu0 %vm1984_vm11, %v2292_v2 }
 0x17c   : > { %v1972_v40 = vpop.permute.xlu1 %1971 }
 0x182   : > { %v1977_v37 = vpop.permute.xlu0 %1976 }
 0x24c   : > { %v2026_v34 = vpop.f32.mrb[0].mxu0 }
 0x24d   : > { %v2027_v60 = vadd.f32 %v2026_v34, %v1972_v40  ;;  %v2126_v0 = vpop.f32.mrb[1].mxu0 }
 0x24e   : > { %v2029_v26 = vpop.f32.mrb[2].mxu0 }
 0x24f   : > { %v2033_v15 = vmax.f32 %v2027_v60, 0.0  ;;  %v2030_v44 = vadd.f32 %v2029_v26, %v1977_v37  ;;  %v2127_v13 = vpop.f32.mrb[3].mxu0 }
 0x251   : > { %2036 = vst.msk [vmem:[%s170_s9] sm:$0xff] %vm2035_vm12, %v2033_v15  ;;  %v2034_v21 = vmax.f32 %v2030_v44, 0.0 }
 0x253   : > { %2037 = vst.msk [vmem:[%s170_s9 + $0x8] sm:$0xff] %vm2035_vm12, %v2034_v21 }
 0x254 PF: > { %s13_s12 = sadd.s32 1, %s2299_s12  }
 0x255   : > { %p10_p4 = scmp.ge.s32.totalorder %s13_s12, 6  }
 0x257   :  { %12 = sbr.rel (!%p10_p4) target bundleno = 1 (0x1), region = 62 }

</bundles_post_ra>
